<compile_context>
chip_gen: v5e
topology: v5e:2x2
jax: 0.10.0
libtpu: 0.0.40
codegen_flags: <defaults>
</compile_context>

<pallas_src>
import functools
import math

import jax
import jax.numpy as jnp
from jax import lax
from jax.experimental import pallas as pl
from jax.experimental.pallas import tpu as pltpu


# ----------------------------------------------------------------------------
# Kernel
# ----------------------------------------------------------------------------
def _mhsa_kernel(x_ref, mask_ref, wq_ref, wk_ref, wv_ref,
                 bq_ref, bk_ref, bv_ref, wo_ref, bo_ref,
                 out_ref, acc_ref, *, n_heads, head_dim, block_b, seq_len):
    S = seq_len
    dh = head_dim
    D = n_heads * dh
    rows = block_b * S

    x = x_ref[...].reshape(rows, D)                 # bf16 (Bt*S, D)
    km = mask_ref[...] == 0.0                       # (Bt, 1, S) key-padding mask
    neg_min = jnp.float32(jnp.finfo(jnp.float32).min)

    acc_ref[...] = jnp.zeros_like(acc_ref)          # f32 (Bt*S, D) output accum

    def head_body(h, carry):
        # Per-head projections: full-depth (K = D) contraction; heads indexed
        # along a leading ref dim -> no sub-128-lane slicing anywhere.
        # 1/sqrt(dh) is already folded into wq/bq.
        q = jnp.dot(x, wq_ref[h], preferred_element_type=jnp.float32) + bq_ref[h]
        k = jnp.dot(x, wk_ref[h], preferred_element_type=jnp.float32) + bk_ref[h]
        v = jnp.dot(x, wv_ref[h], preferred_element_type=jnp.float32) + bv_ref[h]
        qb = q.reshape(block_b, S, dh).astype(jnp.bfloat16)
        kb = k.reshape(block_b, S, dh).astype(jnp.bfloat16)
        vb = v.reshape(block_b, S, dh).astype(jnp.bfloat16)

        # q @ k^T batched over Bt; contract last dims (no transposed copy).
        scores = lax.dot_general(qb, kb, (((2,), (2,)), ((0,), (0,))),
                                 preferred_element_type=jnp.float32)  # (Bt,S,S)
        scores = jnp.where(km, neg_min, scores)

        # Numerically stable softmax in f32; divide goes to the EUP.
        m = jnp.max(scores, axis=-1, keepdims=True)
        e = jnp.exp(scores - m)
        denom = jnp.sum(e, axis=-1, keepdims=True)
        p = (e * pl.reciprocal(denom, approx=True)).astype(jnp.bfloat16)
        # TODO(synk): attention dropout is identity at inference; not applied.

        ctx = lax.dot_general(p, vb, (((2,), (1,)), ((0,), (0,))),
                              preferred_element_type=jnp.float32)     # (Bt,S,dh)

        # Fold output projection per head: acc += ctx_h @ Wo_h (lane-dense N=D).
        acc_ref[...] += jnp.dot(ctx.reshape(rows, dh).astype(jnp.bfloat16),
                                wo_ref[h], preferred_element_type=jnp.float32)
        return carry

    lax.fori_loop(0, n_heads, head_body, 0)

    out = acc_ref[...] + bo_ref[...]
    out_ref[...] = out.reshape(block_b, S, D).astype(out_ref.dtype)


# ----------------------------------------------------------------------------
# One-time weight preparation (hoisted out of the per-call wrapper)
# ----------------------------------------------------------------------------
def prepare_mhsa_params(params, *, n_heads, compute_dtype=jnp.bfloat16):
    """Pack PyTorch-layout Linear weights into the kernel's per-head layout.

    PyTorch Linear stores W as (out, in) and computes x @ W^T + b.  We
    pre-transpose, split per head, fold 1/sqrt(head_dim) into Wq/bq and cast
    matmul operands to `compute_dtype` (accumulation stays f32 in-kernel).
    Call this ONCE per set of weights.
    """
    D = params["wq"].shape[0]
    assert D % n_heads == 0
    dh = D // n_heads
    scale = 1.0 / math.sqrt(dh)

    def split_w(w, s=1.0):
        # (out=D, in=D) -> W^T (in, out) -> (D, H, dh) -> (H, D, dh)
        return (w.T * s).reshape(D, n_heads, dh).transpose(1, 0, 2).astype(compute_dtype)

    def split_b(b, s=1.0):
        return (b * s).reshape(n_heads, 1, dh).astype(jnp.float32)

    # TODO(synk): on v7x, fp8(e4m3) weights would halve resident weight VMEM;
    # needs accuracy validation before enabling, so bf16 is used everywhere.
    return {
        "n_heads": n_heads,
        "wq": split_w(params["wq"], scale), "bq": split_b(params["bq"], scale),
        "wk": split_w(params["wk"]),        "bk": split_b(params["bk"]),
        "wv": split_w(params["wv"]),        "bv": split_b(params["bv"]),
        # out_lin: ctx @ Wo^T + bo; rows of Wo^T grouped per head -> (H, dh, D)
        "wo": params["wo"].T.reshape(n_heads, dh, D).astype(compute_dtype),
        "bo": params["bo"].reshape(1, D).astype(jnp.float32),
    }


# ----------------------------------------------------------------------------
# Generation-aware blocking / VMEM budgeting
# ----------------------------------------------------------------------------
def _tpu_vmem_and_cores():
    vmem_cap = 64 * 2**20              # conservative fallback (v7x per-TC VMEM)
    n_cores = None
    try:
        info = pltpu.get_tpu_info()
        for name in ("vmem_capacity_bytes", "vmem_bytes", "vmem_size_bytes"):
            v = getattr(info, name, None)
            if v:
                vmem_cap = int(v)
                break
        for name in ("num_cores", "tensorcores_per_chip", "core_count"):
            v = getattr(info, name, None)
            if v:
                n_cores = int(v)
                break
    except Exception:
        pass
    if n_cores is None:
        # Heuristic: v7x has 64 MiB VMEM per TC and 2 TCs/chip; v5e/v6e have
        # 128 MiB and a single TC.
        n_cores = 2 if vmem_cap < 100 * 2**20 else 1
    return vmem_cap, n_cores


def _vmem_bytes_estimate(bt, S, D, n_heads, out_itemsize):
    dh = D // n_heads
    rows = bt * S
    xin = 2 * rows * D * 2                     # bf16 input block, double-buffered
    outb = 2 * rows * D * out_itemsize         # output block, double-buffered
    maskb = 2 * bt * S * 4
    wts = (3 * D * D + D * D) * 2              # bf16 weights, single-buffered
    bias = 4 * D * 4
    acc = rows * D * 4                         # f32 output accumulator scratch
    scores = bt * S * S * (4 + 4 + 2)          # scores / exp / bf16 weights
    qkv = rows * dh * 3 * (4 + 2)              # per-head q,k,v f32 + bf16 copies
    return xin + outb + maskb + wts + bias + acc + scores + qkv


def _pick_block_b(bs, S, D, n_heads, out_itemsize, vmem_cap, n_cores):
    budget = int(0.55 * vmem_cap)              # per-step working-set budget
    best = 1
    for bt in range(1, bs + 1):
        if bs % bt:
            continue
        # Keep >= n_cores grid steps only on multi-TC chips (v7x megacore);
        # on single-TC v5e/v6e block_b may cover the whole batch.
        if n_cores > 1 and bs >= n_cores and bs // bt < n_cores:
            continue
        if _vmem_bytes_estimate(bt, S, D, n_heads, out_itemsize) <= budget:
            best = bt
    return best


# ----------------------------------------------------------------------------
# Wrapper
# ----------------------------------------------------------------------------
def multi_head_self_attention(x, mask, packed, *, block_b=None, out_dtype=None):
    """DistilBERT MultiHeadSelfAttention forward with query = key = value = x.

    x: (bs, S, D); mask: (bs, S) with 1 = attend, 0 = padded key.
    `packed` comes from prepare_mhsa_params().  Returns context (bs, S, D).
    """
    # TODO(synk): cross-attention (distinct query/key/value), head_mask and
    # output_attentions (returning the weights) are not covered by this fused
    # self-attention kernel; DistilBERT inference never uses them.
    bs, S, D = x.shape
    n_heads = packed["n_heads"]
    assert D % n_heads == 0
    dh = D // n_heads
    out_dtype = x.dtype if out_dtype is None else out_dtype
    out_itemsize = jnp.dtype(out_dtype).itemsize

    vmem_cap, n_cores = _tpu_vmem_and_cores()
    if block_b is None:
        block_b = _pick_block_b(bs, S, D, n_heads, out_itemsize, vmem_cap, n_cores)
    assert bs % block_b == 0

    est = _vmem_bytes_estimate(block_b, S, D, n_heads, out_itemsize)
    vmem_limit = min(int(0.92 * vmem_cap), max(int(1.5 * est), 32 * 2**20))

    x_bf16 = x.astype(jnp.bfloat16)                  # halves activation DMA
    mask3 = mask.reshape(bs, 1, S).astype(jnp.float32)

    kernel = functools.partial(_mhsa_kernel, n_heads=n_heads, head_dim=dh,
                               block_b=block_b, seq_len=S)
    grid = (bs // block_b,)

    def build(single_buffer_weights):
        if single_buffer_weights:
            w_kw = dict(pipeline_mode=pl.Buffered(1))   # resident, no 2x VMEM
        else:
            w_kw = {}
        in_specs = [
            pl.BlockSpec((block_b, S, D), lambda i: (i, 0, 0)),
            pl.BlockSpec((block_b, 1, S), lambda i: (i, 0, 0)),
            pl.BlockSpec((n_heads, D, dh), lambda i: (0, 0, 0), **w_kw),
            pl.BlockSpec((n_heads, D, dh), lambda i: (0, 0, 0), **w_kw),
            pl.BlockSpec((n_heads, D, dh), lambda i: (0, 0, 0), **w_kw),
            pl.BlockSpec((n_heads, 1, dh), lambda i: (0, 0, 0), **w_kw),
            pl.BlockSpec((n_heads, 1, dh), lambda i: (0, 0, 0), **w_kw),
            pl.BlockSpec((n_heads, 1, dh), lambda i: (0, 0, 0), **w_kw),
            pl.BlockSpec((n_heads, dh, D), lambda i: (0, 0, 0), **w_kw),
            pl.BlockSpec((1, D), lambda i: (0, 0), **w_kw),
        ]
        return pl.pallas_call(
            kernel,
            out_shape=jax.ShapeDtypeStruct((bs, S, D), out_dtype),
            grid=grid,
            in_specs=in_specs,
            out_specs=pl.BlockSpec((block_b, S, D), lambda i: (i, 0, 0)),
            scratch_shapes=[pltpu.VMEM((block_b * S, D), jnp.float32)],
            compiler_params=pltpu.CompilerParams(
                dimension_semantics=("parallel",),
                vmem_limit_bytes=vmem_limit),
        )

    args = (x_bf16, mask3, packed["wq"], packed["wk"], packed["wv"],
            packed["bq"], packed["bk"], packed["bv"], packed["wo"], packed["bo"])
    try:
        return build(True)(*args)
    except Exception:
        # Compatibility fallback if single-buffered pipeline_mode is rejected.
        return build(False)(*args)


# ----------------------------------------------------------------------------
# Pure-JAX reference (replicates the PyTorch forward exactly, f32)
# ----------------------------------------------------------------------------
def reference_jax(query, key, value, mask, params, *, n_heads):
    bs, S, D = query.shape
    dh = D // n_heads

    def lin(x, w, b):
        return x @ w.T + b

    def shape(x):  # (B, S, D) -> (B, H, S, dh)
        return x.reshape(bs, S, n_heads, dh).transpose(0, 2, 1, 3)

    q = shape(lin(query, params["wq"], params["bq"])) / math.sqrt(dh)
    k = shape(lin(key, params["wk"], params["bk"]))
    v = shape(lin(value, params["wv"], params["bv"]))

    scores = jnp.einsum("bhqd,bhkd->bhqk", q, k)
    m = (mask == 0).reshape(bs, 1, 1, S)
    scores = jnp.where(m, jnp.finfo(jnp.float32).min, scores)
    w = jax.nn.softmax(scores, axis=-1)
    ctx = jnp.einsum("bhqk,bhkd->bhqd", w, v)
    ctx = ctx.transpose(0, 2, 1, 3).reshape(bs, S, D)
    return lin(ctx, params["wo"], params["bo"])


if __name__ == "__main__":
    bs, S, D, H = 2, 128, 128, 4   # small but lane-dense (last dim = 128)

    key0 = jax.random.PRNGKey(0)
    ks = jax.random.split(key0, 9)
    init = lambda k, shp: (0.05 * jax.random.normal(k, shp)).astype(jnp.float32)

    params = {
        "wq": init(ks[0], (D, D)), "bq": init(ks[1], (D,)),
        "wk": init(ks[2], (D, D)), "bk": init(ks[3], (D,)),
        "wv": init(ks[4], (D, D)), "bv": init(ks[5], (D,)),
        "wo": init(ks[6], (D, D)), "bo": init(ks[7], (D,)),
    }

    x = jax.random.normal(ks[8], (bs, S, D), dtype=jnp.float32)

    # Key-padding mask: 1 = attend, 0 = masked (pad the tail of batch elem 1).
    mask = jnp.ones((bs, S), dtype=jnp.float32)
    mask = mask.at[1, S - 16:].set(0.0)

    packed = prepare_mhsa_params(params, n_heads=H)   # one-time weight prep
    out = multi_head_self_attention(x, mask, packed)
    out = jax.block_until_ready(out)

    ref = reference_jax(x, x, x, mask, params, n_heads=H)
    assert out.shape == (bs, S, D)
    max_err = float(jnp.max(jnp.abs(out - ref)))
    assert jnp.allclose(out, ref, atol=5e-3, rtol=5e-2), f"max_err={max_err}"

    print("KERNEL_OK")
</pallas_src>

<mosaic_0001>
module attributes {stable_mosaic.version = 11 : i64} {
  func.func @_mhsa_kernel(%arg0: i32, %arg1: memref<1x128x128xbf16, #tpu.memory_space<vmem>>, %arg2: memref<1x1x128xf32, #tpu.memory_space<vmem>>, %arg3: memref<4x128x32xbf16, #tpu.memory_space<vmem>>, %arg4: memref<4x128x32xbf16, #tpu.memory_space<vmem>>, %arg5: memref<4x128x32xbf16, #tpu.memory_space<vmem>>, %arg6: memref<4x1x32xf32, #tpu.memory_space<vmem>>, %arg7: memref<4x1x32xf32, #tpu.memory_space<vmem>>, %arg8: memref<4x1x32xf32, #tpu.memory_space<vmem>>, %arg9: memref<4x32x128xbf16, #tpu.memory_space<vmem>>, %arg10: memref<1x128xf32, #tpu.memory_space<vmem>>, %arg11: memref<1x128x128xf32, #tpu.memory_space<vmem>>, %arg12: memref<128x128xf32, #tpu.memory_space<vmem>>) attributes {dimension_semantics = [#tpu.dimension_semantics<parallel>], iteration_bounds = array<i64: 2>, scalar_prefetch = 0 : i64, scratch_operands = 1 : i64, tpu.core_type = #tpu.core_type<tc>, window_params = [{transform_indices = @transform_0, window_bounds = array<i64: 1, 128, 128>}, {transform_indices = @transform_1, window_bounds = array<i64: 1, 1, 128>}, {pipeline_mode = #tpu.pipeline_mode<synchronous>, transform_indices = @transform_2, window_bounds = array<i64: 4, 128, 32>}, {pipeline_mode = #tpu.pipeline_mode<synchronous>, transform_indices = @transform_3, window_bounds = array<i64: 4, 128, 32>}, {pipeline_mode = #tpu.pipeline_mode<synchronous>, transform_indices = @transform_4, window_bounds = array<i64: 4, 128, 32>}, {pipeline_mode = #tpu.pipeline_mode<synchronous>, transform_indices = @transform_5, window_bounds = array<i64: 4, 1, 32>}, {pipeline_mode = #tpu.pipeline_mode<synchronous>, transform_indices = @transform_6, window_bounds = array<i64: 4, 1, 32>}, {pipeline_mode = #tpu.pipeline_mode<synchronous>, transform_indices = @transform_7, window_bounds = array<i64: 4, 1, 32>}, {pipeline_mode = #tpu.pipeline_mode<synchronous>, transform_indices = @transform_8, window_bounds = array<i64: 4, 32, 128>}, {pipeline_mode = #tpu.pipeline_mode<synchronous>, transform_indices = @transform_9, window_bounds = array<i64: 1, 128>}, {transform_indices = @transform_10, window_bounds = array<i64: 1, 128, 128>}]} {
    %c0 = arith.constant 0 : index
    %c0_0 = arith.constant 0 : index
    %c0_1 = arith.constant 0 : index
    %0 = vector.load %arg1[%c0, %c0_0, %c0_1] : memref<1x128x128xbf16, #tpu.memory_space<vmem>>, vector<1x128x128xbf16>
    %1 = vector.shape_cast %0 : vector<1x128x128xbf16> to vector<128x128xbf16>
    %c0_2 = arith.constant 0 : index
    %c0_3 = arith.constant 0 : index
    %c0_4 = arith.constant 0 : index
    %2 = vector.load %arg2[%c0_2, %c0_3, %c0_4] : memref<1x1x128xf32, #tpu.memory_space<vmem>>, vector<1x1x128xf32>
    %cst = arith.constant 0.000000e+00 : f32
    %3 = vector.broadcast %cst : f32 to vector<1x1x128xf32>
    %4 = arith.cmpf oeq, %2, %3 : vector<1x1x128xf32>
    %cst_5 = arith.constant 0.000000e+00 : f32
    %5 = vector.broadcast %cst_5 : f32 to vector<128x128xf32>
    %c0_6 = arith.constant 0 : index
    %c0_7 = arith.constant 0 : index
    %6 = vector.load %arg12[%c0_6, %c0_7] : memref<128x128xf32, #tpu.memory_space<vmem>>, vector<128x128xf32>
    tpu.vector_store %arg12[%c0_6, %c0_7], %5 {strides = array<i32>} : memref<128x128xf32, #tpu.memory_space<vmem>>, vector<128x128xf32>,
    %cst_8 = arith.constant -3.40282347E+38 : f32
    %c0_i32 = arith.constant 0 : i32
    %c4_i32 = arith.constant 4 : i32
    %7 = arith.addi %c0_i32, %c4_i32 : i32
    %c1_i32 = arith.constant 1 : i32
    scf.for %arg13 = %c0_i32 to %7 step %c1_i32  : i32 {
      %14 = arith.index_cast %arg13 : i32 to index
      %c0_17 = arith.constant 0 : index
      %c0_18 = arith.constant 0 : index
      %15 = vector.load %arg3[%14, %c0_17, %c0_18] : memref<4x128x32xbf16, #tpu.memory_space<vmem>>, vector<1x128x32xbf16>
      %16 = vector.shape_cast %15 : vector<1x128x32xbf16> to vector<128x32xbf16>
      %cst_19 = arith.constant dense<0.000000e+00> : vector<128x32xf32>
      %17 = tpu.matmul %1, %16, %cst_19 {dimension_numbers = #tpu.dot_dimension_numbers<[1], [0], [0], [1], [0, 0, 1, 1], [], []>} : vector<128x128xbf16>, vector<128x32xbf16>, vector<128x32xf32> -> vector<128x32xf32>
      %18 = arith.index_cast %arg13 : i32 to index
      %c0_20 = arith.constant 0 : index
      %c0_21 = arith.constant 0 : index
      %19 = vector.load %arg6[%18, %c0_20, %c0_21] : memref<4x1x32xf32, #tpu.memory_space<vmem>>, vector<1x1x32xf32>
      %20 = vector.shape_cast %19 : vector<1x1x32xf32> to vector<1x32xf32>
      %21 = vector.broadcast %20 : vector<1x32xf32> to vector<128x32xf32>
      %22 = arith.addf %17, %21 : vector<128x32xf32>
      %23 = arith.index_cast %arg13 : i32 to index
      %c0_22 = arith.constant 0 : index
      %c0_23 = arith.constant 0 : index
      %24 = vector.load %arg4[%23, %c0_22, %c0_23] : memref<4x128x32xbf16, #tpu.memory_space<vmem>>, vector<1x128x32xbf16>
      %25 = vector.shape_cast %24 : vector<1x128x32xbf16> to vector<128x32xbf16>
      %cst_24 = arith.constant dense<0.000000e+00> : vector<128x32xf32>
      %26 = tpu.matmul %1, %25, %cst_24 {dimension_numbers = #tpu.dot_dimension_numbers<[1], [0], [0], [1], [0, 0, 1, 1], [], []>} : vector<128x128xbf16>, vector<128x32xbf16>, vector<128x32xf32> -> vector<128x32xf32>
      %27 = arith.index_cast %arg13 : i32 to index
      %c0_25 = arith.constant 0 : index
      %c0_26 = arith.constant 0 : index
      %28 = vector.load %arg7[%27, %c0_25, %c0_26] : memref<4x1x32xf32, #tpu.memory_space<vmem>>, vector<1x1x32xf32>
      %29 = vector.shape_cast %28 : vector<1x1x32xf32> to vector<1x32xf32>
      %30 = vector.broadcast %29 : vector<1x32xf32> to vector<128x32xf32>
      %31 = arith.addf %26, %30 : vector<128x32xf32>
      %32 = arith.index_cast %arg13 : i32 to index
      %c0_27 = arith.constant 0 : index
      %c0_28 = arith.constant 0 : index
      %33 = vector.load %arg5[%32, %c0_27, %c0_28] : memref<4x128x32xbf16, #tpu.memory_space<vmem>>, vector<1x128x32xbf16>
      %34 = vector.shape_cast %33 : vector<1x128x32xbf16> to vector<128x32xbf16>
      %cst_29 = arith.constant dense<0.000000e+00> : vector<128x32xf32>
      %35 = tpu.matmul %1, %34, %cst_29 {dimension_numbers = #tpu.dot_dimension_numbers<[1], [0], [0], [1], [0, 0, 1, 1], [], []>} : vector<128x128xbf16>, vector<128x32xbf16>, vector<128x32xf32> -> vector<128x32xf32>
      %36 = arith.index_cast %arg13 : i32 to index
      %c0_30 = arith.constant 0 : index
      %c0_31 = arith.constant 0 : index
      %37 = vector.load %arg8[%36, %c0_30, %c0_31] : memref<4x1x32xf32, #tpu.memory_space<vmem>>, vector<1x1x32xf32>
      %38 = vector.shape_cast %37 : vector<1x1x32xf32> to vector<1x32xf32>
      %39 = vector.broadcast %38 : vector<1x32xf32> to vector<128x32xf32>
      %40 = arith.addf %35, %39 : vector<128x32xf32>
      %41 = vector.shape_cast %22 : vector<128x32xf32> to vector<1x128x32xf32>
      %42 = arith.truncf %41 : vector<1x128x32xf32> to vector<1x128x32xbf16>
      %43 = vector.shape_cast %31 : vector<128x32xf32> to vector<1x128x32xf32>
      %44 = arith.truncf %43 : vector<1x128x32xf32> to vector<1x128x32xbf16>
      %45 = vector.shape_cast %40 : vector<128x32xf32> to vector<1x128x32xf32>
      %46 = arith.truncf %45 : vector<1x128x32xf32> to vector<1x128x32xbf16>
      %cst_32 = arith.constant dense<0.000000e+00> : vector<1x128x128xf32>
      %47 = tpu.matmul %42, %44, %cst_32 {dimension_numbers = #tpu.dot_dimension_numbers<[2], [2], [1], [1], [0, 0, 0, 1, 1, 1], [0], [0]>} : vector<1x128x32xbf16>, vector<1x128x32xbf16>, vector<1x128x128xf32> -> vector<1x128x128xf32>
      %48 = vector.shape_cast %4 : vector<1x1x128xi1> to vector<1x1x128xi1>
      %49 = vector.broadcast %48 : vector<1x1x128xi1> to vector<1x128x128xi1>
      %50 = vector.broadcast %cst_8 : f32 to vector<1x128x128xf32>
      %51 = arith.select %49, %50, %47 : vector<1x128x128xi1>, vector<1x128x128xf32>
      %cst_33 = arith.constant dense<0xFF800000> : vector<1x128xf32>
      %52 = vector.multi_reduction <maximumf>, %51, %cst_33 [2] : vector<1x128x128xf32> to vector<1x128xf32>
      %53 = vector.shape_cast %52 : vector<1x128xf32> to vector<1x128x1xf32>
      %54 = vector.broadcast %53 : vector<1x128x1xf32> to vector<1x128x128xf32>
      %55 = arith.subf %51, %54 : vector<1x128x128xf32>
      %56 = math.exp %55 : vector<1x128x128xf32>
      %cst_34 = arith.constant dense<0.000000e+00> : vector<1x128xf32>
      %57 = vector.multi_reduction <add>, %56, %cst_34 [2] : vector<1x128x128xf32> to vector<1x128xf32>
      %58 = vector.shape_cast %57 : vector<1x128xf32> to vector<1x128x1xf32>
      %59 = tpu.reciprocal %58 {approx = true} : vector<1x128x1xf32> -> vector<1x128x1xf32>
      %60 = vector.broadcast %59 : vector<1x128x1xf32> to vector<1x128x128xf32>
      %61 = arith.mulf %56, %60 : vector<1x128x128xf32>
      %62 = arith.truncf %61 : vector<1x128x128xf32> to vector<1x128x128xbf16>
      %cst_35 = arith.constant dense<0.000000e+00> : vector<1x128x32xf32>
      %63 = tpu.matmul %62, %46, %cst_35 {dimension_numbers = #tpu.dot_dimension_numbers<[2], [1], [1], [2], [0, 0, 0, 1, 1, 2], [0], [0]>} : vector<1x128x128xbf16>, vector<1x128x32xbf16>, vector<1x128x32xf32> -> vector<1x128x32xf32>
      %c0_36 = arith.constant 0 : index
      %c0_37 = arith.constant 0 : index
      %64 = vector.load %arg12[%c0_36, %c0_37] : memref<128x128xf32, #tpu.memory_space<vmem>>, vector<128x128xf32>
      %65 = vector.shape_cast %63 : vector<1x128x32xf32> to vector<128x32xf32>
      %66 = arith.truncf %65 : vector<128x32xf32> to vector<128x32xbf16>
      %67 = arith.index_cast %arg13 : i32 to index
      %c0_38 = arith.constant 0 : index
      %c0_39 = arith.constant 0 : index
      %68 = vector.load %arg9[%67, %c0_38, %c0_39] : memref<4x32x128xbf16, #tpu.memory_space<vmem>>, vector<1x32x128xbf16>
      %69 = vector.shape_cast %68 : vector<1x32x128xbf16> to vector<32x128xbf16>
      %cst_40 = arith.constant dense<0.000000e+00> : vector<128x128xf32>
      %70 = tpu.matmul %66, %69, %cst_40 {dimension_numbers = #tpu.dot_dimension_numbers<[1], [0], [0], [1], [0, 0, 1, 1], [], []>} : vector<128x32xbf16>, vector<32x128xbf16>, vector<128x128xf32> -> vector<128x128xf32>
      %71 = arith.addf %64, %70 : vector<128x128xf32>
      %c0_41 = arith.constant 0 : index
      %c0_42 = arith.constant 0 : index
      %72 = vector.load %arg12[%c0_41, %c0_42] : memref<128x128xf32, #tpu.memory_space<vmem>>, vector<128x128xf32>
      tpu.vector_store %arg12[%c0_41, %c0_42], %71 {strides = array<i32>} : memref<128x128xf32, #tpu.memory_space<vmem>>, vector<128x128xf32>,
    }
    %c4_i32_9 = arith.constant 4 : i32
    %c0_10 = arith.constant 0 : index
    %c0_11 = arith.constant 0 : index
    %8 = vector.load %arg12[%c0_10, %c0_11] : memref<128x128xf32, #tpu.memory_space<vmem>>, vector<128x128xf32>
    %c0_12 = arith.constant 0 : index
    %c0_13 = arith.constant 0 : index
    %9 = vector.load %arg10[%c0_12, %c0_13] : memref<1x128xf32, #tpu.memory_space<vmem>>, vector<1x128xf32>
    %10 = vector.broadcast %9 : vector<1x128xf32> to vector<128x128xf32>
    %11 = arith.addf %8, %10 : vector<128x128xf32>
    %12 = vector.shape_cast %11 : vector<128x128xf32> to vector<1x128x128xf32>
    %c0_14 = arith.constant 0 : index
    %c0_15 = arith.constant 0 : index
    %c0_16 = arith.constant 0 : index
    %13 = vector.load %arg11[%c0_14, %c0_15, %c0_16] : memref<1x128x128xf32, #tpu.memory_space<vmem>>, vector<1x128x128xf32>
    tpu.vector_store %arg11[%c0_14, %c0_15, %c0_16], %12 {strides = array<i32>} : memref<1x128x128xf32, #tpu.memory_space<vmem>>, vector<1x128x128xf32>,
    return
  }
  func.func @transform_0(%arg0: i32) -> (i32, i32, i32) {
    %c0_i32 = arith.constant 0 : i32
    %c0_i32_0 = arith.constant 0 : i32
    %c0_i32_1 = arith.constant 0 : i32
    return %arg0, %c0_i32, %c0_i32_0 : i32, i32, i32
  }
  func.func @transform_1(%arg0: i32) -> (i32, i32, i32) {
    %c0_i32 = arith.constant 0 : i32
    %c0_i32_0 = arith.constant 0 : i32
    %c0_i32_1 = arith.constant 0 : i32
    return %arg0, %c0_i32, %c0_i32_0 : i32, i32, i32
  }
  func.func @transform_2(%arg0: i32) -> (i32, i32, i32) {
    %c0_i32 = arith.constant 0 : i32
    %c0_i32_0 = arith.constant 0 : i32
    %c0_i32_1 = arith.constant 0 : i32
    %c0_i32_2 = arith.constant 0 : i32
    return %c0_i32, %c0_i32_0, %c0_i32_1 : i32, i32, i32
  }
  func.func @transform_3(%arg0: i32) -> (i32, i32, i32) {
    %c0_i32 = arith.constant 0 : i32
    %c0_i32_0 = arith.constant 0 : i32
    %c0_i32_1 = arith.constant 0 : i32
    %c0_i32_2 = arith.constant 0 : i32
    return %c0_i32, %c0_i32_0, %c0_i32_1 : i32, i32, i32
  }
  func.func @transform_4(%arg0: i32) -> (i32, i32, i32) {
    %c0_i32 = arith.constant 0 : i32
    %c0_i32_0 = arith.constant 0 : i32
    %c0_i32_1 = arith.constant 0 : i32
    %c0_i32_2 = arith.constant 0 : i32
    return %c0_i32, %c0_i32_0, %c0_i32_1 : i32, i32, i32
  }
  func.func @transform_5(%arg0: i32) -> (i32, i32, i32) {
    %c0_i32 = arith.constant 0 : i32
    %c0_i32_0 = arith.constant 0 : i32
    %c0_i32_1 = arith.constant 0 : i32
    %c0_i32_2 = arith.constant 0 : i32
    return %c0_i32, %c0_i32_0, %c0_i32_1 : i32, i32, i32
  }
  func.func @transform_6(%arg0: i32) -> (i32, i32, i32) {
    %c0_i32 = arith.constant 0 : i32
    %c0_i32_0 = arith.constant 0 : i32
    %c0_i32_1 = arith.constant 0 : i32
    %c0_i32_2 = arith.constant 0 : i32
    return %c0_i32, %c0_i32_0, %c0_i32_1 : i32, i32, i32
  }
  func.func @transform_7(%arg0: i32) -> (i32, i32, i32) {
    %c0_i32 = arith.constant 0 : i32
    %c0_i32_0 = arith.constant 0 : i32
    %c0_i32_1 = arith.constant 0 : i32
    %c0_i32_2 = arith.constant 0 : i32
    return %c0_i32, %c0_i32_0, %c0_i32_1 : i32, i32, i32
  }
  func.func @transform_8(%arg0: i32) -> (i32, i32, i32) {
    %c0_i32 = arith.constant 0 : i32
    %c0_i32_0 = arith.constant 0 : i32
    %c0_i32_1 = arith.constant 0 : i32
    %c0_i32_2 = arith.constant 0 : i32
    return %c0_i32, %c0_i32_0, %c0_i32_1 : i32, i32, i32
  }
  func.func @transform_9(%arg0: i32) -> (i32, i32) {
    %c0_i32 = arith.constant 0 : i32
    %c0_i32_0 = arith.constant 0 : i32
    %c0_i32_1 = arith.constant 0 : i32
    return %c0_i32, %c0_i32_0 : i32, i32
  }
  func.func @transform_10(%arg0: i32) -> (i32, i32, i32) {
    %c0_i32 = arith.constant 0 : i32
    %c0_i32_0 = arith.constant 0 : i32
    %c0_i32_1 = arith.constant 0 : i32
    return %arg0, %c0_i32, %c0_i32_0 : i32, i32, i32
  }
}

module attributes {stable_mosaic.version = 11 : i64} {
  func.func @_mhsa_kernel(%arg0: i32, %arg1: memref<1x128x128xbf16, #tpu.memory_space<vmem>>, %arg2: memref<1x1x128xf32, #tpu.memory_space<vmem>>, %arg3: memref<4x128x32xbf16, #tpu.memory_space<vmem>>, %arg4: memref<4x128x32xbf16, #tpu.memory_space<vmem>>, %arg5: memref<4x128x32xbf16, #tpu.memory_space<vmem>>, %arg6: memref<4x1x32xf32, #tpu.memory_space<vmem>>, %arg7: memref<4x1x32xf32, #tpu.memory_space<vmem>>, %arg8: memref<4x1x32xf32, #tpu.memory_space<vmem>>, %arg9: memref<4x32x128xbf16, #tpu.memory_space<vmem>>, %arg10: memref<1x128xf32, #tpu.memory_space<vmem>>, %arg11: memref<1x128x128xf32, #tpu.memory_space<vmem>>, %arg12: memref<128x128xf32, #tpu.memory_space<vmem>>) attributes {dimension_semantics = [#tpu.dimension_semantics<parallel>], iteration_bounds = array<i64: 2>, scalar_prefetch = 0 : i64, scratch_operands = 1 : i64, tpu.core_type = #tpu.core_type<tc>, window_params = [{transform_indices = @transform_0, window_bounds = array<i64: 1, 128, 128>}, {transform_indices = @transform_1, window_bounds = array<i64: 1, 1, 128>}, {pipeline_mode = #tpu.pipeline_mode<synchronous>, transform_indices = @transform_2, window_bounds = array<i64: 4, 128, 32>}, {pipeline_mode = #tpu.pipeline_mode<synchronous>, transform_indices = @transform_3, window_bounds = array<i64: 4, 128, 32>}, {pipeline_mode = #tpu.pipeline_mode<synchronous>, transform_indices = @transform_4, window_bounds = array<i64: 4, 128, 32>}, {pipeline_mode = #tpu.pipeline_mode<synchronous>, transform_indices = @transform_5, window_bounds = array<i64: 4, 1, 32>}, {pipeline_mode = #tpu.pipeline_mode<synchronous>, transform_indices = @transform_6, window_bounds = array<i64: 4, 1, 32>}, {pipeline_mode = #tpu.pipeline_mode<synchronous>, transform_indices = @transform_7, window_bounds = array<i64: 4, 1, 32>}, {pipeline_mode = #tpu.pipeline_mode<synchronous>, transform_indices = @transform_8, window_bounds = array<i64: 4, 32, 128>}, {pipeline_mode = #tpu.pipeline_mode<synchronous>, transform_indices = @transform_9, window_bounds = array<i64: 1, 128>}, {transform_indices = @transform_10, window_bounds = array<i64: 1, 128, 128>}]} {
    %c0 = arith.constant 0 : index
    %c0_0 = arith.constant 0 : index
    %c0_1 = arith.constant 0 : index
    %0 = vector.load %arg1[%c0, %c0_0, %c0_1] : memref<1x128x128xbf16, #tpu.memory_space<vmem>>, vector<1x128x128xbf16>
    %1 = vector.shape_cast %0 : vector<1x128x128xbf16> to vector<128x128xbf16>
    %c0_2 = arith.constant 0 : index
    %c0_3 = arith.constant 0 : index
    %c0_4 = arith.constant 0 : index
    %2 = vector.load %arg2[%c0_2, %c0_3, %c0_4] : memref<1x1x128xf32, #tpu.memory_space<vmem>>, vector<1x1x128xf32>
    %cst = arith.constant 0.000000e+00 : f32
    %3 = vector.broadcast %cst : f32 to vector<1x1x128xf32>
    %4 = arith.cmpf oeq, %2, %3 : vector<1x1x128xf32>
    %cst_5 = arith.constant 0.000000e+00 : f32
    %5 = vector.broadcast %cst_5 : f32 to vector<128x128xf32>
    %c0_6 = arith.constant 0 : index
    %c0_7 = arith.constant 0 : index
    %6 = vector.load %arg12[%c0_6, %c0_7] : memref<128x128xf32, #tpu.memory_space<vmem>>, vector<128x128xf32>
    tpu.vector_store %arg12[%c0_6, %c0_7], %5 {strides = array<i32>} : memref<128x128xf32, #tpu.memory_space<vmem>>, vector<128x128xf32>,
    %cst_8 = arith.constant -3.40282347E+38 : f32
    %c0_i32 = arith.constant 0 : i32
    %c4_i32 = arith.constant 4 : i32
    %7 = arith.addi %c0_i32, %c4_i32 : i32
    %c1_i32 = arith.constant 1 : i32
    scf.for %arg13 = %c0_i32 to %7 step %c1_i32  : i32 {
      %14 = arith.index_cast %arg13 : i32 to index
      %c0_17 = arith.constant 0 : index
      %c0_18 = arith.constant 0 : index
      %15 = vector.load %arg3[%14, %c0_17, %c0_18] : memref<4x128x32xbf16, #tpu.memory_space<vmem>>, vector<1x128x32xbf16>
      %16 = vector.shape_cast %15 : vector<1x128x32xbf16> to vector<128x32xbf16>
      %cst_19 = arith.constant dense<0.000000e+00> : vector<128x32xf32>
      %17 = tpu.matmul %1, %16, %cst_19 {dimension_numbers = #tpu.dot_dimension_numbers<[1], [0], [0], [1], [0, 0, 1, 1], [], []>} : vector<128x128xbf16>, vector<128x32xbf16>, vector<128x32xf32> -> vector<128x32xf32>
      %18 = arith.index_cast %arg13 : i32 to index
      %c0_20 = arith.constant 0 : index
      %c0_21 = arith.constant 0 : index
      %19 = vector.load %arg6[%18, %c0_20, %c0_21] : memref<4x1x32xf32, #tpu.memory_space<vmem>>, vector<1x1x32xf32>
      %20 = vector.shape_cast %19 : vector<1x1x32xf32> to vector<1x32xf32>
      %21 = vector.broadcast %20 : vector<1x32xf32> to vector<128x32xf32>
      %22 = arith.addf %17, %21 : vector<128x32xf32>
      %23 = arith.index_cast %arg13 : i32 to index
      %c0_22 = arith.constant 0 : index
      %c0_23 = arith.constant 0 : index
      %24 = vector.load %arg4[%23, %c0_22, %c0_23] : memref<4x128x32xbf16, #tpu.memory_space<vmem>>, vector<1x128x32xbf16>
      %25 = vector.shape_cast %24 : vector<1x128x32xbf16> to vector<128x32xbf16>
      %cst_24 = arith.constant dense<0.000000e+00> : vector<128x32xf32>
      %26 = tpu.matmul %1, %25, %cst_24 {dimension_numbers = #tpu.dot_dimension_numbers<[1], [0], [0], [1], [0, 0, 1, 1], [], []>} : vector<128x128xbf16>, vector<128x32xbf16>, vector<128x32xf32> -> vector<128x32xf32>
      %27 = arith.index_cast %arg13 : i32 to index
      %c0_25 = arith.constant 0 : index
      %c0_26 = arith.constant 0 : index
      %28 = vector.load %arg7[%27, %c0_25, %c0_26] : memref<4x1x32xf32, #tpu.memory_space<vmem>>, vector<1x1x32xf32>
      %29 = vector.shape_cast %28 : vector<1x1x32xf32> to vector<1x32xf32>
      %30 = vector.broadcast %29 : vector<1x32xf32> to vector<128x32xf32>
      %31 = arith.addf %26, %30 : vector<128x32xf32>
      %32 = arith.index_cast %arg13 : i32 to index
      %c0_27 = arith.constant 0 : index
      %c0_28 = arith.constant 0 : index
      %33 = vector.load %arg5[%32, %c0_27, %c0_28] : memref<4x128x32xbf16, #tpu.memory_space<vmem>>, vector<1x128x32xbf16>
      %34 = vector.shape_cast %33 : vector<1x128x32xbf16> to vector<128x32xbf16>
      %cst_29 = arith.constant dense<0.000000e+00> : vector<128x32xf32>
      %35 = tpu.matmul %1, %34, %cst_29 {dimension_numbers = #tpu.dot_dimension_numbers<[1], [0], [0], [1], [0, 0, 1, 1], [], []>} : vector<128x128xbf16>, vector<128x32xbf16>, vector<128x32xf32> -> vector<128x32xf32>
      %36 = arith.index_cast %arg13 : i32 to index
      %c0_30 = arith.constant 0 : index
      %c0_31 = arith.constant 0 : index
      %37 = vector.load %arg8[%36, %c0_30, %c0_31] : memref<4x1x32xf32, #tpu.memory_space<vmem>>, vector<1x1x32xf32>
      %38 = vector.shape_cast %37 : vector<1x1x32xf32> to vector<1x32xf32>
      %39 = vector.broadcast %38 : vector<1x32xf32> to vector<128x32xf32>
      %40 = arith.addf %35, %39 : vector<128x32xf32>
      %41 = vector.shape_cast %22 : vector<128x32xf32> to vector<1x128x32xf32>
      %42 = arith.truncf %41 : vector<1x128x32xf32> to vector<1x128x32xbf16>
      %43 = vector.shape_cast %31 : vector<128x32xf32> to vector<1x128x32xf32>
      %44 = arith.truncf %43 : vector<1x128x32xf32> to vector<1x128x32xbf16>
      %45 = vector.shape_cast %40 : vector<128x32xf32> to vector<1x128x32xf32>
      %46 = arith.truncf %45 : vector<1x128x32xf32> to vector<1x128x32xbf16>
      %cst_32 = arith.constant dense<0.000000e+00> : vector<1x128x128xf32>
      %47 = tpu.matmul %42, %44, %cst_32 {dimension_numbers = #tpu.dot_dimension_numbers<[2], [2], [1], [1], [0, 0, 0, 1, 1, 1], [0], [0]>} : vector<1x128x32xbf16>, vector<1x128x32xbf16>, vector<1x128x128xf32> -> vector<1x128x128xf32>
      %48 = vector.shape_cast %4 : vector<1x1x128xi1> to vector<1x1x128xi1>
      %49 = vector.broadcast %48 : vector<1x1x128xi1> to vector<1x128x128xi1>
      %50 = vector.broadcast %cst_8 : f32 to vector<1x128x128xf32>
      %51 = arith.select %49, %50, %47 : vector<1x128x128xi1>, vector<1x128x128xf32>
      %cst_33 = arith.constant dense<0xFF800000> : vector<1x128xf32>
      %52 = vector.multi_reduction <maximumf>, %51, %cst_33 [2] : vector<1x128x128xf32> to vector<1x128xf32>
      %53 = vector.shape_cast %52 : vector<1x128xf32> to vector<1x128x1xf32>
      %54 = vector.broadcast %53 : vector<1x128x1xf32> to vector<1x128x128xf32>
      %55 = arith.subf %51, %54 : vector<1x128x128xf32>
      %56 = math.exp %55 : vector<1x128x128xf32>
      %cst_34 = arith.constant dense<0.000000e+00> : vector<1x128xf32>
      %57 = vector.multi_reduction <add>, %56, %cst_34 [2] : vector<1x128x128xf32> to vector<1x128xf32>
      %58 = vector.shape_cast %57 : vector<1x128xf32> to vector<1x128x1xf32>
      %59 = tpu.reciprocal %58 {approx = true} : vector<1x128x1xf32> -> vector<1x128x1xf32>
      %60 = vector.broadcast %59 : vector<1x128x1xf32> to vector<1x128x128xf32>
      %61 = arith.mulf %56, %60 : vector<1x128x128xf32>
      %62 = arith.truncf %61 : vector<1x128x128xf32> to vector<1x128x128xbf16>
      %cst_35 = arith.constant dense<0.000000e+00> : vector<1x128x32xf32>
      %63 = tpu.matmul %62, %46, %cst_35 {dimension_numbers = #tpu.dot_dimension_numbers<[2], [1], [1], [2], [0, 0, 0, 1, 1, 2], [0], [0]>} : vector<1x128x128xbf16>, vector<1x128x32xbf16>, vector<1x128x32xf32> -> vector<1x128x32xf32>
      %c0_36 = arith.constant 0 : index
      %c0_37 = arith.constant 0 : index
      %64 = vector.load %arg12[%c0_36, %c0_37] : memref<128x128xf32, #tpu.memory_space<vmem>>, vector<128x128xf32>
      %65 = vector.shape_cast %63 : vector<1x128x32xf32> to vector<128x32xf32>
      %66 = arith.truncf %65 : vector<128x32xf32> to vector<128x32xbf16>
      %67 = arith.index_cast %arg13 : i32 to index
      %c0_38 = arith.constant 0 : index
      %c0_39 = arith.constant 0 : index
      %68 = vector.load %arg9[%67, %c0_38, %c0_39] : memref<4x32x128xbf16, #tpu.memory_space<vmem>>, vector<1x32x128xbf16>
      %69 = vector.shape_cast %68 : vector<1x32x128xbf16> to vector<32x128xbf16>
      %cst_40 = arith.constant dense<0.000000e+00> : vector<128x128xf32>
      %70 = tpu.matmul %66, %69, %cst_40 {dimension_numbers = #tpu.dot_dimension_numbers<[1], [0], [0], [1], [0, 0, 1, 1], [], []>} : vector<128x32xbf16>, vector<32x128xbf16>, vector<128x128xf32> -> vector<128x128xf32>
      %71 = arith.addf %64, %70 : vector<128x128xf32>
      %c0_41 = arith.constant 0 : index
      %c0_42 = arith.constant 0 : index
      %72 = vector.load %arg12[%c0_41, %c0_42] : memref<128x128xf32, #tpu.memory_space<vmem>>, vector<128x128xf32>
      tpu.vector_store %arg12[%c0_41, %c0_42], %71 {strides = array<i32>} : memref<128x128xf32, #tpu.memory_space<vmem>>, vector<128x128xf32>,
    }
    %c4_i32_9 = arith.constant 4 : i32
    %c0_10 = arith.constant 0 : index
    %c0_11 = arith.constant 0 : index
    %8 = vector.load %arg12[%c0_10, %c0_11] : memref<128x128xf32, #tpu.memory_space<vmem>>, vector<128x128xf32>
    %c0_12 = arith.constant 0 : index
    %c0_13 = arith.constant 0 : index
    %9 = vector.load %arg10[%c0_12, %c0_13] : memref<1x128xf32, #tpu.memory_space<vmem>>, vector<1x128xf32>
    %10 = vector.broadcast %9 : vector<1x128xf32> to vector<128x128xf32>
    %11 = arith.addf %8, %10 : vector<128x128xf32>
    %12 = vector.shape_cast %11 : vector<128x128xf32> to vector<1x128x128xf32>
    %c0_14 = arith.constant 0 : index
    %c0_15 = arith.constant 0 : index
    %c0_16 = arith.constant 0 : index
    %13 = vector.load %arg11[%c0_14, %c0_15, %c0_16] : memref<1x128x128xf32, #tpu.memory_space<vmem>>, vector<1x128x128xf32>
    tpu.vector_store %arg11[%c0_14, %c0_15, %c0_16], %12 {strides = array<i32>} : memref<1x128x128xf32, #tpu.memory_space<vmem>>, vector<1x128x128xf32>,
    return
  }
  func.func @transform_0(%arg0: i32) -> (i32, i32, i32) {
    %c0_i32 = arith.constant 0 : i32
    %c0_i32_0 = arith.constant 0 : i32
    %c0_i32_1 = arith.constant 0 : i32
    return %arg0, %c0_i32, %c0_i32_0 : i32, i32, i32
  }
  func.func @transform_1(%arg0: i32) -> (i32, i32, i32) {
    %c0_i32 = arith.constant 0 : i32
    %c0_i32_0 = arith.constant 0 : i32
    %c0_i32_1 = arith.constant 0 : i32
    return %arg0, %c0_i32, %c0_i32_0 : i32, i32, i32
  }
  func.func @transform_2(%arg0: i32) -> (i32, i32, i32) {
    %c0_i32 = arith.constant 0 : i32
    %c0_i32_0 = arith.constant 0 : i32
    %c0_i32_1 = arith.constant 0 : i32
    %c0_i32_2 = arith.constant 0 : i32
    return %c0_i32, %c0_i32_0, %c0_i32_1 : i32, i32, i32
  }
  func.func @transform_3(%arg0: i32) -> (i32, i32, i32) {
    %c0_i32 = arith.constant 0 : i32
    %c0_i32_0 = arith.constant 0 : i32
    %c0_i32_1 = arith.constant 0 : i32
    %c0_i32_2 = arith.constant 0 : i32
    return %c0_i32, %c0_i32_0, %c0_i32_1 : i32, i32, i32
  }
  func.func @transform_4(%arg0: i32) -> (i32, i32, i32) {
    %c0_i32 = arith.constant 0 : i32
    %c0_i32_0 = arith.constant 0 : i32
    %c0_i32_1 = arith.constant 0 : i32
    %c0_i32_2 = arith.constant 0 : i32
    return %c0_i32, %c0_i32_0, %c0_i32_1 : i32, i32, i32
  }
  func.func @transform_5(%arg0: i32) -> (i32, i32, i32) {
    %c0_i32 = arith.constant 0 : i32
    %c0_i32_0 = arith.constant 0 : i32
    %c0_i32_1 = arith.constant 0 : i32
    %c0_i32_2 = arith.constant 0 : i32
    return %c0_i32, %c0_i32_0, %c0_i32_1 : i32, i32, i32
  }
  func.func @transform_6(%arg0: i32) -> (i32, i32, i32) {
    %c0_i32 = arith.constant 0 : i32
    %c0_i32_0 = arith.constant 0 : i32
    %c0_i32_1 = arith.constant 0 : i32
    %c0_i32_2 = arith.constant 0 : i32
    return %c0_i32, %c0_i32_0, %c0_i32_1 : i32, i32, i32
  }
  func.func @transform_7(%arg0: i32) -> (i32, i32, i32) {
    %c0_i32 = arith.constant 0 : i32
    %c0_i32_0 = arith.constant 0 : i32
    %c0_i32_1 = arith.constant 0 : i32
    %c0_i32_2 = arith.constant 0 : i32
    return %c0_i32, %c0_i32_0, %c0_i32_1 : i32, i32, i32
  }
  func.func @transform_8(%arg0: i32) -> (i32, i32, i32) {
    %c0_i32 = arith.constant 0 : i32
    %c0_i32_0 = arith.constant 0 : i32
    %c0_i32_1 = arith.constant 0 : i32
    %c0_i32_2 = arith.constant 0 : i32
    return %c0_i32, %c0_i32_0, %c0_i32_1 : i32, i32, i32
  }
  func.func @transform_9(%arg0: i32) -> (i32, i32) {
    %c0_i32 = arith.constant 0 : i32
    %c0_i32_0 = arith.constant 0 : i32
    %c0_i32_1 = arith.constant 0 : i32
    return %c0_i32, %c0_i32_0 : i32, i32
  }
  func.func @transform_10(%arg0: i32) -> (i32, i32, i32) {
    %c0_i32 = arith.constant 0 : i32
    %c0_i32_0 = arith.constant 0 : i32
    %c0_i32_1 = arith.constant 0 : i32
    return %arg0, %c0_i32, %c0_i32_0 : i32, i32, i32
  }
}

</mosaic_0001>

<bundles_post_ra>
// kernel: tpu_custom_call.1
= control target key start
LH: loop header
LB: loop body
LE: loop exit
PB: predicated region body
PF: predicated region fallthrough
CT: control target
= control target key end

     0   :  { %15 = vsyncpa [#allocation4], 0  ;;  %s2705_s0 = inlined_call_operand.vmem [shape: bf16[2,128,128], index: 0, kind: input, shape index: {}]   ;;  %s2706_s1 = inlined_call_operand.vmem [shape: f32[2,1,128], index: 1, kind: input, shape index: {}]   ;;  %s2707_s2 = inlined_call_operand.vmem [shape: bf16[4,128,32], index: 2, kind: input, shape index: {}]   ;;  %s2708_s3 = inlined_call_operand.vmem [shape: bf16[4,128,32], index: 3, kind: input, shape index: {}]   ;;  %s2709_s4 = inlined_call_operand.vmem [shape: bf16[4,128,32], index: 4, kind: input, shape index: {}]   ;;  %s2710_s5 = inlined_call_operand.vmem [shape: f32[4,1,32], index: 5, kind: input, shape index: {}]   ;;  %s2711_s6 = inlined_call_operand.vmem [shape: f32[4,1,32], index: 6, kind: input, shape index: {}]   ;;  %s2712_s7 = inlined_call_operand.vmem [shape: f32[4,1,32], index: 7, kind: input, shape index: {}]   ;;  %s2713_s8 = inlined_call_operand.vmem [shape: bf16[4,32,128], index: 8, kind: input, shape index: {}]   ;;  %s2714_s9 = inlined_call_operand.vmem [shape: f32[1,128], index: 9, kind: input, shape index: {}]   ;;  %s2715_s10 = inlined_call_operand.hbm [shape: f32[2,128,128], index: 10, kind: output, shape index: {}]  }
   0x1   :  { %17 = vsyncpa [#allocation4 + $0x1], 0  ;;  %s2159_s13 = smov 0   ;;  %s2161_s14 = smov 0  }
   0x2   :  { %s2163_s15 = smov 0   ;;  %s2165_s16 = smov 0  }
   0x3 LB: > { %s2180_s17 = sadd.s32 4294967295, %s2094_s16   ;;  %s1675_s18 = sadd.s32 4294967294, %s2094_s16   ;;  %s2094_s16 = sphi %s2165_s16, %s2723_s16   ;;  %s2090_s15 = sphi %s2163_s15, %s2722_s15   ;;  %s2086_s14 = sphi %s2161_s14, %s2721_s14   ;;  %s2082_s13 = sphi %s2159_s13, %s2720_s13  }
   0x4   : > { %s2184_s19 = sadd.s32 1, %s2094_s16   ;;  %s250_s20 = sadd.s32 1, %s2090_s15 }
   0x5   : > { %s247_s21 = ssub.s32 %s2094_s16, %s2184_s19  ;;  %p260_p0 = scmp.ne.s32.totalorder %s2090_s15, %s2086_s14 }
   0x6   : > { %p248_p1 = scmp.eq.s32.totalorder %s247_s21, 0  ;;  %p261_p2 = scmp.eq.s32.totalorder %s2180_s17, 1 }
   0x7   : > { %p266_p3 = scmp.ne.s32.totalorder %s2086_s14, %s2082_s13  ;;  %p267_p4 = scmp.eq.s32.totalorder %s1675_s18, 1 }
   0x8   : > { %s2195_s22 = scalar_select %p248_p1, %s2090_s15, %s250_s20  }
   0x9   : > { %p2197_p5 = por %p261_p2, %p260_p0  ;;  %p2201_p6 = por %p267_p4, %p266_p3 }
   0xa   : > { %p1678_p7 = scmp.ge.s32.totalorder %s2094_s16, 1  ;;  %p323_p8 = scmp.lt.s32.totalorder %s2094_s16, 3 }
   0xc   : > { %p324_p9 = pnand %p1678_p7, %p323_p8 }
   0xd   : > { %s361_s25 = sand.u32 (!%p324_p9), 1, %s2086_s14   ;;  %p364_p10 = scmp.lt.s32.totalorder (!%p324_p9), %s2180_s17, 1 }
   0xe   : > { %327 = sbr.rel (%p324_p9) target bundleno = 1199 (0x4af), region = 60  ;;  %s2211_s26 = sshll.u32 (!%p324_p9), %s361_s25, 7 }
   0xf   : > { %s2256_s21 = scalar_lea.vmem (!%p324_p9), [#allocation3], %s2211_s26 }
  0x13   : > { %v2100_v0 = vmov 0.0   ;;  %s365_s27 = scalar_select %p364_p10, %s2180_s17, 1 }
  0x14   : > { %391 = vst [vmem:[#allocation2 + $0x30] sm:$0xff] %v2100_v0 }
  0x15   : > { %392 = vst [vmem:[#allocation2] sm:$0xff] %v2100_v0  ;;  %s1845_s28 = sshll.u32 %s365_s27, 6  ;;  %s371_s11 = scalar_lea.vmem %s2706_s1, %s365_s27 }
  0x16   : > { %393 = vst [vmem:[#allocation2 + $0x58] sm:$0xff] %v2100_v0  ;;  %s368_s20 = scalar_lea.vmem %s2705_s0, %s1845_s28  ;;  %v2226_v4 = vld [vmem:[%s371_s11] sm:$0x1]  ;;  %s2258_s27 = smov 0  }
  0x17   : > { %394 = vst [vmem:[#allocation2 + $0x18] sm:$0xff] %v2100_v0  ;;  %v2220_v1 = vld [vmem:[%s368_s20] sm:$0xf]  ;;  %v2222_v2 = vld [vmem:[%s368_s20] sm:$0xf0]  ;;  %vm390_vm0 = vcmp.eq.f32.partialorder %v2226_v4, 0.0 }
  0x18   : > { %395 = vst [vmem:[#allocation2 + $0x50] sm:$0xff] %v2100_v0  ;;  %v2224_v3 = vld [vmem:[%s368_s20 + $0x8] sm:$0xf]  ;;  %v2228_v5 = vld [vmem:[%s368_s20 + $0x8] sm:$0xf0] }
  0x19   : > { %396 = vst [vmem:[#allocation2 + $0x68] sm:$0xff] %v2100_v0  ;;  %v2230_v6 = vld [vmem:[%s368_s20 + $0x10] sm:$0xf]  ;;  %v2232_v7 = vld [vmem:[%s368_s20 + $0x10] sm:$0xf0] }
  0x1a   : > { %v2234_v8 = vld [vmem:[%s368_s20 + $0x18] sm:$0xf]  ;;  %v2236_v9 = vld [vmem:[%s368_s20 + $0x18] sm:$0xf0]  ;;  %v2238_v10 = vld [vmem:[%s368_s20 + $0x20] sm:$0xf] }
  0x1b   : > { %v2240_v11 = vld [vmem:[%s368_s20 + $0x20] sm:$0xf0]  ;;  %v2242_v12 = vld [vmem:[%s368_s20 + $0x28] sm:$0xf]  ;;  %v2244_v13 = vld [vmem:[%s368_s20 + $0x28] sm:$0xf0] }
  0x1c   : > { %v2246_v14 = vld [vmem:[%s368_s20 + $0x30] sm:$0xf]  ;;  %v2248_v15 = vld [vmem:[%s368_s20 + $0x30] sm:$0xf0]  ;;  %v2250_v16 = vld [vmem:[%s368_s20 + $0x38] sm:$0xf] }
  0x1d   : > { %v2252_v17 = vld [vmem:[%s368_s20 + $0x38] sm:$0xf0]  ;;  %397 = vst [vmem:[#allocation2 + $0x8] sm:$0xff] %v2100_v0 }
  0x1e   : > { %398 = vst [vmem:[#allocation2 + $0x48] sm:$0xff] %v2100_v0 }
  0x1f   : > { %399 = vst [vmem:[#allocation2 + $0x40] sm:$0xff] %v2100_v0 }
  0x20   : > { %400 = vst [vmem:[#allocation2 + $0x20] sm:$0xff] %v2100_v0 }
  0x21   : > { %401 = vst [vmem:[#allocation2 + $0x10] sm:$0xff] %v2100_v0 }
  0x22   : > { %402 = vst [vmem:[#allocation2 + $0x38] sm:$0xff] %v2100_v0 }
  0x23   : > { %403 = vst [vmem:[#allocation2 + $0x60] sm:$0xff] %v2100_v0 }
  0x24   : > { %404 = vst [vmem:[#allocation2 + $0x70] sm:$0xff] %v2100_v0 }
  0x25   : > { %405 = vst [vmem:[#allocation2 + $0x78] sm:$0xff] %v2100_v0 }
  0x26   : > { %406 = vst [vmem:[#allocation2 + $0x28] sm:$0xff] %v2100_v0 }
  0x27 LB: >> { %s2264_s28 = sshll.u32 %s2098_s27, 6  ;;  %s600_s11 = scalar_lea.vmem %s2711_s6, %s2098_s27  ;;  %v2276_v26 = vor.u32 %v2240_v11, %v2238_v10  ;;  %v2280_v27 = vor.u32 %v2222_v2, %v2220_v1  ;;  %v2286_v28 = vor.u32 %v2244_v13, %v2242_v12  ;;  %v2290_v29 = vor.u32 %v2228_v5, %v2224_v3  ;;  %s2098_s27 = sphi %s2258_s27, %s412_s27  }
  0x28   : >> { %s583_s26 = scalar_lea.vmem %s2708_s3, %s2264_s28  ;;  %s415_s30 = scalar_lea.vmem %s2707_s2, %s2264_s28  ;;  %v2300_v34 = vor.u32 %v2248_v15, %v2246_v14  ;;  %v2304_v35 = vor.u32 %v2232_v7, %v2230_v6  ;;  %v2310_v40 = vor.u32 %v2252_v17, %v2250_v16  ;;  %v2314_v41 = vor.u32 %v2236_v9, %v2234_v8  ;;  %v2335_v43 = vld [vmem:[%s600_s11] ss:$0 sm:$0xff] }
  0x29   : >> { %v1871_v18 = vld [vmem:[%s583_s26 + $0x38] sm:$0xff]  ;;  %v1870_v19 = vld [vmem:[%s583_s26 + $0x30] sm:$0xff]  ;;  %v1869_v20 = vld [vmem:[%s583_s26 + $0x28] sm:$0xff]  ;;  %s2361_s12 = scalar_lea.vmem %s2709_s4, %s2264_s28  ;;  %vm950_vm1 = vcmask 261120   ;;  %s720_s20 = scalar_lea.vmem %s2712_s7, %s2098_s27 }
  0x2a   : >> { %1893 = vmatpush.bf16.msra.mxu3 %v1871_v18  ;;  %653 = vmatpush.bf16.msra.mxu1 %v1871_v18  ;;  %v1868_v21 = vld [vmem:[%s583_s26 + $0x20] sm:$0xff]  ;;  %v1867_v22 = vld [vmem:[%s583_s26 + $0x18] sm:$0xff]  ;;  %v1866_v23 = vld [vmem:[%s583_s26 + $0x10] sm:$0xff] }
  0x2b   : >> { %v1865_v24 = vld [vmem:[%s583_s26 + $0x8] sm:$0xff]  ;;  %v1864_v25 = vld [vmem:[%s583_s26] sm:$0xff]  ;;  %v1862_v30 = vld [vmem:[%s415_s30 + $0x38] sm:$0xff]  ;;  %s432_s26 = scalar_lea.vmem %s2710_s5, %s2098_s27 }
  0x2c   : >> { %533 = vmatpush.bf16.msra.mxu0 %v1862_v30  ;;  %v1861_v31 = vld [vmem:[%s415_s30 + $0x30] sm:$0xff]  ;;  %1885 = vmatpush.bf16.msra.mxu2 %v1862_v30  ;;  %v1860_v32 = vld [vmem:[%s415_s30 + $0x28] sm:$0xff]  ;;  %v1859_v33 = vld [vmem:[%s415_s30 + $0x20] sm:$0xff] }
  0x2d   : >> { %v1858_v36 = vld [vmem:[%s415_s30 + $0x18] sm:$0xff]  ;;  %v1857_v37 = vld [vmem:[%s415_s30 + $0x10] sm:$0xff]  ;;  %v1856_v38 = vld [vmem:[%s415_s30 + $0x8] sm:$0xff] }
  0x2e   : >> { %1894 = vmatpush.bf16.msra.mxu3 %v1870_v19  ;;  %654 = vmatpush.bf16.msra.mxu1 %v1870_v19  ;;  %v1855_v39 = vld [vmem:[%s415_s30] sm:$0xff] }
  0x30   : >> { %534 = vmatpush.bf16.msra.mxu0 %v1861_v31  ;;  %1886 = vmatpush.bf16.msra.mxu2 %v1861_v31 }
  0x32   : >> { %1895 = vmatpush.bf16.msra.mxu3 %v1869_v20  ;;  %655 = vmatpush.bf16.msra.mxu1 %v1869_v20  ;;  %v1880_v20 = vld [vmem:[%s2361_s12 + $0x38] sm:$0xff] }
  0x34   : >> { %535 = vmatpush.bf16.msra.mxu0 %v1860_v32  ;;  %1887 = vmatpush.bf16.msra.mxu2 %v1860_v32 }
  0x36   : >> { %1896 = vmatpush.bf16.msra.mxu3 %v1868_v21  ;;  %656 = vmatpush.bf16.msra.mxu1 %v1868_v21 }
  0x38   : >> { %536 = vmatpush.bf16.msra.mxu0 %v1859_v33  ;;  %1888 = vmatpush.bf16.msra.mxu2 %v1859_v33 }
  0x3a   : >> { %1897 = vmatpush.bf16.msra.mxu3 %v1867_v22  ;;  %657 = vmatpush.bf16.msra.mxu1 %v1867_v22 }
  0x3c   : >> { %537 = vmatpush.bf16.msra.mxu0 %v1858_v36  ;;  %1889 = vmatpush.bf16.msra.mxu2 %v1858_v36 }
  0x3e   : >> { %1898 = vmatpush.bf16.msra.mxu3 %v1866_v23  ;;  %658 = vmatpush.bf16.msra.mxu1 %v1866_v23  ;;  %v1879_v23 = vld [vmem:[%s2361_s12 + $0x30] sm:$0xff] }
  0x40   : >> { %538 = vmatpush.bf16.msra.mxu0 %v1857_v37  ;;  %1890 = vmatpush.bf16.msra.mxu2 %v1857_v37  ;;  %v1877_v37 = vld [vmem:[%s2361_s12 + $0x20] sm:$0xff] }
  0x42   : >> { %1899 = vmatpush.bf16.msra.mxu3 %v1865_v24  ;;  %659 = vmatpush.bf16.msra.mxu1 %v1865_v24  ;;  %v1878_v24 = vld [vmem:[%s2361_s12 + $0x28] sm:$0xff] }
  0x44   : >> { %539 = vmatpush.bf16.msra.mxu0 %v1856_v38  ;;  %1891 = vmatpush.bf16.msra.mxu2 %v1856_v38 }
  0x46   : >> { %1900 = vmatpush.bf16.msra.mxu3 %v1864_v25  ;;  %660 = vmatpush.bf16.msra.mxu1 %v1864_v25 }
  0x48   : >> { %540 = vmatpush.bf16.msra.mxu0 %v1855_v39  ;;  %1892 = vmatpush.bf16.msra.mxu2 %v1855_v39 }
  0x49   : >> { %681 = vmatmul.bf16.vlgmr.msra.gmra.mxu3 %v2276_v26  ;;  %661 = vmatmul.bf16.vlgmr.msra.gmra.mxu1 %v2280_v27 }
  0x4b   : >> { %541 = vmatmul.bf16.vlgmr.msra.gmra.mxu0 %v2280_v27  ;;  %566 = vmatmul.bf16.vlgmr.msra.gmra.mxu2 %v2286_v28 }
  0x4c   : >> { %773 = vmatpush.bf16.msrb.mxu2 %v1880_v20 }
  0x50   : >> { %774 = vmatpush.bf16.msrb.mxu2 %v1879_v23 }
  0x54   : >> { %775 = vmatpush.bf16.msrb.mxu2 %v1878_v24 }
  0x58   : >> { %776 = vmatpush.bf16.msrb.mxu2 %v1877_v37 }
  0x59   : >> { %686 = vmatmul.bf16.gmra.mxu3 %v2286_v28  ;;  %666 = vmatmul.bf16.gmra.mxu1 %v2290_v29 }
  0x5b   : >> { %546 = vmatmul.bf16.gmra.mxu0 %v2290_v29  ;;  %571 = vmatmul.bf16.gmra.mxu2 %v2300_v34 }
  0x69   : >> { %691 = vmatmul.bf16.gmra.mxu3 %v2300_v34  ;;  %671 = vmatmul.bf16.gmra.mxu1 %v2304_v35 }
  0x6b   : >> { %551 = vmatmul.bf16.gmra.mxu0 %v2304_v35  ;;  %576 = vmatmul.bf16.gmra.mxu2 %v2310_v40 }
  0x79   : >> { %696 = vmatmul.bf16.gmra.mxu3 %v2310_v40  ;;  %676 = vmatmul.bf16.gmra.mxu1 %v2314_v41 }
  0x7b   : >> { %556 = vmatmul.bf16.gmra.mxu0 %v2314_v41 }
  0x8b   : >> { %561 = vmatmul.bf16.gmra.mxu0 %v2276_v26 }
  0xc6   : >> { %v662_v42 = vpop.f32.mrf.mxu1 }
  0xc7   : >> { %v663_v44 = vadd.f32 %v2335_v43, %v662_v42  ;;  %v1876_v42 = vld [vmem:[%s2361_s12 + $0x18] sm:$0xff] }
  0xc8   : >> { %777 = vmatpush.bf16.msrb.mxu2 %v1876_v42  ;;  %v542_v42 = vpop.f32.mrf.mxu0 }
  0xc9   : >> { %v838_v46 = vpack.c.bf16 %v663_v44, %v663_v44 }
  0xcb   : >> { %v2340_v50 = vunpack.c.l.b16 %v838_v46 }
  0xcc   : >> { %v682_v45 = vpop.f32.mrf.mxu3 }
  0xcd   : >> { %v683_v49 = vadd.f32 %v2335_v43, %v682_v45 }
  0xce   : >> { %v664_v47 = vpop.f32.mrf.mxu1 }
  0xcf   : >> { %v665_v48 = vadd.f32 %v2335_v43, %v664_v47  ;;  %v846_v54 = vpack.c.bf16 %v683_v49, %v683_v49 }
  0xd1   : >> { %v839_v51 = vpack.c.bf16 %v665_v48, %v665_v48  ;;  %v2347_v58 = vunpack.c.l.b16 %v846_v54  ;;  %v1875_v54 = vld [vmem:[%s2361_s12 + $0x10] sm:$0xff] }
  0xd2   : >> { %778 = vmatpush.bf16.msrb.mxu2 %v1875_v54  ;;  %v544_v54 = vpop.f32.mrf.mxu0 }
  0xd3   : >> { %v2342_v52 = vunpack.c.l.b16 %v839_v51 }
  0xd4   : >> { %v684_v53 = vpop.f32.mrf.mxu3 }
  0xd5   : >> { %v685_v55 = vadd.f32 %v2335_v43, %v684_v53  ;;  %v942_v56 = vpack.c.b16 %v2342_v52, %v2340_v50 }
  0xd6   : >> { %v2353_v63 = vpop.f32.mrf.mxu1 }
  0xd7   : >> { %v847_v57 = vpack.c.bf16 %v685_v55, %v685_v55 }
  0xd9   : >> { %v2349_v59 = vunpack.c.l.b16 %v847_v57 }
  0xdb   : >> { %v946_v60 = vpack.c.b16 %v2349_v59, %v2347_v58 }
  0xdc   : >> { %v687_v61 = vpop.f32.mrf.mxu3 }
  0xdd   : >> { %v688_v55 = vadd.f32 %v2335_v43, %v687_v61 }
  0xde   : >> { %v2355_v18 = vpop.f32.mrf.mxu1 }
  0xdf   : >> { %v848_v23 = vpack.c.bf16 %v688_v55, %v688_v55  ;;  %v670_v58 = vadd.f32 %v2335_v43, %v2355_v18 }
  0xe1   : >> { %v841_v55 = vpack.c.bf16 %v670_v58, %v670_v58 }
  0xe4   : >> { %v689_v62 = vpop.f32.mrf.mxu3 }
  0xe5   : >> { %v690_v49 = vadd.f32 %v2335_v43, %v689_v62 }
  0xe6   : >> { %v672_v22 = vpop.f32.mrf.mxu1 }
  0xe7   : >> { %v849_v20 = vpack.c.bf16 %v690_v49, %v690_v49 }
  0xe9   : >> { %v937_v62 = vunpack.c.l.b16 %v849_v20  ;;  %v547_v20 = vpop.f32.mrf.mxu0 }
  0xec   : >> { %v692_v0 = vpop.f32.mrf.mxu3 }
  0xed   : >> { %v693_v38 = vadd.f32 %v2335_v43, %v692_v0 }
  0xee   : >> { %v674_v36 = vpop.f32.mrf.mxu1 }
  0xef   : >> { %v850_v47 = vpack.c.bf16 %v693_v38, %v693_v38 }
  0xf1   : >> { %v938_v57 = vunpack.c.l.b16 %v850_v47 }
  0xf4   : >> { %v694_v19 = vpop.f32.mrf.mxu3 }
  0xf5   : >> { %v695_v31 = vadd.f32 %v2335_v43, %v694_v19  ;;  %v1874_v19 = vld [vmem:[%s2361_s12 + $0x8] sm:$0xff] }
  0xf6   : >> { %v677_v0 = vpop.f32.mrf.mxu1  ;;  %779 = vmatpush.bf16.msrb.mxu2 %v1874_v19  ;;  %v929_v19 = vunpack.c.l.b16 %v841_v55 }
  0xf7   : >> { %v851_v44 = vpack.c.bf16 %v695_v31, %v695_v31 }
  0xf9   : >> { %v939_v51 = vunpack.c.l.b16 %v851_v44  ;;  %v988_v44 = vsel %vm950_vm1, %v946_v60, 0 }
  0xfc   : >> { %v697_v21 = vpop.f32.mrf.mxu3 }
  0xfd   : >> { %v698_v25 = vadd.f32 %v2335_v43, %v697_v21  ;;  %v948_v21 = vpack.c.b16 %v939_v51, %v938_v57 }
  0xfe   : >> { %v679_v31 = vpop.f32.mrf.mxu1 }
  0xff   : >> { %v852_v32 = vpack.c.bf16 %v698_v25, %v698_v25  ;;  %v994_v24 = vsel %vm950_vm1, %v948_v21, 0  ;;  %v1873_v25 = vld [vmem:[%s2361_s12] sm:$0xff]  ;;  %s1881_s12 = sshll.u32 %s2098_s27, 4  ;;  %s412_s27 = sadd.s32 1, %s2098_s27  }
 0x100   : >> { %780 = vmatpush.bf16.msrb.mxu2 %v1873_v25  ;;  %p409_p11 = scmp.ge.s32.totalorder %s412_s27, 4  }
 0x101   : >> { %v940_v45 = vunpack.c.l.b16 %v852_v32  ;;  %v678_v32 = vadd.f32 %v2335_v43, %v677_v0  ;;  %s1884_s27 = sshll.u32 (%p409_p11), %s2180_s17, 7  ;;  %s1585_s17 = sshll.u32 (%p409_p11), %s2256_s21, 4  ;;  %s1586_s17 = int_to_ptr.vmem [resolvable:$true] %s1585_s17 }
 0x102   : > { %s1573_s18 = scalar_lea.sflag (%p409_p11), [#allocation4], %s361_s25 }
 0x103   : >> { %781 = vmatmul.bf16.vlgmr.msrb.gmra.mxu2 %v2280_v27  ;;  %v844_v38 = vpack.c.bf16 %v678_v32, %v678_v32 }
 0x104   : >> { %v699_v30 = vpop.f32.mrf.mxu3 }
 0x105   : >> { %v700_v33 = vadd.f32 %v2335_v43, %v699_v30  ;;  %v936_v30 = vunpack.c.l.b16 %v848_v23  ;;  %v932_v27 = vunpack.c.l.b16 %v844_v38 }
 0x107   : >> { %v853_v39 = vpack.c.bf16 %v700_v33, %v700_v33  ;;  %v947_v61 = vpack.c.b16 %v937_v62, %v936_v30  ;;  %v680_v33 = vadd.f32 %v2335_v43, %v679_v31  ;;  %v549_v62 = vpop.f32.mrf.mxu0  ;;  %v976_v30 = vsel %vm950_vm1, %v942_v56, 0 }
 0x109   : >> { %v941_v46 = vunpack.c.l.b16 %v853_v39  ;;  %v991_v37 = vsel %vm950_vm1, %v947_v61, 0  ;;  %v845_v39 = vpack.c.bf16 %v680_v33, %v680_v33 }
 0x10b   : >> { %v949_v48 = vpack.c.b16 %v941_v46, %v940_v45  ;;  %v673_v45 = vadd.f32 %v2335_v43, %v672_v22  ;;  %v675_v46 = vadd.f32 %v2335_v43, %v674_v36  ;;  %v933_v47 = vunpack.c.l.b16 %v845_v39 }
 0x10d   : >> { %v997_v53 = vsel %vm950_vm1, %v949_v48, 0  ;;  %v842_v48 = vpack.c.bf16 %v673_v45, %v673_v45  ;;  %v843_v49 = vpack.c.bf16 %v675_v46, %v675_v46  ;;  %v945_v51 = vpack.c.b16 %v933_v47, %v932_v27  ;;  %v567_v47 = vpop.f32.mrf.mxu2 }
 0x10e   : >> { %999 = vmatpush.bf16.xpose.msrb.mxu3 %v997_v53  ;;  %v668_v53 = vadd.f32 %v2335_v43, %v2353_v63  ;;  %v2405_v43 = vld [vmem:[%s432_s26] ss:$0 sm:$0xff]  ;;  %s2048_s26 = scalar_lea.hbm (%p409_p11), %s2715_s10, 256 }
 0x10f   : >> { %v930_v59 = vunpack.c.l.b16 %v842_v48  ;;  %v931_v60 = vunpack.c.l.b16 %v843_v49  ;;  %v985_v22 = vsel %vm950_vm1, %v945_v51, 0  ;;  %v543_v21 = vadd.f32 %v2405_v43, %v542_v42  ;;  %v552_v32 = vpop.f32.mrf.mxu0 }
 0x110   : >> { %v840_v36 = vpack.c.bf16 %v668_v53, %v668_v53  ;;  %v545_v23 = vadd.f32 %v2405_v43, %v544_v54  ;;  %v548_v33 = vadd.f32 %v2405_v43, %v547_v20  ;;  %v553_v45 = vadd.f32 %v2405_v43, %v552_v32 }
 0x111   : >> { %v944_v57 = vpack.c.b16 %v931_v60, %v930_v59 }
 0x112   : >> { %v928_v0 = vunpack.c.l.b16 %v840_v36  ;;  %v823_v25 = vpack.c.bf16 %v545_v23, %v545_v23  ;;  %v824_v38 = vpack.c.bf16 %v548_v33, %v548_v33  ;;  %v826_v46 = vpack.c.bf16 %v553_v45, %v553_v45 }
 0x113   : >> { %786 = vmatmul.bf16.gmra.mxu2 %v2290_v29  ;;  %v982_v29 = vsel %vm950_vm1, %v944_v57, 0 }
 0x114   : >> { %v943_v63 = vpack.c.b16 %v929_v19, %v928_v0  ;;  %v887_v31 = vunpack.c.l.b16 %v823_v25  ;;  %v890_v48 = vunpack.c.l.b16 %v826_v46  ;;  %v568_v25 = vadd.f32 %v2405_v43, %v567_v47 }
 0x115   : >> { %v569_v54 = vpop.f32.mrf.mxu2 }
 0x116   : >> { %1000 = vmatpush.bf16.xpose.msrb.mxu3 %v994_v24  ;;  %v979_v18 = vsel %vm950_vm1, %v943_v63, 0  ;;  %v822_v24 = vpack.c.bf16 %v543_v21, %v543_v21 }
 0x117   : >> { %v554_v42 = vpop.f32.mrf.mxu0 }
 0x118   : >> { %v886_v61 = vunpack.c.l.b16 %v822_v24 }
 0x11d   : >> { %v572_v57 = vpop.f32.mrf.mxu2 }
 0x11e   : >> { %1001 = vmatpush.bf16.xpose.msrb.mxu3 %v991_v37  ;;  %v550_v37 = vadd.f32 %v2405_v43, %v549_v62 }
 0x11f   : >> { %v557_v56 = vpop.f32.mrf.mxu0 }
 0x120   : >> { %v825_v39 = vpack.c.bf16 %v550_v37, %v550_v37  ;;  %v573_v37 = vadd.f32 %v2405_v43, %v572_v57 }
 0x122   : >> { %v889_v50 = vunpack.c.l.b16 %v825_v39  ;;  %v834_v39 = vpack.c.bf16 %v573_v37, %v573_v37 }
 0x123   : >> { %791 = vmatmul.bf16.gmra.mxu2 %v2304_v35  ;;  %v902_v35 = vpack.c.b16 %v887_v31, %v886_v61 }
 0x126   : >> { %1002 = vmatpush.bf16.xpose.msrb.mxu3 %v988_v44  ;;  %v888_v44 = vunpack.c.l.b16 %v824_v38 }
 0x127   : >> { %v559_v51 = vpop.f32.mrf.mxu0 }
 0x128   : >> { %v903_v52 = vpack.c.b16 %v889_v50, %v888_v44  ;;  %v560_v58 = vadd.f32 %v2405_v43, %v559_v51  ;;  %v898_v44 = vunpack.c.l.b16 %v834_v39 }
 0x12e   : >> { %1003 = vmatpush.bf16.xpose.msrb.mxu3 %v985_v22  ;;  %v829_v22 = vpack.c.bf16 %v560_v58, %v560_v58  ;;  %v2101_v58 = vmov 0  }
 0x12f   : >> { %v562_v59 = vpop.f32.mrf.mxu0 }
 0x130   : >> { %v893_v55 = vunpack.c.l.b16 %v829_v22 }
 0x133   : >> { %796 = vmatmul.bf16.gmra.mxu2 %v2314_v41  ;;  %v555_v41 = vadd.f32 %v2405_v43, %v554_v42 }
 0x135   : >> { %v827_v27 = vpack.c.bf16 %v555_v41, %v555_v41 }
 0x136   : >> { %1004 = vmatpush.bf16.xpose.msrb.mxu3 %v982_v29  ;;  %v563_v29 = vadd.f32 %v2405_v43, %v562_v59 }
 0x137   : >> { %v891_v49 = vunpack.c.l.b16 %v827_v27  ;;  %v564_v0 = vpop.f32.mrf.mxu0 }
 0x138   : >> { %v830_v20 = vpack.c.bf16 %v563_v29, %v563_v29 }
 0x139   : >> { %v904_v53 = vpack.c.b16 %v891_v49, %v890_v48 }
 0x13a   : >> { %v894_v21 = vunpack.c.l.b16 %v830_v20 }
 0x13e   : >> { %1005 = vmatpush.bf16.xpose.msrb.mxu3 %v979_v18  ;;  %v574_v18 = vpop.f32.mrf.mxu2 }
 0x13f   : >> { %v575_v38 = vadd.f32 %v2405_v43, %v574_v18 }
 0x141   : >> { %v835_v42 = vpack.c.bf16 %v575_v38, %v575_v38  ;;  %v1962_v38 = vld [vmem:[%s720_s20] ss:$0 sm:$0xff]  ;;  %s1398_s20 = scalar_lea.vmem %s2713_s8, %s1881_s12  ;;  %s1584_s12 = scalar_lea.hbm (%p409_p11), %s2715_s10, %s1884_s27 }
 0x142   : > { %s1587_s28 = sshll.u32 (%p409_p11), %s1584_s12, 4  ;;  %s1588_s28 = int_to_ptr.hbm [resolvable:$true] %s1587_s28 }
 0x143   : >> { %801 = vmatmul.bf16.gmra.mxu2 %v2276_v26  ;;  %v558_v26 = vadd.f32 %v2405_v43, %v557_v56  ;;  %v899_v50 = vunpack.c.l.b16 %v835_v42 }
 0x145   : >> { %v828_v60 = vpack.c.bf16 %v558_v26, %v558_v26  ;;  %v908_v56 = vpack.c.b16 %v899_v50, %v898_v44 }
 0x146   : >> { %1006 = vmatpush.bf16.xpose.msrb.mxu3 %v976_v30  ;;  %v577_v24 = vpop.f32.mrf.mxu2  ;;  %v832_v30 = vpack.c.bf16 %v568_v25, %v568_v25 }
 0x147   : >> { %v892_v36 = vunpack.c.l.b16 %v828_v60  ;;  %v578_v45 = vadd.f32 %v2405_v43, %v577_v24 }
 0x148   : >> { %v896_v31 = vunpack.c.l.b16 %v832_v30 }
 0x149   : >> { %v905_v19 = vpack.c.b16 %v893_v55, %v892_v36  ;;  %v836_v27 = vpack.c.bf16 %v578_v45, %v578_v45 }
 0x14b   : >> { %v900_v48 = vunpack.c.l.b16 %v836_v27 }
 0x14d   : >> { %1814 = vmatmul.msk.bf16.vlgmr.msrb.gmra.mxu3 %vm950_vm1, %v902_v35 }
 0x14e   : >> { %v579_v35 = vpop.f32.mrf.mxu2 }
 0x14f   : >> { %v580_v41 = vadd.f32 %v2405_v43, %v579_v35 }
 0x151   : >> { %v837_v47 = vpack.c.bf16 %v580_v41, %v580_v41 }
 0x153   : >> { %806 = vmatmul.bf16.gmra.mxu2 %v2286_v28  ;;  %v565_v28 = vadd.f32 %v2405_v43, %v564_v0  ;;  %v901_v49 = vunpack.c.l.b16 %v837_v47 }
 0x155   : >> { %v831_v63 = vpack.c.bf16 %v565_v28, %v565_v28 }
 0x157   : >> { %v895_v23 = vunpack.c.l.b16 %v831_v63 }
 0x159   : >> { %v906_v62 = vpack.c.b16 %v895_v23, %v894_v21 }
 0x15d   : >> { %1815 = vmatmul.msk.bf16.gmra.mxu3 %vm950_vm1, %v903_v52 }
 0x163   : >> { %811 = vmatmul.bf16.gmra.mxu2 %v2300_v34  ;;  %v570_v34 = vadd.f32 %v2405_v43, %v569_v54  ;;  %v1048_v43 = vsel %vm390_vm0, 1, %v2101_v58 }
 0x164   : >> { %v1049_v59 = vperm.slane %v1048_v43, 0 }
 0x165   : >> { %v833_v61 = vpack.c.bf16 %v570_v34, %v570_v34 }
 0x166   : >> { %vm2456_vm2 = vcmp.eq.s32.totalorder %v1049_v59, 1 }
 0x167   : >> { %v897_v32 = vunpack.c.l.b16 %v833_v61 }
 0x169   : >> { %v907_v33 = vpack.c.b16 %v897_v32, %v896_v31 }
 0x16d   : >> { %1816 = vmatmul.msk.bf16.gmra.mxu3 %vm950_vm1, %v904_v53  ;;  %v909_v53 = vpack.c.b16 %v901_v49, %v900_v48 }
 0x173   : >> { %816 = vmatmul.bf16.gmra.mxu2 %v2310_v40 }
 0x17d   : >> { %1817 = vmatmul.msk.bf16.gmra.mxu3 %vm950_vm1, %v905_v19 }
 0x186   : >> { %v2438_v40 = vpop.f32.mrf.mxu2 }
 0x18d   : >> { %1818 = vmatmul.msk.bf16.gmra.mxu3 %vm950_vm1, %v906_v62 }
 0x18e   : >> { %v2440_v52 = vpop.f32.mrf.mxu2 }
 0x196   : >> { %v2445_v46 = vpop.f32.mrf.mxu2 }
 0x19d   : >> { %1819 = vmatmul.msk.bf16.gmra.mxu3 %vm950_vm1, %v907_v33 }
 0x19e   : >> { %v2447_v51 = vpop.f32.mrf.mxu2 }
 0x1a6   : >> { %v2450_v54 = vpop.f32.mrf.mxu2 }
 0x1ad   : >> { %1820 = vmatmul.msk.bf16.gmra.mxu3 %vm950_vm1, %v908_v56 }
 0x1ae   : >> { %v2452_v26 = vpop.f32.mrf.mxu2 }
 0x1b6   : >> { %v2460_v22 = vpop.f32.mrf.mxu2 }
 0x1bd   : >> { %1821 = vmatmul.msk.bf16.gmra.mxu3 %vm950_vm1, %v909_v53 }
 0x1be   : >> { %v2467_v57 = vpop.f32.mrf.mxu2 }
 0x1c6   : >> { %v802_v29 = vpop.f32.mrf.mxu2 }
 0x1ce   : >> { %v804_v63 = vpop.f32.mrf.mxu2 }
 0x1d0   : >> { %v1008_v36 = vpop.f32.mrf.mxu3 }
 0x1d1   : >> { %v2464_v55 = vsel %vm2456_vm2, -3.4028235e+38, %v1008_v36 }
 0x1d2   : >> { %1067 = vmax.xlane.f32.xlu0 %v2464_v55 }
 0x1d6   : >> { %v807_v23 = vpop.f32.mrf.mxu2 }
 0x1d8   : >> { %v1010_v0 = vpop.f32.mrf.mxu3 }
 0x1d9   : >> { %v2471_v19 = vsel %vm2456_vm2, -3.4028235e+38, %v1010_v0 }
 0x1da   : >> { %1069 = vmax.xlane.f32.xlu0 %v2471_v19 }
 0x1de   : >> { %v809_v25 = vpop.f32.mrf.mxu2 }
 0x1e0   : >> { %v1013_v28 = vpop.f32.mrf.mxu3 }
 0x1e1   : >> { %v2476_v20 = vsel %vm2456_vm2, -3.4028235e+38, %v1013_v28  ;;  %v803_v28 = vadd.f32 %v1962_v38, %v802_v29  ;;  %v800_v29 = vadd.f32 %v1962_v38, %v2467_v57  ;;  %v790_v57 = vadd.f32 %v1962_v38, %v2447_v51 }
 0x1e2   : >> { %1071 = vmax.xlane.f32.xlu1 %v2476_v20 }
 0x1e6   : >> { %v812_v61 = vpop.f32.mrf.mxu2 }
 0x1e7   : >> { %v813_v56 = vadd.f32 %v1962_v38, %v812_v61  ;;  %v862_v61 = vpack.c.bf16 %v803_v28, %v803_v28 }
 0x1e8   : >> { %v1015_v18 = vpop.f32.mrf.mxu3 }
 0x1e9   : >> { %v2481_v21 = vsel %vm2456_vm2, -3.4028235e+38, %v1015_v18  ;;  %v866_v47 = vpack.c.bf16 %v813_v56, %v813_v56  ;;  %v805_v18 = vadd.f32 %v1962_v38, %v804_v63  ;;  %v798_v56 = vadd.f32 %v1962_v38, %v2460_v22 }
 0x1ea   : >> { %1073 = vmax.xlane.f32.xlu1 %v2481_v21  ;;  %v1299_v63 = vunpack.c.l.b16 %v862_v61  ;;  %v788_v22 = vadd.f32 %v1962_v38, %v2445_v46 }
 0x1eb   : >> { %v1303_v43 = vunpack.c.l.b16 %v866_v47  ;;  %v860_v47 = vpack.c.bf16 %v798_v56, %v798_v56 }
 0x1ee   : >> { %v814_v35 = vpop.f32.mrf.mxu2 }
 0x1ef   : >> { %v815_v45 = vadd.f32 %v1962_v38, %v814_v35  ;;  %v863_v35 = vpack.c.bf16 %v805_v18, %v805_v18  ;;  %v856_v18 = vpack.c.bf16 %v788_v22, %v788_v22 }
 0x1f0   : >> { %v1018_v62 = vpop.f32.mrf.mxu3 }
 0x1f1   : >> { %v2486_v24 = vsel %vm2456_vm2, -3.4028235e+38, %v1018_v62  ;;  %v867_v48 = vpack.c.bf16 %v815_v45, %v815_v45  ;;  %v808_v62 = vadd.f32 %v1962_v38, %v807_v23  ;;  %v1300_v23 = vunpack.c.l.b16 %v863_v35 }
 0x1f2   : >> { %1075 = vmax.xlane.f32.xlu2 %v2486_v24  ;;  %v1293_v61 = vunpack.c.l.b16 %v856_v18 }
 0x1f3   : >> { %v1304_v59 = vunpack.c.l.b16 %v867_v48  ;;  %v861_v48 = vpack.c.bf16 %v800_v29, %v800_v29 }
 0x1f6   : >> { %v817_v39 = vpop.f32.mrf.mxu2 }
 0x1f7   : >> { %v818_v50 = vadd.f32 %v1962_v38, %v817_v39 }
 0x1f8   : >> { %v1020_v34 = vpop.f32.mrf.mxu3 }
 0x1f9   : >> { %v2491_v30 = vsel %vm2456_vm2, -3.4028235e+38, %v1020_v34  ;;  %v868_v41 = vpack.c.bf16 %v818_v50, %v818_v50  ;;  %v810_v34 = vadd.f32 %v1962_v38, %v809_v25  ;;  %v795_v50 = vadd.f32 %v1962_v38, %v2452_v26 }
 0x1fa   : >> { %1077 = vmax.xlane.f32.xlu2 %v2491_v30  ;;  %v785_v26 = vadd.f32 %v1962_v38, %v2440_v52 }
 0x1fb   : >> { %v1305_v53 = vunpack.c.l.b16 %v868_v41  ;;  %v865_v39 = vpack.c.bf16 %v810_v34, %v810_v34 }
 0x1fc   : >> { %v855_v28 = vpack.c.bf16 %v785_v26, %v785_v26 }
 0x1fd   : >> { %v1302_v45 = vunpack.c.l.b16 %v865_v39 }
 0x1fe   : >> { %v819_v27 = vpop.f32.mrf.mxu2  ;;  %v1292_v52 = vunpack.c.l.b16 %v855_v28 }
 0x1ff   : >> { %v820_v49 = vadd.f32 %v1962_v38, %v819_v27  ;;  %v859_v27 = vpack.c.bf16 %v795_v50, %v795_v50 }
 0x200   : >> { %v1023_v31 = vpop.f32.mrf.mxu3 }
 0x201   : >> { %v2496_v32 = vsel %vm2456_vm2, -3.4028235e+38, %v1023_v31  ;;  %v869_v58 = vpack.c.bf16 %v820_v49, %v820_v49  ;;  %v1313_v31 = vpack.c.b16 %v1304_v59, %v1303_v43  ;;  %v1296_v43 = vunpack.c.l.b16 %v859_v27 }
 0x202   : >> { %1079 = vmax.xlane.f32.xlu0 %v2496_v32  ;;  %v1297_v59 = vunpack.c.l.b16 %v860_v47 }
 0x203   : >> { %v1306_v36 = vunpack.c.l.b16 %v869_v58 }
 0x205   : >> { %v1314_v0 = vpack.c.b16 %v1306_v36, %v1305_v53  ;;  %v1311_v53 = vpack.c.b16 %v1300_v23, %v1299_v63  ;;  %v1298_v36 = vunpack.c.l.b16 %v861_v48 }
 0x207   : >> { %1323 = vmatpush.bf16.msrb.mxu0 %v1314_v0  ;;  %1901 = vmatpush.bf16.msra.mxu2 %v1314_v0  ;;  %v1310_v34 = vpack.c.b16 %v1298_v36, %v1297_v59 }
 0x208   : >> { %v1025_v33 = vpop.f32.mrf.mxu3 }
 0x209   : >> { %v2501_v37 = vsel %vm2456_vm2, -3.4028235e+38, %v1025_v33  ;;  %v864_v33 = vpack.c.bf16 %v808_v62, %v808_v62  ;;  %v857_v62 = vpack.c.bf16 %v790_v57, %v790_v57 }
 0x20a   : >> { %1081 = vmax.xlane.f32.xlu1 %v2501_v37 }
 0x20b   : >> { %1324 = vmatpush.bf16.msrb.mxu0 %v1313_v31  ;;  %1902 = vmatpush.bf16.msra.mxu2 %v1313_v31  ;;  %v1301_v25 = vunpack.c.l.b16 %v864_v33  ;;  %v1294_v46 = vunpack.c.l.b16 %v857_v62 }
 0x20d   : >> { %v1312_v49 = vpack.c.b16 %v1302_v45, %v1301_v25  ;;  %v1308_v51 = vpack.c.b16 %v1294_v46, %v1293_v61 }
 0x20f   : >> { %1325 = vmatpush.bf16.msrb.mxu0 %v1312_v49  ;;  %1903 = vmatpush.bf16.msra.mxu2 %v1312_v49 }
 0x210   : >> { %v1028_v42 = vpop.f32.mrf.mxu3 }
 0x211   : >> { %v2511_v44 = vsel %vm2456_vm2, -3.4028235e+38, %v1028_v42  ;;  %v793_v42 = vadd.f32 %v1962_v38, %v2450_v54  ;;  %v783_v54 = vadd.f32 %v1962_v38, %v2438_v40 }
 0x212   : >> { %1083 = vmax.xlane.f32.xlu1 %v2511_v44 }
 0x213   : >> { %v858_v41 = vpack.c.bf16 %v793_v42, %v793_v42  ;;  %1326 = vmatpush.bf16.msrb.mxu0 %v1311_v53  ;;  %1904 = vmatpush.bf16.msra.mxu2 %v1311_v53  ;;  %v854_v0 = vpack.c.bf16 %v783_v54, %v783_v54 }
 0x215   : >> { %v1295_v58 = vunpack.c.l.b16 %v858_v41  ;;  %v1291_v40 = vunpack.c.l.b16 %v854_v0 }
 0x217   : >> { %v1309_v31 = vpack.c.b16 %v1296_v43, %v1295_v58  ;;  %1327 = vmatpush.bf16.msrb.mxu0 %v1310_v34  ;;  %1905 = vmatpush.bf16.msra.mxu2 %v1310_v34  ;;  %v1307_v38 = vpack.c.b16 %v1292_v52, %v1291_v40 }
 0x218   : >> { %v1030_v42 = vpop.f32.mrf.mxu3 }
 0x21b   : >> { %1328 = vmatpush.bf16.msrb.mxu0 %v1309_v31  ;;  %1906 = vmatpush.bf16.msra.mxu2 %v1309_v31 }
 0x21f   : >> { %1329 = vmatpush.bf16.msrb.mxu0 %v1308_v51  ;;  %1907 = vmatpush.bf16.msra.mxu2 %v1308_v51 }
 0x220   : >> { %v1033_v23 = vpop.f32.mrf.mxu3 }
 0x223   : >> { %1330 = vmatpush.bf16.msrb.mxu0 %v1307_v38  ;;  %1908 = vmatpush.bf16.msra.mxu2 %v1307_v38 }
 0x245   : >> { %v1068_v35 = vpop.xlane.xlu0 %1067 }
 0x246   : >> { %v1099_v33 = vsub.f32 %v2464_v55, %v1068_v35  ;;  %v2532_v55 = vsel %vm2456_vm2, -3.4028235e+38, %v1030_v42 }
 0x248   : >> { %v1115_v39 = vmul.f32 1.442695, %v1099_v33 }
 0x24a   : >> { %1963 = vpow2.f32 %v1115_v39 }
 0x24d   : >> { %v1070_v50 = vpop.xlane.xlu0 %1069 }
 0x24e   : >> { %v1100_v56 = vsub.f32 %v2471_v19, %v1070_v50  ;;  %v1035_v19 = vpop.f32.mrf.mxu3 }
 0x250   : >> { %v2524_v29 = vpop.eup %1963  ;;  %v1117_v63 = vmul.f32 1.442695, %v1100_v56 }
 0x251   : >> { %1147 = vadd.xlane.f32.xlu2 %v2524_v29 }
 0x252   : >> { %1965 = vpow2.f32 %v1117_v63 }
 0x255   : >> { %v1072_v25 = vpop.xlane.xlu1 %1071 }
 0x256   : >> { %v1101_v45 = vsub.f32 %v2476_v20, %v1072_v25  ;;  %v2541_v20 = vsel %vm2456_vm2, -3.4028235e+38, %v1033_v23  ;;  %v1038_v22 = vpop.f32.mrf.mxu3 }
 0x258   : >> { %v2528_v41 = vpop.eup %1965  ;;  %v1119_v27 = vmul.f32 1.442695, %v1101_v45 }
 0x259   : >> { %1149 = vadd.xlane.f32.xlu0 %v2528_v41  ;;  %1085 = vmax.xlane.f32.xlu2 %v2532_v55 }
 0x25a   : >> { %1967 = vpow2.f32 %v1119_v27 }
 0x25d   : >> { %v1074_v47 = vpop.xlane.xlu1 %1073 }
 0x25e   : >> { %v1102_v48 = vsub.f32 %v2481_v21, %v1074_v47  ;;  %v2550_v21 = vsel %vm2456_vm2, -3.4028235e+38, %v1035_v19  ;;  %v1040_v28 = vpop.f32.mrf.mxu3 }
 0x260   : >> { %v2537_v49 = vpop.eup %1967  ;;  %v1121_v53 = vmul.f32 1.442695, %v1102_v48 }
 0x261   : >> { %1151 = vadd.xlane.f32.xlu0 %v2537_v49  ;;  %1087 = vmax.xlane.f32.xlu2 %v2541_v20 }
 0x262   : >> { %1969 = vpow2.f32 %v1121_v53 }
 0x265   : >> { %v1076_v54 = vpop.xlane.xlu2 %1075 }
 0x266   : >> { %v1103_v26 = vsub.f32 %v2486_v24, %v1076_v54  ;;  %v2559_v24 = vsel %vm2456_vm2, -3.4028235e+38, %v1038_v22  ;;  %v1043_v40 = vpop.f32.mrf.mxu3 }
 0x268   : >> { %v2546_v57 = vpop.eup %1969  ;;  %v1123_v58 = vmul.f32 1.442695, %v1103_v26 }
 0x269   : >> { %1153 = vadd.xlane.f32.xlu1 %v2546_v57  ;;  %1089 = vmax.xlane.f32.xlu0 %v2550_v21 }
 0x26a   : >> { %1971 = vpow2.f32 %v1123_v58 }
 0x26d   : >> { %v1078_v43 = vpop.xlane.xlu2 %1077 }
 0x26e   : >> { %v1104_v59 = vsub.f32 %v2491_v30, %v1078_v43  ;;  %v2568_v30 = vsel %vm2456_vm2, -3.4028235e+38, %v1040_v28  ;;  %v1045_v38 = vpop.f32.mrf.mxu3 }
 0x270   : >> { %v2555_v36 = vpop.eup %1971  ;;  %v1125_v0 = vmul.f32 1.442695, %v1104_v59 }
 0x271   : >> { %1155 = vadd.xlane.f32.xlu1 %v2555_v36  ;;  %1091 = vmax.xlane.f32.xlu0 %v2559_v24 }
 0x272   : >> { %1973 = vpow2.f32 %v1125_v0 }
 0x275   : >> { %v1080_v18 = vpop.xlane.xlu0 %1079 }
 0x276   : >> { %v1105_v62 = vsub.f32 %v2496_v32, %v1080_v18  ;;  %v2577_v32 = vsel %vm2456_vm2, -3.4028235e+38, %v1043_v40 }
 0x278   : >> { %v2564_v34 = vpop.eup %1973  ;;  %v1127_v31 = vmul.f32 1.442695, %v1105_v62 }
 0x279   : >> { %1157 = vadd.xlane.f32.xlu2 %v2564_v34  ;;  %1093 = vmax.xlane.f32.xlu1 %v2568_v30 }
 0x27a   : >> { %1975 = vpow2.f32 %v1127_v31 }
 0x27d   : >> { %v1082_v52 = vpop.xlane.xlu1 %1081 }
 0x27e   : >> { %v1106_v61 = vsub.f32 %v2501_v37, %v1082_v52  ;;  %v2586_v37 = vsel %vm2456_vm2, -3.4028235e+38, %v1045_v38 }
 0x280   : >> { %v2573_v46 = vpop.eup %1975  ;;  %v1129_v51 = vmul.f32 1.442695, %v1106_v61 }
 0x281   : >> { %1159 = vadd.xlane.f32.xlu2 %v2573_v46  ;;  %1095 = vmax.xlane.f32.xlu1 %v2577_v32 }
 0x282   : >> { %1977 = vpow2.f32 %v1129_v51 }
 0x285   : >> { %v1084_v35 = vpop.xlane.xlu1 %1083 }
 0x286   : >> { %v1107_v33 = vsub.f32 %v2511_v44, %v1084_v35 }
 0x288   : >> { %v2582_v39 = vpop.eup %1977  ;;  %v1131_v42 = vmul.f32 1.442695, %v1107_v33 }
 0x289   : >> { %1161 = vadd.xlane.f32.xlu0 %v2582_v39  ;;  %1097 = vmax.xlane.f32.xlu2 %v2586_v37 }
 0x28a   : >> { %1979 = vpow2.f32 %v1131_v42 }
 0x290   : >> { %v2590_v50 = vpop.eup %1979 }
 0x291   : >> { %1163 = vadd.xlane.f32.xlu0 %v2590_v50 }
 0x2c4   : >> { %v1148_v56 = vpop.xlane.xlu2 %1147 }
 0x2c5   : >> { %1981 = vrcp.f32 %v1148_v56 }
 0x2cb   : >> { %v1982_v23 = vpop.eup %1981 }
 0x2cc   : >> { %v1150_v63 = vpop.xlane.xlu0 %1149  ;;  %v1086_v44 = vpop.xlane.xlu2 %1085  ;;  %v1195_v45 = vmul.f32 %v1982_v23, %v2524_v29 }
 0x2cd   : >> { %1983 = vrcp.f32 %v1150_v63  ;;  %v1108_v25 = vsub.f32 %v2532_v55, %v1086_v44 }
 0x2ce   : >> { %v1211_v53 = vpack.c.bf16 %v1195_v45, %v1195_v45 }
 0x2cf   : >> { %v1133_v60 = vmul.f32 1.442695, %v1108_v25 }
 0x2d0   : >> { %v1243_v55 = vunpack.c.l.b16 %v1211_v53 }
 0x2d1   : >> { %1985 = vpow2.f32 %v1133_v60 }
 0x2d3   : >> { %v1984_v27 = vpop.eup %1983 }
 0x2d4   : >> { %v1152_v19 = vpop.xlane.xlu0 %1151  ;;  %v1088_v47 = vpop.xlane.xlu2 %1087  ;;  %v1196_v48 = vmul.f32 %v1984_v27, %v2528_v41 }
 0x2d5   : >> { %v1109_v54 = vsub.f32 %v2541_v20, %v1088_v47  ;;  %1987 = vrcp.f32 %v1152_v19 }
 0x2d6   : >> { %v1212_v26 = vpack.c.bf16 %v1196_v48, %v1196_v48 }
 0x2d7   : >> { %v2597_v22 = vpop.eup %1985  ;;  %v1135_v58 = vmul.f32 1.442695, %v1109_v54 }
 0x2d8   : >> { %1165 = vadd.xlane.f32.xlu1 %v2597_v22  ;;  %v1244_v43 = vunpack.c.l.b16 %v1212_v26 }
 0x2d9   : >> { %1989 = vpow2.f32 %v1135_v58 }
 0x2da   : >> { %v1259_v29 = vpack.c.b16 %v1244_v43, %v1243_v55 }
 0x2db   : >> { %v1988_v28 = vpop.eup %1987 }
 0x2dc   : >> { %1331 = vmatmul.bf16.vlgmr.msrb.gmra.mxu0 %v1259_v29  ;;  %v1154_v59 = vpop.xlane.xlu1 %1153  ;;  %v1090_v0 = vpop.xlane.xlu0 %1089  ;;  %v1197_v62 = vmul.f32 %v1988_v28, %v2537_v49 }
 0x2dd   : >> { %1991 = vrcp.f32 %v1154_v59  ;;  %v1110_v41 = vsub.f32 %v2550_v21, %v1090_v0 }
 0x2de   : >> { %v1213_v51 = vpack.c.bf16 %v1197_v62, %v1197_v62 }
 0x2df   : >> { %v2601_v18 = vpop.eup %1989  ;;  %v1137_v20 = vmul.f32 1.442695, %v1110_v41 }
 0x2e0   : >> { %1167 = vadd.xlane.f32.xlu2 %v2601_v18  ;;  %v1245_v42 = vunpack.c.l.b16 %v1213_v51  ;;  %v1882_v51 = vld [vmem:[%s1398_s20] sm:$0xff] }
 0x2e1   : >> { %1993 = vpow2.f32 %v1137_v20 }
 0x2e3   : >> { %v1992_v31 = vpop.eup %1991 }
 0x2e4   : >> { %v1156_v40 = vpop.xlane.xlu1 %1155  ;;  %v1092_v52 = vpop.xlane.xlu0 %1091  ;;  %v1198_v61 = vmul.f32 %v1992_v31, %v2546_v57 }
 0x2e5   : >> { %v1111_v38 = vsub.f32 %v2559_v24, %v1092_v52  ;;  %1995 = vrcp.f32 %v1156_v40 }
 0x2e6   : >> { %v1214_v35 = vpack.c.bf16 %v1198_v61, %v1198_v61 }
 0x2e7   : >> { %v2607_v33 = vpop.eup %1993  ;;  %v1139_v21 = vmul.f32 1.442695, %v1111_v38 }
 0x2e8   : >> { %1169 = vadd.xlane.f32.xlu0 %v2607_v33  ;;  %v1246_v56 = vunpack.c.l.b16 %v1214_v35 }
 0x2e9   : >> { %1997 = vpow2.f32 %v1139_v21 }
 0x2ea   : >> { %v1260_v49 = vpack.c.b16 %v1246_v56, %v1245_v42 }
 0x2eb   : >> { %v1996_v23 = vpop.eup %1995 }
 0x2ec   : >> { %1336 = vmatmul.bf16.gmra.mxu0 %v1260_v49  ;;  %v1158_v63 = vpop.xlane.xlu2 %1157  ;;  %v1094_v44 = vpop.xlane.xlu1 %1093  ;;  %v1199_v60 = vmul.f32 %v1996_v23, %v2555_v36 }
 0x2ed   : >> { %1999 = vrcp.f32 %v1158_v63  ;;  %v1112_v57 = vsub.f32 %v2568_v30, %v1094_v44 }
 0x2ee   : >> { %v1215_v48 = vpack.c.bf16 %v1199_v60, %v1199_v60 }
 0x2ef   : >> { %v2611_v25 = vpop.eup %1997  ;;  %v1141_v24 = vmul.f32 1.442695, %v1112_v57 }
 0x2f0   : >> { %1171 = vadd.xlane.f32.xlu1 %v2611_v25  ;;  %v1247_v58 = vunpack.c.l.b16 %v1215_v48 }
 0x2f1   : >> { %2001 = vpow2.f32 %v1141_v24 }
 0x2f3   : >> { %v2000_v45 = vpop.eup %1999 }
 0x2f4   : >> { %v1160_v27 = vpop.xlane.xlu2 %1159  ;;  %v1096_v19 = vpop.xlane.xlu1 %1095  ;;  %v1200_v47 = vmul.f32 %v2000_v45, %v2564_v34 }
 0x2f5   : >> { %v1113_v53 = vsub.f32 %v2577_v32, %v1096_v19  ;;  %2003 = vrcp.f32 %v1160_v27 }
 0x2f6   : >> { %v1216_v54 = vpack.c.bf16 %v1200_v47, %v1200_v47 }
 0x2f7   : >> { %v2617_v26 = vpop.eup %2001  ;;  %v1143_v30 = vmul.f32 1.442695, %v1113_v53 }
 0x2f8   : >> { %1173 = vadd.xlane.f32.xlu2 %v2617_v26  ;;  %v1248_v55 = vunpack.c.l.b16 %v1216_v54 }
 0x2f9   : >> { %2005 = vpow2.f32 %v1143_v30 }
 0x2fa   : >> { %v1261_v36 = vpack.c.b16 %v1248_v55, %v1247_v58 }
 0x2fb   : >> { %v2004_v59 = vpop.eup %2003 }
 0x2fc   : >> { %1341 = vmatmul.bf16.gmra.mxu0 %v1261_v36  ;;  %v1162_v43 = vpop.xlane.xlu0 %1161  ;;  %v1098_v29 = vpop.xlane.xlu2 %1097  ;;  %v1201_v28 = vmul.f32 %v2004_v59, %v2573_v46  ;;  %v1883_v46 = vld [vmem:[%s1398_s20 + $0x8] sm:$0xff]  ;;  %s2042_s20 = sshra.s32 (%p409_p11), %s1588_s28, 4  ;;  %s2043_s20 = int_to_ptr.hbm [resolvable:$true] %s2042_s20 }
 0x2fd   : >> { %2007 = vrcp.f32 %v1162_v43  ;;  %v1114_v34 = vsub.f32 %v2586_v37, %v1098_v29  ;;  %1445 = vmatpush.bf16.msrb.mxu1 %v1883_v46  ;;  %s2044_s29 = scalar_lea.hbm (%p409_p11), %s2043_s20, 128  ;;  %p2049_p1 = scmp.lt.s32.totalorder (%p409_p11), %s2043_s20, %s2715_s10 }
 0x2fe   : >> { %v1217_v62 = vpack.c.bf16 %v1201_v28, %v1201_v28  ;;  %p2045_p12 = scmp.ne.s32.totalorder (%p409_p11), %s2043_s20, %s2044_s29  ;;  %p2050_p2 = scmp.lt.s32.totalorder (%p409_p11), %s2048_s26, %s2044_s29 }
 0x2ff   : >> { %v2621_v32 = vpop.eup %2005  ;;  %v1145_v0 = vmul.f32 1.442695, %v1114_v34 }
 0x300   : >> { %1175 = vadd.xlane.f32.xlu0 %v2621_v32  ;;  %v1249_v52 = vunpack.c.l.b16 %v1217_v62  ;;  %p2046_p13 = pnand (%p409_p11), %p2045_p12, %p2197_p5  ;;  %p2051_p3 = por (%p409_p11), %p2050_p2, %p2049_p1 }
 0x301   : >> { %2009 = vpow2.f32 %v1145_v0  ;;  %1446 = vmatpush.bf16.msrb.mxu1 %v1882_v51 }
 0x302   : > { %p2047_p0 = pneg (%p409_p11), %p2046_p13 }
 0x303   : >> { %v2008_v41 = vpop.eup %2007 }
 0x304   : >> { %v1202_v20 = vmul.f32 %v2008_v41, %v2582_v39  ;;  %v1164_v39 = vpop.xlane.xlu0 %1163  ;;  %p2052_p4 = pnand (%p409_p11), %p2051_p3, %p2047_p0 }
 0x305   : >> { %2011 = vrcp.f32 %v1164_v39 }
 0x306   : >> { %v1218_v31 = vpack.c.bf16 %v1202_v20, %v1202_v20 }
 0x307   : >> { %v2626_v40 = vpop.eup %2009 }
 0x308   : >> { %1177 = vadd.xlane.f32.xlu1 %v2626_v40  ;;  %v1250_v37 = vunpack.c.l.b16 %v1218_v31 }
 0x30a   : >> { %v1262_v61 = vpack.c.b16 %v1250_v37, %v1249_v52 }
 0x30b   : >> { %v2012_v35 = vpop.eup %2011 }
 0x30c   : >> { %1346 = vmatmul.bf16.gmra.mxu0 %v1262_v61  ;;  %v1203_v21 = vmul.f32 %v2012_v35, %v2590_v50 }
 0x30e   : >> { %v1219_v63 = vpack.c.bf16 %v1203_v21, %v1203_v21 }
 0x310   : >> { %v1251_v23 = vunpack.c.l.b16 %v1219_v63 }
 0x34b   : >> { %v1166_v38 = vpop.xlane.xlu1 %1165 }
 0x34c   : >> { %2013 = vrcp.f32 %v1166_v38 }
 0x352   : >> { %v2014_v42 = vpop.eup %2013 }
 0x353   : >> { %v1168_v56 = vpop.xlane.xlu2 %1167  ;;  %v1204_v49 = vmul.f32 %v2014_v42, %v2597_v22 }
 0x354   : >> { %2015 = vrcp.f32 %v1168_v56 }
 0x355   : >> { %v1220_v44 = vpack.c.bf16 %v1204_v49, %v1204_v49 }
 0x357   : >> { %v1252_v57 = vunpack.c.l.b16 %v1220_v44 }
 0x359   : >> { %v1332_v24 = vpop.f32.mrf.mxu0  ;;  %v1263_v60 = vpack.c.b16 %v1252_v57, %v1251_v23 }
 0x35a   : >> { %v2016_v27 = vpop.eup %2015 }
 0x35b   : >> { %v1170_v45 = vpop.xlane.xlu0 %1169  ;;  %1351 = vmatmul.bf16.gmra.mxu0 %v1263_v60  ;;  %v1205_v19 = vmul.f32 %v2016_v27, %v2601_v18 }
 0x35c   : >> { %2017 = vrcp.f32 %v1170_v45 }
 0x35d   : >> { %v1221_v22 = vpack.c.bf16 %v1205_v19, %v1205_v19 }
 0x35f   : >> { %v1253_v58 = vunpack.c.l.b16 %v1221_v22 }
 0x361   : >> { %v1334_v47 = vpop.f32.mrf.mxu0 }
 0x362   : >> { %v2018_v48 = vpop.eup %2017  ;;  %v1388_v50 = vpack.c.bf16 %v1334_v47, %v1332_v24 }
 0x363   : >> { %v1172_v53 = vpop.xlane.xlu1 %1171  ;;  %v1206_v54 = vmul.f32 %v2018_v48, %v2607_v33 }
 0x364   : >> { %1832 = vmatmul.msk.bf16.vlgmr.msrb.gmra.mxu1 %vm950_vm1, %v1388_v50  ;;  %2019 = vrcp.f32 %v1172_v53  ;;  %v1374_v53 = vld [vmem:[#allocation2 + $0x58] sm:$0xff] }
 0x365   : >> { %v1222_v30 = vpack.c.bf16 %v1206_v54, %v1206_v54 }
 0x367   : >> { %v1254_v55 = vunpack.c.l.b16 %v1222_v30 }
 0x369   : >> { %v1337_v36 = vpop.f32.mrf.mxu0  ;;  %v1264_v43 = vpack.c.b16 %v1254_v55, %v1253_v58  ;;  %v1375_v55 = vld [vmem:[#allocation2 + $0x18] sm:$0xff] }
 0x36a   : >> { %v2020_v59 = vpop.eup %2019 }
 0x36b   : >> { %1356 = vmatmul.bf16.gmra.mxu0 %v1264_v43  ;;  %v1174_v29 = vpop.xlane.xlu2 %1173  ;;  %v1207_v18 = vmul.f32 %v2020_v59, %v2611_v25  ;;  %v1376_v59 = vld [vmem:[#allocation2 + $0x50] sm:$0xff] }
 0x36c   : >> { %2021 = vrcp.f32 %v1174_v29 }
 0x36d   : >> { %v1223_v20 = vpack.c.bf16 %v1207_v18, %v1207_v18 }
 0x36f   : >> { %v1255_v31 = vunpack.c.l.b16 %v1223_v20 }
 0x371   : >> { %v1339_v34 = vpop.f32.mrf.mxu0 }
 0x372   : >> { %v2022_v0 = vpop.eup %2021  ;;  %v1389_v28 = vpack.c.bf16 %v1339_v34, %v1337_v36 }
 0x373   : >> { %v1176_v41 = vpop.xlane.xlu0 %1175  ;;  %v1208_v33 = vmul.f32 %v2022_v0, %v2617_v26 }
 0x374   : >> { %1833 = vmatmul.msk.bf16.gmra.mxu1 %vm950_vm1, %v1389_v28  ;;  %2023 = vrcp.f32 %v1176_v41  ;;  %v1377_v41 = vld [vmem:[#allocation2 + $0x68] sm:$0xff] }
 0x375   : >> { %v1224_v62 = vpack.c.bf16 %v1208_v33, %v1208_v33 }
 0x377   : >> { %v1256_v52 = vunpack.c.l.b16 %v1224_v62 }
 0x379   : >> { %v1342_v37 = vpop.f32.mrf.mxu0  ;;  %v1265_v61 = vpack.c.b16 %v1256_v52, %v1255_v31  ;;  %v1378_v31 = vld [vmem:[#allocation2 + $0x8] sm:$0xff] }
 0x37a   : >> { %v2024_v51 = vpop.eup %2023 }
 0x37b   : >> { %v1178_v46 = vpop.xlane.xlu1 %1177  ;;  %1361 = vmatmul.bf16.gmra.mxu0 %v1265_v61  ;;  %v1209_v25 = vmul.f32 %v2024_v51, %v2621_v32  ;;  %v1372_v32 = vld [vmem:[#allocation2 + $0x30] sm:$0xff]  ;;  %v1379_v51 = vld [vmem:[#allocation2 + $0x48] sm:$0xff] }
 0x37c   : >> { %2025 = vrcp.f32 %v1178_v46 }
 0x37d   : >> { %v1225_v21 = vpack.c.bf16 %v1209_v25, %v1209_v25 }
 0x37f   : >> { %v1257_v56 = vunpack.c.l.b16 %v1225_v21 }
 0x381   : >> { %v1344_v39 = vpop.f32.mrf.mxu0 }
 0x382   : >> { %v2026_v38 = vpop.eup %2025  ;;  %v1390_v35 = vpack.c.bf16 %v1344_v39, %v1342_v37 }
 0x383   : >> { %v1210_v26 = vmul.f32 %v2026_v38, %v2626_v40  ;;  %v1373_v40 = vld [vmem:[#allocation2] sm:$0xff] }
 0x384   : >> { %1834 = vmatmul.msk.bf16.gmra.mxu1 %vm950_vm1, %v1390_v35  ;;  %v1380_v38 = vld [vmem:[#allocation2 + $0x40] sm:$0xff] }
 0x385   : >> { %v1226_v42 = vpack.c.bf16 %v1210_v26, %v1210_v26  ;;  %v1381_v26 = vld [vmem:[#allocation2 + $0x20] sm:$0xff] }
 0x387   : >> { %v1258_v49 = vunpack.c.l.b16 %v1226_v42 }
 0x389   : >> { %v1347_v63 = vpop.f32.mrf.mxu0  ;;  %v1266_v44 = vpack.c.b16 %v1258_v49, %v1257_v56  ;;  %v1382_v49 = vld [vmem:[#allocation2 + $0x10] sm:$0xff] }
 0x38b   : >> { %1366 = vmatmul.bf16.vlgmr.msra.gmra.mxu2 %v1266_v44 }
 0x391   : >> { %v1349_v23 = vpop.f32.mrf.mxu0 }
 0x392   : >> { %v1391_v57 = vpack.c.bf16 %v1349_v23, %v1347_v63  ;;  %v1383_v23 = vld [vmem:[#allocation2 + $0x38] sm:$0xff] }
 0x394   : >> { %1835 = vmatmul.msk.bf16.gmra.mxu1 %vm950_vm1, %v1391_v57 }
 0x3d8   : >> { %v1352_v24 = vpop.f32.mrf.mxu0 }
 0x3e0   : >> { %v1354_v60 = vpop.f32.mrf.mxu0 }
 0x3e1   : >> { %v1392_v45 = vpack.c.bf16 %v1354_v60, %v1352_v24  ;;  %v1448_v27 = vpop.f32.mrf.mxu1 }
 0x3e2   : >> { %v1488_v19 = vadd.f32 %v1448_v27, %v1372_v32  ;;  %v1384_v32 = vld [vmem:[#allocation2 + $0x60] sm:$0xff]  ;;  %v1385_v27 = vld [vmem:[#allocation2 + $0x70] sm:$0xff] }
 0x3e3   : >> { %1836 = vmatmul.msk.bf16.gmra.mxu1 %vm950_vm1, %v1392_v45 }
 0x3e4   : >> { %1504 = vst [vmem:[#allocation2 + $0x30] sm:$0xff] %v1488_v19 }
 0x3e8   : >> { %v1357_v47 = vpop.f32.mrf.mxu0 }
 0x3e9   : >> { %v1450_v48 = vpop.f32.mrf.mxu1 }
 0x3ea   : >> { %v1489_v50 = vadd.f32 %v1450_v48, %v1373_v40 }
 0x3ec   : >> { %1505 = vst [vmem:[#allocation2] sm:$0xff] %v1489_v50 }
 0x3f0   : >> { %v1359_v54 = vpop.f32.mrf.mxu0 }
 0x3f1   : >> { %v1393_v22 = vpack.c.bf16 %v1359_v54, %v1357_v47  ;;  %v1453_v30 = vpop.f32.mrf.mxu1  ;;  %v1386_v47 = vld [vmem:[#allocation2 + $0x78] sm:$0xff] }
 0x3f2   : >> { %v1490_v58 = vadd.f32 %v1453_v30, %v1374_v53  ;;  %v1387_v53 = vld [vmem:[#allocation2 + $0x28] sm:$0xff]  ;;  %v1520_v30 = vld [vmem:[#allocation2 + $0x30] sm:$0xff] (%p409_p11) }
 0x3f3   : >> { %1837 = vmatmul.msk.bf16.gmra.mxu1 %vm950_vm1, %v1393_v22 }
 0x3f4   : >> { %1506 = vst [vmem:[#allocation2 + $0x58] sm:$0xff] %v1490_v58  ;;  %v2027_v58 = vld [vmem:[%s2714_s9] ss:$0 sm:$0xff] (%p409_p11) }
 0x3f8   : >> { %v1362_v36 = vpop.f32.mrf.mxu0 }
 0x3f9   : >> { %v1455_v43 = vpop.f32.mrf.mxu1 }
 0x3fa   : >> { %v1491_v29 = vadd.f32 %v1455_v43, %v1375_v55  ;;  %v1521_v55 = vld [vmem:[#allocation2] sm:$0xff] (%p409_p11) }
 0x3fc   : >> { %1507 = vst [vmem:[#allocation2 + $0x18] sm:$0xff] %v1491_v29  ;;  %v1540_v29 = vadd.f32 (%p409_p11), %v2027_v58, %v1520_v30 }
 0x3fe   : > { %1556 = vst [vmem:[%s2256_s21] sm:$0xff] (%p409_p11), %v1540_v29 }
 0x400   : >> { %v1364_v18 = vpop.f32.mrf.mxu0 }
 0x401   : >> { %v1394_v34 = vpack.c.bf16 %v1364_v18, %v1362_v36  ;;  %v1458_v0 = vpop.f32.mrf.mxu1  ;;  %v1522_v36 = vld [vmem:[#allocation2 + $0x58] sm:$0xff] (%p409_p11) }
 0x402   : >> { %v1492_v28 = vadd.f32 %v1458_v0, %v1376_v59  ;;  %v1541_v59 = vadd.f32 (%p409_p11), %v2027_v58, %v1521_v55  ;;  %v1542_v18 = vadd.f32 (%p409_p11), %v2027_v58, %v1522_v36 }
 0x403   : >> { %1838 = vmatmul.msk.bf16.gmra.mxu1 %vm950_vm1, %v1394_v34  ;;  %v1523_v43 = vld [vmem:[#allocation2 + $0x18] sm:$0xff] (%p409_p11) }
 0x404   : >> { %1508 = vst [vmem:[#allocation2 + $0x50] sm:$0xff] %v1492_v28  ;;  %v1543_v28 = vadd.f32 (%p409_p11), %v2027_v58, %v1523_v43 }
 0x405   : > { %1557 = vst [vmem:[%s2256_s21 + $0x8] sm:$0xff] (%p409_p11), %v1541_v59 }
 0x406   : > { %1558 = vst [vmem:[%s2256_s21 + $0x10] sm:$0xff] (%p409_p11), %v1542_v18 }
 0x407   : > { %1559 = vst [vmem:[%s2256_s21 + $0x18] sm:$0xff] (%p409_p11), %v1543_v28 }
 0x409   : >> { %v1460_v33 = vpop.f32.mrf.mxu1 }
 0x40a   : >> { %v1493_v20 = vadd.f32 %v1460_v33, %v1377_v41 }
 0x40b   : > { %v1524_v34 = vld [vmem:[#allocation2 + $0x50] sm:$0xff] (%p409_p11) }
 0x40c   : >> { %1509 = vst [vmem:[#allocation2 + $0x68] sm:$0xff] %v1493_v20  ;;  %v1544_v1 = vadd.f32 (%p409_p11), %v2027_v58, %v1524_v34 }
 0x40e   : >> { %v1367_v62 = vpop.f32.mrf.mxu2  ;;  %1560 = vst [vmem:[%s2256_s21 + $0x20] sm:$0xff] (%p409_p11), %v1544_v1 }
 0x411   : >> { %v1463_v52 = vpop.f32.mrf.mxu1 }
 0x412   : >> { %v1494_v37 = vadd.f32 %v1463_v52, %v1378_v31 }
 0x413   : > { %v1525_v0 = vld [vmem:[#allocation2 + $0x68] sm:$0xff] (%p409_p11) }
 0x414   : >> { %1510 = vst [vmem:[#allocation2 + $0x8] sm:$0xff] %v1494_v37  ;;  %v1545_v3 = vadd.f32 (%p409_p11), %v2027_v58, %v1525_v0 }
 0x416   : >> { %v1369_v61 = vpop.f32.mrf.mxu2  ;;  %1561 = vst [vmem:[%s2256_s21 + $0x28] sm:$0xff] (%p409_p11), %v1545_v3 }
 0x417   : >> { %v1395_v46 = vpack.c.bf16 %v1369_v61, %v1367_v62 }
 0x419   : >> { %v1465_v25 = vpop.f32.mrf.mxu1  ;;  %1839 = vmatmul.msk.bf16.gmra.mxu1 %vm950_vm1, %v1395_v46 }
 0x41a   : >> { %v1495_v39 = vadd.f32 %v1465_v25, %v1379_v51 }
 0x41b   : > { %v1526_v41 = vld [vmem:[#allocation2 + $0x8] sm:$0xff] (%p409_p11) }
 0x41c   : >> { %1511 = vst [vmem:[#allocation2 + $0x48] sm:$0xff] %v1495_v39  ;;  %v1546_v5 = vadd.f32 (%p409_p11), %v2027_v58, %v1526_v41 }
 0x41e   : > { %1562 = vst [vmem:[%s2256_s21 + $0x30] sm:$0xff] (%p409_p11), %v1546_v5 }
 0x423   : > { %v1527_v2 = vld [vmem:[#allocation2 + $0x48] sm:$0xff] (%p409_p11) }
 0x424   : > { %v1547_v7 = vadd.f32 (%p409_p11), %v2027_v58, %v1527_v2 }
 0x426   : > { %1563 = vst [vmem:[%s2256_s21 + $0x38] sm:$0xff] (%p409_p11), %v1547_v7 }
 0x460   : >> { %v1468_v35 = vpop.f32.mrf.mxu1 }
 0x461   : >> { %v1496_v21 = vadd.f32 %v1468_v35, %v1380_v38 }
 0x463   : >> { %1512 = vst [vmem:[#allocation2 + $0x40] sm:$0xff] %v1496_v21 }
 0x468   : >> { %v1470_v42 = vpop.f32.mrf.mxu1 }
 0x469   : >> { %v1497_v56 = vadd.f32 %v1470_v42, %v1381_v26 }
 0x46a   : > { %v1528_v4 = vld [vmem:[#allocation2 + $0x40] sm:$0xff] (%p409_p11) }
 0x46b   : >> { %1513 = vst [vmem:[#allocation2 + $0x20] sm:$0xff] %v1497_v56  ;;  %v1548_v9 = vadd.f32 (%p409_p11), %v2027_v58, %v1528_v4 }
 0x46d   : > { %1564 = vst [vmem:[%s2256_s21 + $0x40] sm:$0xff] (%p409_p11), %v1548_v9 }
 0x470   : >> { %v1473_v63 = vpop.f32.mrf.mxu1 }
 0x471   : >> { %v1498_v44 = vadd.f32 %v1473_v63, %v1382_v49 }
 0x472   : > { %v1529_v6 = vld [vmem:[#allocation2 + $0x20] sm:$0xff] (%p409_p11) }
 0x473   : >> { %1514 = vst [vmem:[#allocation2 + $0x10] sm:$0xff] %v1498_v44  ;;  %v1549_v11 = vadd.f32 (%p409_p11), %v2027_v58, %v1529_v6 }
 0x475   : > { %1565 = vst [vmem:[%s2256_s21 + $0x48] sm:$0xff] (%p409_p11), %v1549_v11 }
 0x478   : >> { %v1475_v57 = vpop.f32.mrf.mxu1 }
 0x479   : >> { %v1499_v24 = vadd.f32 %v1475_v57, %v1383_v23 }
 0x47a   : > { %v1530_v8 = vld [vmem:[#allocation2 + $0x10] sm:$0xff] (%p409_p11) }
 0x47b   : >> { %1515 = vst [vmem:[#allocation2 + $0x38] sm:$0xff] %v1499_v24  ;;  %v1550_v13 = vadd.f32 (%p409_p11), %v2027_v58, %v1530_v8 }
 0x47d   : > { %1566 = vst [vmem:[%s2256_s21 + $0x50] sm:$0xff] (%p409_p11), %v1550_v13 }
 0x480   : >> { %v1478_v60 = vpop.f32.mrf.mxu1 }
 0x481   : >> { %v1500_v45 = vadd.f32 %v1478_v60, %v1384_v32 }
 0x482   : > { %v1531_v10 = vld [vmem:[#allocation2 + $0x38] sm:$0xff] (%p409_p11) }
 0x483   : >> { %1516 = vst [vmem:[#allocation2 + $0x60] sm:$0xff] %v1500_v45  ;;  %v1551_v15 = vadd.f32 (%p409_p11), %v2027_v58, %v1531_v10 }
 0x485   : > { %1567 = vst [vmem:[%s2256_s21 + $0x58] sm:$0xff] (%p409_p11), %v1551_v15 }
 0x488   : >> { %v1480_v19 = vpop.f32.mrf.mxu1 }
 0x489   : >> { %v1501_v40 = vadd.f32 %v1480_v19, %v1385_v27 }
 0x48a   : > { %v1532_v12 = vld [vmem:[#allocation2 + $0x60] sm:$0xff] (%p409_p11) }
 0x48b   : >> { %1517 = vst [vmem:[#allocation2 + $0x70] sm:$0xff] %v1501_v40  ;;  %v1552_v17 = vadd.f32 (%p409_p11), %v2027_v58, %v1532_v12 }
 0x48d   : > { %1568 = vst [vmem:[%s2256_s21 + $0x60] sm:$0xff] (%p409_p11), %v1552_v17 }
 0x492   : > { %v1533_v14 = vld [vmem:[#allocation2 + $0x70] sm:$0xff] (%p409_p11) }
 0x493   : > { %v1553_v20 = vadd.f32 (%p409_p11), %v2027_v58, %v1533_v14 }
 0x495   : > { %1569 = vst [vmem:[%s2256_s21 + $0x68] sm:$0xff] (%p409_p11), %v1553_v20 }
 0x496   : >> { %v1483_v48 = vpop.f32.mrf.mxu1 }
 0x497   : >> { %v1502_v50 = vadd.f32 %v1483_v48, %v1386_v47 }
 0x499   : >> { %1518 = vst [vmem:[#allocation2 + $0x78] sm:$0xff] %v1502_v50 }
 0x49d   : > { %411 = sbr.rel (!%p409_p11) target bundleno = 39 (0x27), region = 112 }
 0x49e   : >> { %v1485_v54 = vpop.f32.mrf.mxu1 }
 0x49f   : >> { %v1503_v22 = vadd.f32 %v1485_v54, %v1387_v53 }
 0x4a0   : > { %v1534_v16 = vld [vmem:[#allocation2 + $0x78] sm:$0xff] (%p409_p11) }
 0x4a1   : >> { %1519 = vst [vmem:[#allocation2 + $0x28] sm:$0xff] %v1503_v22  ;;  %v1554_v62 = vadd.f32 (%p409_p11), %v2027_v58, %v1534_v16 }
 0x4a3   : > { %1570 = vst [vmem:[%s2256_s21 + $0x70] sm:$0xff] %v1554_v62 }
 0x4a8   : > { %v1535_v33 = vld [vmem:[#allocation2 + $0x28] sm:$0xff] }
 0x4a9   : > { %v1555_v31 = vadd.f32 %v2027_v58, %v1535_v33 }
 0x4ab   : > { %1571 = vst [vmem:[%s2256_s21 + $0x78] sm:$0xff] %v1555_v31 }
 0x4ac   : > { %2055 = shalt.err (!%p2052_p4)
}
 0x4ad   : > { %s2102_s25 = smov 128   ;;  %s2103_s21 = smov 8  }
 0x4ae   : > { %1909 = dma.vmem_to_hbm [thread:$0]  (%p2197_p5), %s1586_s17, 2048, %s1588_s28, %s1573_s18, %s2102_s25, %s2102_s25, %s2103_s21  }
 0x4af PF: > { %p1915_p7 = scmp.ge.s32.totalorder %s2094_s16, 2  ;;  %s1602_s11 = sand.u32 1, %s2082_s13  }
 0x4b0   : > { %s1603_s27 = scalar_lea.sflag [#allocation4], %s1602_s11 }
 0x4b1   : > { %p1912_p8 = pnand %p1915_p7, %p2201_p6 }
 0x4b3   : > { %p1913_p9 = pneg %p1912_p8 }
 0x4b5   : > { %2077 = dma.done.wait (%p1913_p9), %s1603_s27, 2048  }
 0x4b6   : > { %2079 = vsyncadd (%p1913_p9), %s1603_s27, 4294965248  ;;  %p20_p10 = scmp.ge.s32.totalorder %s2184_s19, 4   ;;  %s2720_s13 = smov %s2086_s14 }
 0x4b7   : > { %s2721_s14 = smov %s2090_s15  ;;  %s2722_s15 = smov %s2195_s22 }
 0x4b8   : > { %s2723_s16 = smov %s2184_s19  ;;  %22 = sbr.rel (!%p20_p10) target bundleno = 3 (0x3), region = 123 }
 0x4bd   :  { %1609 = vsyncpa [#allocation4], 1 }
 0x4be   :  { %1611 = vsyncpa [#allocation4 + $0x1], 1 }

// kernel: tpu_custom_call.1
= control target key start
LH: loop header
LB: loop body
LE: loop exit
PB: predicated region body
PF: predicated region fallthrough
CT: control target
= control target key end

     0   :  { %15 = vsyncpa [#allocation4], 0  ;;  %s2705_s0 = inlined_call_operand.vmem [shape: bf16[2,128,128], index: 0, kind: input, shape index: {}]   ;;  %s2706_s1 = inlined_call_operand.vmem [shape: f32[2,1,128], index: 1, kind: input, shape index: {}]   ;;  %s2707_s2 = inlined_call_operand.vmem [shape: bf16[4,128,32], index: 2, kind: input, shape index: {}]   ;;  %s2708_s3 = inlined_call_operand.vmem [shape: bf16[4,128,32], index: 3, kind: input, shape index: {}]   ;;  %s2709_s4 = inlined_call_operand.vmem [shape: bf16[4,128,32], index: 4, kind: input, shape index: {}]   ;;  %s2710_s5 = inlined_call_operand.vmem [shape: f32[4,1,32], index: 5, kind: input, shape index: {}]   ;;  %s2711_s6 = inlined_call_operand.vmem [shape: f32[4,1,32], index: 6, kind: input, shape index: {}]   ;;  %s2712_s7 = inlined_call_operand.vmem [shape: f32[4,1,32], index: 7, kind: input, shape index: {}]   ;;  %s2713_s8 = inlined_call_operand.vmem [shape: bf16[4,32,128], index: 8, kind: input, shape index: {}]   ;;  %s2714_s9 = inlined_call_operand.vmem [shape: f32[1,128], index: 9, kind: input, shape index: {}]   ;;  %s2715_s10 = inlined_call_operand.hbm [shape: f32[2,128,128], index: 10, kind: output, shape index: {}]  }
   0x1   :  { %17 = vsyncpa [#allocation4 + $0x1], 0  ;;  %s2159_s13 = smov 0   ;;  %s2161_s14 = smov 0  }
   0x2   :  { %s2163_s15 = smov 0   ;;  %s2165_s16 = smov 0  }
   0x3 LB: > { %s2180_s17 = sadd.s32 4294967295, %s2094_s16   ;;  %s1675_s18 = sadd.s32 4294967294, %s2094_s16   ;;  %s2094_s16 = sphi %s2165_s16, %s2723_s16   ;;  %s2090_s15 = sphi %s2163_s15, %s2722_s15   ;;  %s2086_s14 = sphi %s2161_s14, %s2721_s14   ;;  %s2082_s13 = sphi %s2159_s13, %s2720_s13  }
   0x4   : > { %s2184_s19 = sadd.s32 1, %s2094_s16   ;;  %s250_s20 = sadd.s32 1, %s2090_s15 }
   0x5   : > { %s247_s21 = ssub.s32 %s2094_s16, %s2184_s19  ;;  %p260_p0 = scmp.ne.s32.totalorder %s2090_s15, %s2086_s14 }
   0x6   : > { %p248_p1 = scmp.eq.s32.totalorder %s247_s21, 0  ;;  %p261_p2 = scmp.eq.s32.totalorder %s2180_s17, 1 }
   0x7   : > { %p266_p3 = scmp.ne.s32.totalorder %s2086_s14, %s2082_s13  ;;  %p267_p4 = scmp.eq.s32.totalorder %s1675_s18, 1 }
   0x8   : > { %s2195_s22 = scalar_select %p248_p1, %s2090_s15, %s250_s20  }
   0x9   : > { %p2197_p5 = por %p261_p2, %p260_p0  ;;  %p2201_p6 = por %p267_p4, %p266_p3 }
   0xa   : > { %p1678_p7 = scmp.ge.s32.totalorder %s2094_s16, 1  ;;  %p323_p8 = scmp.lt.s32.totalorder %s2094_s16, 3 }
   0xc   : > { %p324_p9 = pnand %p1678_p7, %p323_p8 }
   0xd   : > { %s361_s25 = sand.u32 (!%p324_p9), 1, %s2086_s14   ;;  %p364_p10 = scmp.lt.s32.totalorder (!%p324_p9), %s2180_s17, 1 }
   0xe   : > { %327 = sbr.rel (%p324_p9) target bundleno = 1199 (0x4af), region = 60  ;;  %s2211_s26 = sshll.u32 (!%p324_p9), %s361_s25, 7 }
   0xf   : > { %s2256_s21 = scalar_lea.vmem (!%p324_p9), [#allocation3], %s2211_s26 }
  0x13   : > { %v2100_v0 = vmov 0.0   ;;  %s365_s27 = scalar_select %p364_p10, %s2180_s17, 1 }
  0x14   : > { %391 = vst [vmem:[#allocation2 + $0x30] sm:$0xff] %v2100_v0 }
  0x15   : > { %392 = vst [vmem:[#allocation2] sm:$0xff] %v2100_v0  ;;  %s1845_s28 = sshll.u32 %s365_s27, 6  ;;  %s371_s11 = scalar_lea.vmem %s2706_s1, %s365_s27 }
  0x16   : > { %393 = vst [vmem:[#allocation2 + $0x58] sm:$0xff] %v2100_v0  ;;  %s368_s20 = scalar_lea.vmem %s2705_s0, %s1845_s28  ;;  %v2226_v4 = vld [vmem:[%s371_s11] sm:$0x1]  ;;  %s2258_s27 = smov 0  }
  0x17   : > { %394 = vst [vmem:[#allocation2 + $0x18] sm:$0xff] %v2100_v0  ;;  %v2220_v1 = vld [vmem:[%s368_s20] sm:$0xf]  ;;  %v2222_v2 = vld [vmem:[%s368_s20] sm:$0xf0]  ;;  %vm390_vm0 = vcmp.eq.f32.partialorder %v2226_v4, 0.0 }
  0x18   : > { %395 = vst [vmem:[#allocation2 + $0x50] sm:$0xff] %v2100_v0  ;;  %v2224_v3 = vld [vmem:[%s368_s20 + $0x8] sm:$0xf]  ;;  %v2228_v5 = vld [vmem:[%s368_s20 + $0x8] sm:$0xf0] }
  0x19   : > { %396 = vst [vmem:[#allocation2 + $0x68] sm:$0xff] %v2100_v0  ;;  %v2230_v6 = vld [vmem:[%s368_s20 + $0x10] sm:$0xf]  ;;  %v2232_v7 = vld [vmem:[%s368_s20 + $0x10] sm:$0xf0] }
  0x1a   : > { %v2234_v8 = vld [vmem:[%s368_s20 + $0x18] sm:$0xf]  ;;  %v2236_v9 = vld [vmem:[%s368_s20 + $0x18] sm:$0xf0]  ;;  %v2238_v10 = vld [vmem:[%s368_s20 + $0x20] sm:$0xf] }
  0x1b   : > { %v2240_v11 = vld [vmem:[%s368_s20 + $0x20] sm:$0xf0]  ;;  %v2242_v12 = vld [vmem:[%s368_s20 + $0x28] sm:$0xf]  ;;  %v2244_v13 = vld [vmem:[%s368_s20 + $0x28] sm:$0xf0] }
  0x1c   : > { %v2246_v14 = vld [vmem:[%s368_s20 + $0x30] sm:$0xf]  ;;  %v2248_v15 = vld [vmem:[%s368_s20 + $0x30] sm:$0xf0]  ;;  %v2250_v16 = vld [vmem:[%s368_s20 + $0x38] sm:$0xf] }
  0x1d   : > { %v2252_v17 = vld [vmem:[%s368_s20 + $0x38] sm:$0xf0]  ;;  %397 = vst [vmem:[#allocation2 + $0x8] sm:$0xff] %v2100_v0 }
  0x1e   : > { %398 = vst [vmem:[#allocation2 + $0x48] sm:$0xff] %v2100_v0 }
  0x1f   : > { %399 = vst [vmem:[#allocation2 + $0x40] sm:$0xff] %v2100_v0 }
  0x20   : > { %400 = vst [vmem:[#allocation2 + $0x20] sm:$0xff] %v2100_v0 }
  0x21   : > { %401 = vst [vmem:[#allocation2 + $0x10] sm:$0xff] %v2100_v0 }
  0x22   : > { %402 = vst [vmem:[#allocation2 + $0x38] sm:$0xff] %v2100_v0 }
  0x23   : > { %403 = vst [vmem:[#allocation2 + $0x60] sm:$0xff] %v2100_v0 }
  0x24   : > { %404 = vst [vmem:[#allocation2 + $0x70] sm:$0xff] %v2100_v0 }
  0x25   : > { %405 = vst [vmem:[#allocation2 + $0x78] sm:$0xff] %v2100_v0 }
  0x26   : > { %406 = vst [vmem:[#allocation2 + $0x28] sm:$0xff] %v2100_v0 }
  0x27 LB: >> { %s2264_s28 = sshll.u32 %s2098_s27, 6  ;;  %s600_s11 = scalar_lea.vmem %s2711_s6, %s2098_s27  ;;  %v2276_v26 = vor.u32 %v2240_v11, %v2238_v10  ;;  %v2280_v27 = vor.u32 %v2222_v2, %v2220_v1  ;;  %v2286_v28 = vor.u32 %v2244_v13, %v2242_v12  ;;  %v2290_v29 = vor.u32 %v2228_v5, %v2224_v3  ;;  %s2098_s27 = sphi %s2258_s27, %s412_s27  }
  0x28   : >> { %s583_s26 = scalar_lea.vmem %s2708_s3, %s2264_s28  ;;  %s415_s30 = scalar_lea.vmem %s2707_s2, %s2264_s28  ;;  %v2300_v34 = vor.u32 %v2248_v15, %v2246_v14  ;;  %v2304_v35 = vor.u32 %v2232_v7, %v2230_v6  ;;  %v2310_v40 = vor.u32 %v2252_v17, %v2250_v16  ;;  %v2314_v41 = vor.u32 %v2236_v9, %v2234_v8  ;;  %v2335_v43 = vld [vmem:[%s600_s11] ss:$0 sm:$0xff] }
  0x29   : >> { %v1871_v18 = vld [vmem:[%s583_s26 + $0x38] sm:$0xff]  ;;  %v1870_v19 = vld [vmem:[%s583_s26 + $0x30] sm:$0xff]  ;;  %v1869_v20 = vld [vmem:[%s583_s26 + $0x28] sm:$0xff]  ;;  %s2361_s12 = scalar_lea.vmem %s2709_s4, %s2264_s28  ;;  %vm950_vm1 = vcmask 261120   ;;  %s720_s20 = scalar_lea.vmem %s2712_s7, %s2098_s27 }
  0x2a   : >> { %1893 = vmatpush.bf16.msra.mxu3 %v1871_v18  ;;  %653 = vmatpush.bf16.msra.mxu1 %v1871_v18  ;;  %v1868_v21 = vld [vmem:[%s583_s26 + $0x20] sm:$0xff]  ;;  %v1867_v22 = vld [vmem:[%s583_s26 + $0x18] sm:$0xff]  ;;  %v1866_v23 = vld [vmem:[%s583_s26 + $0x10] sm:$0xff] }
  0x2b   : >> { %v1865_v24 = vld [vmem:[%s583_s26 + $0x8] sm:$0xff]  ;;  %v1864_v25 = vld [vmem:[%s583_s26] sm:$0xff]  ;;  %v1862_v30 = vld [vmem:[%s415_s30 + $0x38] sm:$0xff]  ;;  %s432_s26 = scalar_lea.vmem %s2710_s5, %s2098_s27 }
  0x2c   : >> { %533 = vmatpush.bf16.msra.mxu0 %v1862_v30  ;;  %v1861_v31 = vld [vmem:[%s415_s30 + $0x30] sm:$0xff]  ;;  %1885 = vmatpush.bf16.msra.mxu2 %v1862_v30  ;;  %v1860_v32 = vld [vmem:[%s415_s30 + $0x28] sm:$0xff]  ;;  %v1859_v33 = vld [vmem:[%s415_s30 + $0x20] sm:$0xff] }
  0x2d   : >> { %v1858_v36 = vld [vmem:[%s415_s30 + $0x18] sm:$0xff]  ;;  %v1857_v37 = vld [vmem:[%s415_s30 + $0x10] sm:$0xff]  ;;  %v1856_v38 = vld [vmem:[%s415_s30 + $0x8] sm:$0xff] }
  0x2e   : >> { %1894 = vmatpush.bf16.msra.mxu3 %v1870_v19  ;;  %654 = vmatpush.bf16.msra.mxu1 %v1870_v19  ;;  %v1855_v39 = vld [vmem:[%s415_s30] sm:$0xff] }
  0x30   : >> { %534 = vmatpush.bf16.msra.mxu0 %v1861_v31  ;;  %1886 = vmatpush.bf16.msra.mxu2 %v1861_v31 }
  0x32   : >> { %1895 = vmatpush.bf16.msra.mxu3 %v1869_v20  ;;  %655 = vmatpush.bf16.msra.mxu1 %v1869_v20  ;;  %v1880_v20 = vld [vmem:[%s2361_s12 + $0x38] sm:$0xff] }
  0x34   : >> { %535 = vmatpush.bf16.msra.mxu0 %v1860_v32  ;;  %1887 = vmatpush.bf16.msra.mxu2 %v1860_v32 }
  0x36   : >> { %1896 = vmatpush.bf16.msra.mxu3 %v1868_v21  ;;  %656 = vmatpush.bf16.msra.mxu1 %v1868_v21 }
  0x38   : >> { %536 = vmatpush.bf16.msra.mxu0 %v1859_v33  ;;  %1888 = vmatpush.bf16.msra.mxu2 %v1859_v33 }
  0x3a   : >> { %1897 = vmatpush.bf16.msra.mxu3 %v1867_v22  ;;  %657 = vmatpush.bf16.msra.mxu1 %v1867_v22 }
  0x3c   : >> { %537 = vmatpush.bf16.msra.mxu0 %v1858_v36  ;;  %1889 = vmatpush.bf16.msra.mxu2 %v1858_v36 }
  0x3e   : >> { %1898 = vmatpush.bf16.msra.mxu3 %v1866_v23  ;;  %658 = vmatpush.bf16.msra.mxu1 %v1866_v23  ;;  %v1879_v23 = vld [vmem:[%s2361_s12 + $0x30] sm:$0xff] }
  0x40   : >> { %538 = vmatpush.bf16.msra.mxu0 %v1857_v37  ;;  %1890 = vmatpush.bf16.msra.mxu2 %v1857_v37  ;;  %v1877_v37 = vld [vmem:[%s2361_s12 + $0x20] sm:$0xff] }
  0x42   : >> { %1899 = vmatpush.bf16.msra.mxu3 %v1865_v24  ;;  %659 = vmatpush.bf16.msra.mxu1 %v1865_v24  ;;  %v1878_v24 = vld [vmem:[%s2361_s12 + $0x28] sm:$0xff] }
  0x44   : >> { %539 = vmatpush.bf16.msra.mxu0 %v1856_v38  ;;  %1891 = vmatpush.bf16.msra.mxu2 %v1856_v38 }
  0x46   : >> { %1900 = vmatpush.bf16.msra.mxu3 %v1864_v25  ;;  %660 = vmatpush.bf16.msra.mxu1 %v1864_v25 }
  0x48   : >> { %540 = vmatpush.bf16.msra.mxu0 %v1855_v39  ;;  %1892 = vmatpush.bf16.msra.mxu2 %v1855_v39 }
  0x49   : >> { %681 = vmatmul.bf16.vlgmr.msra.gmra.mxu3 %v2276_v26  ;;  %661 = vmatmul.bf16.vlgmr.msra.gmra.mxu1 %v2280_v27 }
  0x4b   : >> { %541 = vmatmul.bf16.vlgmr.msra.gmra.mxu0 %v2280_v27  ;;  %566 = vmatmul.bf16.vlgmr.msra.gmra.mxu2 %v2286_v28 }
  0x4c   : >> { %773 = vmatpush.bf16.msrb.mxu2 %v1880_v20 }
  0x50   : >> { %774 = vmatpush.bf16.msrb.mxu2 %v1879_v23 }
  0x54   : >> { %775 = vmatpush.bf16.msrb.mxu2 %v1878_v24 }
  0x58   : >> { %776 = vmatpush.bf16.msrb.mxu2 %v1877_v37 }
  0x59   : >> { %686 = vmatmul.bf16.gmra.mxu3 %v2286_v28  ;;  %666 = vmatmul.bf16.gmra.mxu1 %v2290_v29 }
  0x5b   : >> { %546 = vmatmul.bf16.gmra.mxu0 %v2290_v29  ;;  %571 = vmatmul.bf16.gmra.mxu2 %v2300_v34 }
  0x69   : >> { %691 = vmatmul.bf16.gmra.mxu3 %v2300_v34  ;;  %671 = vmatmul.bf16.gmra.mxu1 %v2304_v35 }
  0x6b   : >> { %551 = vmatmul.bf16.gmra.mxu0 %v2304_v35  ;;  %576 = vmatmul.bf16.gmra.mxu2 %v2310_v40 }
  0x79   : >> { %696 = vmatmul.bf16.gmra.mxu3 %v2310_v40  ;;  %676 = vmatmul.bf16.gmra.mxu1 %v2314_v41 }
  0x7b   : >> { %556 = vmatmul.bf16.gmra.mxu0 %v2314_v41 }
  0x8b   : >> { %561 = vmatmul.bf16.gmra.mxu0 %v2276_v26 }
  0xc6   : >> { %v662_v42 = vpop.f32.mrf.mxu1 }
  0xc7   : >> { %v663_v44 = vadd.f32 %v2335_v43, %v662_v42  ;;  %v1876_v42 = vld [vmem:[%s2361_s12 + $0x18] sm:$0xff] }
  0xc8   : >> { %777 = vmatpush.bf16.msrb.mxu2 %v1876_v42  ;;  %v542_v42 = vpop.f32.mrf.mxu0 }
  0xc9   : >> { %v838_v46 = vpack.c.bf16 %v663_v44, %v663_v44 }
  0xcb   : >> { %v2340_v50 = vunpack.c.l.b16 %v838_v46 }
  0xcc   : >> { %v682_v45 = vpop.f32.mrf.mxu3 }
  0xcd   : >> { %v683_v49 = vadd.f32 %v2335_v43, %v682_v45 }
  0xce   : >> { %v664_v47 = vpop.f32.mrf.mxu1 }
  0xcf   : >> { %v665_v48 = vadd.f32 %v2335_v43, %v664_v47  ;;  %v846_v54 = vpack.c.bf16 %v683_v49, %v683_v49 }
  0xd1   : >> { %v839_v51 = vpack.c.bf16 %v665_v48, %v665_v48  ;;  %v2347_v58 = vunpack.c.l.b16 %v846_v54  ;;  %v1875_v54 = vld [vmem:[%s2361_s12 + $0x10] sm:$0xff] }
  0xd2   : >> { %778 = vmatpush.bf16.msrb.mxu2 %v1875_v54  ;;  %v544_v54 = vpop.f32.mrf.mxu0 }
  0xd3   : >> { %v2342_v52 = vunpack.c.l.b16 %v839_v51 }
  0xd4   : >> { %v684_v53 = vpop.f32.mrf.mxu3 }
  0xd5   : >> { %v685_v55 = vadd.f32 %v2335_v43, %v684_v53  ;;  %v942_v56 = vpack.c.b16 %v2342_v52, %v2340_v50 }
  0xd6   : >> { %v2353_v63 = vpop.f32.mrf.mxu1 }
  0xd7   : >> { %v847_v57 = vpack.c.bf16 %v685_v55, %v685_v55 }
  0xd9   : >> { %v2349_v59 = vunpack.c.l.b16 %v847_v57 }
  0xdb   : >> { %v946_v60 = vpack.c.b16 %v2349_v59, %v2347_v58 }
  0xdc   : >> { %v687_v61 = vpop.f32.mrf.mxu3 }
  0xdd   : >> { %v688_v55 = vadd.f32 %v2335_v43, %v687_v61 }
  0xde   : >> { %v2355_v18 = vpop.f32.mrf.mxu1 }
  0xdf   : >> { %v848_v23 = vpack.c.bf16 %v688_v55, %v688_v55  ;;  %v670_v58 = vadd.f32 %v2335_v43, %v2355_v18 }
  0xe1   : >> { %v841_v55 = vpack.c.bf16 %v670_v58, %v670_v58 }
  0xe4   : >> { %v689_v62 = vpop.f32.mrf.mxu3 }
  0xe5   : >> { %v690_v49 = vadd.f32 %v2335_v43, %v689_v62 }
  0xe6   : >> { %v672_v22 = vpop.f32.mrf.mxu1 }
  0xe7   : >> { %v849_v20 = vpack.c.bf16 %v690_v49, %v690_v49 }
  0xe9   : >> { %v937_v62 = vunpack.c.l.b16 %v849_v20  ;;  %v547_v20 = vpop.f32.mrf.mxu0 }
  0xec   : >> { %v692_v0 = vpop.f32.mrf.mxu3 }
  0xed   : >> { %v693_v38 = vadd.f32 %v2335_v43, %v692_v0 }
  0xee   : >> { %v674_v36 = vpop.f32.mrf.mxu1 }
  0xef   : >> { %v850_v47 = vpack.c.bf16 %v693_v38, %v693_v38 }
  0xf1   : >> { %v938_v57 = vunpack.c.l.b16 %v850_v47 }
  0xf4   : >> { %v694_v19 = vpop.f32.mrf.mxu3 }
  0xf5   : >> { %v695_v31 = vadd.f32 %v2335_v43, %v694_v19  ;;  %v1874_v19 = vld [vmem:[%s2361_s12 + $0x8] sm:$0xff] }
  0xf6   : >> { %v677_v0 = vpop.f32.mrf.mxu1  ;;  %779 = vmatpush.bf16.msrb.mxu2 %v1874_v19  ;;  %v929_v19 = vunpack.c.l.b16 %v841_v55 }
  0xf7   : >> { %v851_v44 = vpack.c.bf16 %v695_v31, %v695_v31 }
  0xf9   : >> { %v939_v51 = vunpack.c.l.b16 %v851_v44  ;;  %v988_v44 = vsel %vm950_vm1, %v946_v60, 0 }
  0xfc   : >> { %v697_v21 = vpop.f32.mrf.mxu3 }
  0xfd   : >> { %v698_v25 = vadd.f32 %v2335_v43, %v697_v21  ;;  %v948_v21 = vpack.c.b16 %v939_v51, %v938_v57 }
  0xfe   : >> { %v679_v31 = vpop.f32.mrf.mxu1 }
  0xff   : >> { %v852_v32 = vpack.c.bf16 %v698_v25, %v698_v25  ;;  %v994_v24 = vsel %vm950_vm1, %v948_v21, 0  ;;  %v1873_v25 = vld [vmem:[%s2361_s12] sm:$0xff]  ;;  %s1881_s12 = sshll.u32 %s2098_s27, 4  ;;  %s412_s27 = sadd.s32 1, %s2098_s27  }
 0x100   : >> { %780 = vmatpush.bf16.msrb.mxu2 %v1873_v25  ;;  %p409_p11 = scmp.ge.s32.totalorder %s412_s27, 4  }
 0x101   : >> { %v940_v45 = vunpack.c.l.b16 %v852_v32  ;;  %v678_v32 = vadd.f32 %v2335_v43, %v677_v0  ;;  %s1884_s27 = sshll.u32 (%p409_p11), %s2180_s17, 7  ;;  %s1585_s17 = sshll.u32 (%p409_p11), %s2256_s21, 4  ;;  %s1586_s17 = int_to_ptr.vmem [resolvable:$true] %s1585_s17 }
 0x102   : > { %s1573_s18 = scalar_lea.sflag (%p409_p11), [#allocation4], %s361_s25 }
 0x103   : >> { %781 = vmatmul.bf16.vlgmr.msrb.gmra.mxu2 %v2280_v27  ;;  %v844_v38 = vpack.c.bf16 %v678_v32, %v678_v32 }
 0x104   : >> { %v699_v30 = vpop.f32.mrf.mxu3 }
 0x105   : >> { %v700_v33 = vadd.f32 %v2335_v43, %v699_v30  ;;  %v936_v30 = vunpack.c.l.b16 %v848_v23  ;;  %v932_v27 = vunpack.c.l.b16 %v844_v38 }
 0x107   : >> { %v853_v39 = vpack.c.bf16 %v700_v33, %v700_v33  ;;  %v947_v61 = vpack.c.b16 %v937_v62, %v936_v30  ;;  %v680_v33 = vadd.f32 %v2335_v43, %v679_v31  ;;  %v549_v62 = vpop.f32.mrf.mxu0  ;;  %v976_v30 = vsel %vm950_vm1, %v942_v56, 0 }
 0x109   : >> { %v941_v46 = vunpack.c.l.b16 %v853_v39  ;;  %v991_v37 = vsel %vm950_vm1, %v947_v61, 0  ;;  %v845_v39 = vpack.c.bf16 %v680_v33, %v680_v33 }
 0x10b   : >> { %v949_v48 = vpack.c.b16 %v941_v46, %v940_v45  ;;  %v673_v45 = vadd.f32 %v2335_v43, %v672_v22  ;;  %v675_v46 = vadd.f32 %v2335_v43, %v674_v36  ;;  %v933_v47 = vunpack.c.l.b16 %v845_v39 }
 0x10d   : >> { %v997_v53 = vsel %vm950_vm1, %v949_v48, 0  ;;  %v842_v48 = vpack.c.bf16 %v673_v45, %v673_v45  ;;  %v843_v49 = vpack.c.bf16 %v675_v46, %v675_v46  ;;  %v945_v51 = vpack.c.b16 %v933_v47, %v932_v27  ;;  %v567_v47 = vpop.f32.mrf.mxu2 }
 0x10e   : >> { %999 = vmatpush.bf16.xpose.msrb.mxu3 %v997_v53  ;;  %v668_v53 = vadd.f32 %v2335_v43, %v2353_v63  ;;  %v2405_v43 = vld [vmem:[%s432_s26] ss:$0 sm:$0xff]  ;;  %s2048_s26 = scalar_lea.hbm (%p409_p11), %s2715_s10, 256 }
 0x10f   : >> { %v930_v59 = vunpack.c.l.b16 %v842_v48  ;;  %v931_v60 = vunpack.c.l.b16 %v843_v49  ;;  %v985_v22 = vsel %vm950_vm1, %v945_v51, 0  ;;  %v543_v21 = vadd.f32 %v2405_v43, %v542_v42  ;;  %v552_v32 = vpop.f32.mrf.mxu0 }
 0x110   : >> { %v840_v36 = vpack.c.bf16 %v668_v53, %v668_v53  ;;  %v545_v23 = vadd.f32 %v2405_v43, %v544_v54  ;;  %v548_v33 = vadd.f32 %v2405_v43, %v547_v20  ;;  %v553_v45 = vadd.f32 %v2405_v43, %v552_v32 }
 0x111   : >> { %v944_v57 = vpack.c.b16 %v931_v60, %v930_v59 }
 0x112   : >> { %v928_v0 = vunpack.c.l.b16 %v840_v36  ;;  %v823_v25 = vpack.c.bf16 %v545_v23, %v545_v23  ;;  %v824_v38 = vpack.c.bf16 %v548_v33, %v548_v33  ;;  %v826_v46 = vpack.c.bf16 %v553_v45, %v553_v45 }
 0x113   : >> { %786 = vmatmul.bf16.gmra.mxu2 %v2290_v29  ;;  %v982_v29 = vsel %vm950_vm1, %v944_v57, 0 }
 0x114   : >> { %v943_v63 = vpack.c.b16 %v929_v19, %v928_v0  ;;  %v887_v31 = vunpack.c.l.b16 %v823_v25  ;;  %v890_v48 = vunpack.c.l.b16 %v826_v46  ;;  %v568_v25 = vadd.f32 %v2405_v43, %v567_v47 }
 0x115   : >> { %v569_v54 = vpop.f32.mrf.mxu2 }
 0x116   : >> { %1000 = vmatpush.bf16.xpose.msrb.mxu3 %v994_v24  ;;  %v979_v18 = vsel %vm950_vm1, %v943_v63, 0  ;;  %v822_v24 = vpack.c.bf16 %v543_v21, %v543_v21 }
 0x117   : >> { %v554_v42 = vpop.f32.mrf.mxu0 }
 0x118   : >> { %v886_v61 = vunpack.c.l.b16 %v822_v24 }
 0x11d   : >> { %v572_v57 = vpop.f32.mrf.mxu2 }
 0x11e   : >> { %1001 = vmatpush.bf16.xpose.msrb.mxu3 %v991_v37  ;;  %v550_v37 = vadd.f32 %v2405_v43, %v549_v62 }
 0x11f   : >> { %v557_v56 = vpop.f32.mrf.mxu0 }
 0x120   : >> { %v825_v39 = vpack.c.bf16 %v550_v37, %v550_v37  ;;  %v573_v37 = vadd.f32 %v2405_v43, %v572_v57 }
 0x122   : >> { %v889_v50 = vunpack.c.l.b16 %v825_v39  ;;  %v834_v39 = vpack.c.bf16 %v573_v37, %v573_v37 }
 0x123   : >> { %791 = vmatmul.bf16.gmra.mxu2 %v2304_v35  ;;  %v902_v35 = vpack.c.b16 %v887_v31, %v886_v61 }
 0x126   : >> { %1002 = vmatpush.bf16.xpose.msrb.mxu3 %v988_v44  ;;  %v888_v44 = vunpack.c.l.b16 %v824_v38 }
 0x127   : >> { %v559_v51 = vpop.f32.mrf.mxu0 }
 0x128   : >> { %v903_v52 = vpack.c.b16 %v889_v50, %v888_v44  ;;  %v560_v58 = vadd.f32 %v2405_v43, %v559_v51  ;;  %v898_v44 = vunpack.c.l.b16 %v834_v39 }
 0x12e   : >> { %1003 = vmatpush.bf16.xpose.msrb.mxu3 %v985_v22  ;;  %v829_v22 = vpack.c.bf16 %v560_v58, %v560_v58  ;;  %v2101_v58 = vmov 0  }
 0x12f   : >> { %v562_v59 = vpop.f32.mrf.mxu0 }
 0x130   : >> { %v893_v55 = vunpack.c.l.b16 %v829_v22 }
 0x133   : >> { %796 = vmatmul.bf16.gmra.mxu2 %v2314_v41  ;;  %v555_v41 = vadd.f32 %v2405_v43, %v554_v42 }
 0x135   : >> { %v827_v27 = vpack.c.bf16 %v555_v41, %v555_v41 }
 0x136   : >> { %1004 = vmatpush.bf16.xpose.msrb.mxu3 %v982_v29  ;;  %v563_v29 = vadd.f32 %v2405_v43, %v562_v59 }
 0x137   : >> { %v891_v49 = vunpack.c.l.b16 %v827_v27  ;;  %v564_v0 = vpop.f32.mrf.mxu0 }
 0x138   : >> { %v830_v20 = vpack.c.bf16 %v563_v29, %v563_v29 }
 0x139   : >> { %v904_v53 = vpack.c.b16 %v891_v49, %v890_v48 }
 0x13a   : >> { %v894_v21 = vunpack.c.l.b16 %v830_v20 }
 0x13e   : >> { %1005 = vmatpush.bf16.xpose.msrb.mxu3 %v979_v18  ;;  %v574_v18 = vpop.f32.mrf.mxu2 }
 0x13f   : >> { %v575_v38 = vadd.f32 %v2405_v43, %v574_v18 }
 0x141   : >> { %v835_v42 = vpack.c.bf16 %v575_v38, %v575_v38  ;;  %v1962_v38 = vld [vmem:[%s720_s20] ss:$0 sm:$0xff]  ;;  %s1398_s20 = scalar_lea.vmem %s2713_s8, %s1881_s12  ;;  %s1584_s12 = scalar_lea.hbm (%p409_p11), %s2715_s10, %s1884_s27 }
 0x142   : > { %s1587_s28 = sshll.u32 (%p409_p11), %s1584_s12, 4  ;;  %s1588_s28 = int_to_ptr.hbm [resolvable:$true] %s1587_s28 }
 0x143   : >> { %801 = vmatmul.bf16.gmra.mxu2 %v2276_v26  ;;  %v558_v26 = vadd.f32 %v2405_v43, %v557_v56  ;;  %v899_v50 = vunpack.c.l.b16 %v835_v42 }
 0x145   : >> { %v828_v60 = vpack.c.bf16 %v558_v26, %v558_v26  ;;  %v908_v56 = vpack.c.b16 %v899_v50, %v898_v44 }
 0x146   : >> { %1006 = vmatpush.bf16.xpose.msrb.mxu3 %v976_v30  ;;  %v577_v24 = vpop.f32.mrf.mxu2  ;;  %v832_v30 = vpack.c.bf16 %v568_v25, %v568_v25 }
 0x147   : >> { %v892_v36 = vunpack.c.l.b16 %v828_v60  ;;  %v578_v45 = vadd.f32 %v2405_v43, %v577_v24 }
 0x148   : >> { %v896_v31 = vunpack.c.l.b16 %v832_v30 }
 0x149   : >> { %v905_v19 = vpack.c.b16 %v893_v55, %v892_v36  ;;  %v836_v27 = vpack.c.bf16 %v578_v45, %v578_v45 }
 0x14b   : >> { %v900_v48 = vunpack.c.l.b16 %v836_v27 }
 0x14d   : >> { %1814 = vmatmul.msk.bf16.vlgmr.msrb.gmra.mxu3 %vm950_vm1, %v902_v35 }
 0x14e   : >> { %v579_v35 = vpop.f32.mrf.mxu2 }
 0x14f   : >> { %v580_v41 = vadd.f32 %v2405_v43, %v579_v35 }
 0x151   : >> { %v837_v47 = vpack.c.bf16 %v580_v41, %v580_v41 }
 0x153   : >> { %806 = vmatmul.bf16.gmra.mxu2 %v2286_v28  ;;  %v565_v28 = vadd.f32 %v2405_v43, %v564_v0  ;;  %v901_v49 = vunpack.c.l.b16 %v837_v47 }
 0x155   : >> { %v831_v63 = vpack.c.bf16 %v565_v28, %v565_v28 }
 0x157   : >> { %v895_v23 = vunpack.c.l.b16 %v831_v63 }
 0x159   : >> { %v906_v62 = vpack.c.b16 %v895_v23, %v894_v21 }
 0x15d   : >> { %1815 = vmatmul.msk.bf16.gmra.mxu3 %vm950_vm1, %v903_v52 }
 0x163   : >> { %811 = vmatmul.bf16.gmra.mxu2 %v2300_v34  ;;  %v570_v34 = vadd.f32 %v2405_v43, %v569_v54  ;;  %v1048_v43 = vsel %vm390_vm0, 1, %v2101_v58 }
 0x164   : >> { %v1049_v59 = vperm.slane %v1048_v43, 0 }
 0x165   : >> { %v833_v61 = vpack.c.bf16 %v570_v34, %v570_v34 }
 0x166   : >> { %vm2456_vm2 = vcmp.eq.s32.totalorder %v1049_v59, 1 }
 0x167   : >> { %v897_v32 = vunpack.c.l.b16 %v833_v61 }
 0x169   : >> { %v907_v33 = vpack.c.b16 %v897_v32, %v896_v31 }
 0x16d   : >> { %1816 = vmatmul.msk.bf16.gmra.mxu3 %vm950_vm1, %v904_v53  ;;  %v909_v53 = vpack.c.b16 %v901_v49, %v900_v48 }
 0x173   : >> { %816 = vmatmul.bf16.gmra.mxu2 %v2310_v40 }
 0x17d   : >> { %1817 = vmatmul.msk.bf16.gmra.mxu3 %vm950_vm1, %v905_v19 }
 0x186   : >> { %v2438_v40 = vpop.f32.mrf.mxu2 }
 0x18d   : >> { %1818 = vmatmul.msk.bf16.gmra.mxu3 %vm950_vm1, %v906_v62 }
 0x18e   : >> { %v2440_v52 = vpop.f32.mrf.mxu2 }
 0x196   : >> { %v2445_v46 = vpop.f32.mrf.mxu2 }
 0x19d   : >> { %1819 = vmatmul.msk.bf16.gmra.mxu3 %vm950_vm1, %v907_v33 }
 0x19e   : >> { %v2447_v51 = vpop.f32.mrf.mxu2 }
 0x1a6   : >> { %v2450_v54 = vpop.f32.mrf.mxu2 }
 0x1ad   : >> { %1820 = vmatmul.msk.bf16.gmra.mxu3 %vm950_vm1, %v908_v56 }
 0x1ae   : >> { %v2452_v26 = vpop.f32.mrf.mxu2 }
 0x1b6   : >> { %v2460_v22 = vpop.f32.mrf.mxu2 }
 0x1bd   : >> { %1821 = vmatmul.msk.bf16.gmra.mxu3 %vm950_vm1, %v909_v53 }
 0x1be   : >> { %v2467_v57 = vpop.f32.mrf.mxu2 }
 0x1c6   : >> { %v802_v29 = vpop.f32.mrf.mxu2 }
 0x1ce   : >> { %v804_v63 = vpop.f32.mrf.mxu2 }
 0x1d0   : >> { %v1008_v36 = vpop.f32.mrf.mxu3 }
 0x1d1   : >> { %v2464_v55 = vsel %vm2456_vm2, -3.4028235e+38, %v1008_v36 }
 0x1d2   : >> { %1067 = vmax.xlane.f32.xlu0 %v2464_v55 }
 0x1d6   : >> { %v807_v23 = vpop.f32.mrf.mxu2 }
 0x1d8   : >> { %v1010_v0 = vpop.f32.mrf.mxu3 }
 0x1d9   : >> { %v2471_v19 = vsel %vm2456_vm2, -3.4028235e+38, %v1010_v0 }
 0x1da   : >> { %1069 = vmax.xlane.f32.xlu0 %v2471_v19 }
 0x1de   : >> { %v809_v25 = vpop.f32.mrf.mxu2 }
 0x1e0   : >> { %v1013_v28 = vpop.f32.mrf.mxu3 }
 0x1e1   : >> { %v2476_v20 = vsel %vm2456_vm2, -3.4028235e+38, %v1013_v28  ;;  %v803_v28 = vadd.f32 %v1962_v38, %v802_v29  ;;  %v800_v29 = vadd.f32 %v1962_v38, %v2467_v57  ;;  %v790_v57 = vadd.f32 %v1962_v38, %v2447_v51 }
 0x1e2   : >> { %1071 = vmax.xlane.f32.xlu1 %v2476_v20 }
 0x1e6   : >> { %v812_v61 = vpop.f32.mrf.mxu2 }
 0x1e7   : >> { %v813_v56 = vadd.f32 %v1962_v38, %v812_v61  ;;  %v862_v61 = vpack.c.bf16 %v803_v28, %v803_v28 }
 0x1e8   : >> { %v1015_v18 = vpop.f32.mrf.mxu3 }
 0x1e9   : >> { %v2481_v21 = vsel %vm2456_vm2, -3.4028235e+38, %v1015_v18  ;;  %v866_v47 = vpack.c.bf16 %v813_v56, %v813_v56  ;;  %v805_v18 = vadd.f32 %v1962_v38, %v804_v63  ;;  %v798_v56 = vadd.f32 %v1962_v38, %v2460_v22 }
 0x1ea   : >> { %1073 = vmax.xlane.f32.xlu1 %v2481_v21  ;;  %v1299_v63 = vunpack.c.l.b16 %v862_v61  ;;  %v788_v22 = vadd.f32 %v1962_v38, %v2445_v46 }
 0x1eb   : >> { %v1303_v43 = vunpack.c.l.b16 %v866_v47  ;;  %v860_v47 = vpack.c.bf16 %v798_v56, %v798_v56 }
 0x1ee   : >> { %v814_v35 = vpop.f32.mrf.mxu2 }
 0x1ef   : >> { %v815_v45 = vadd.f32 %v1962_v38, %v814_v35  ;;  %v863_v35 = vpack.c.bf16 %v805_v18, %v805_v18  ;;  %v856_v18 = vpack.c.bf16 %v788_v22, %v788_v22 }
 0x1f0   : >> { %v1018_v62 = vpop.f32.mrf.mxu3 }
 0x1f1   : >> { %v2486_v24 = vsel %vm2456_vm2, -3.4028235e+38, %v1018_v62  ;;  %v867_v48 = vpack.c.bf16 %v815_v45, %v815_v45  ;;  %v808_v62 = vadd.f32 %v1962_v38, %v807_v23  ;;  %v1300_v23 = vunpack.c.l.b16 %v863_v35 }
 0x1f2   : >> { %1075 = vmax.xlane.f32.xlu2 %v2486_v24  ;;  %v1293_v61 = vunpack.c.l.b16 %v856_v18 }
 0x1f3   : >> { %v1304_v59 = vunpack.c.l.b16 %v867_v48  ;;  %v861_v48 = vpack.c.bf16 %v800_v29, %v800_v29 }
 0x1f6   : >> { %v817_v39 = vpop.f32.mrf.mxu2 }
 0x1f7   : >> { %v818_v50 = vadd.f32 %v1962_v38, %v817_v39 }
 0x1f8   : >> { %v1020_v34 = vpop.f32.mrf.mxu3 }
 0x1f9   : >> { %v2491_v30 = vsel %vm2456_vm2, -3.4028235e+38, %v1020_v34  ;;  %v868_v41 = vpack.c.bf16 %v818_v50, %v818_v50  ;;  %v810_v34 = vadd.f32 %v1962_v38, %v809_v25  ;;  %v795_v50 = vadd.f32 %v1962_v38, %v2452_v26 }
 0x1fa   : >> { %1077 = vmax.xlane.f32.xlu2 %v2491_v30  ;;  %v785_v26 = vadd.f32 %v1962_v38, %v2440_v52 }
 0x1fb   : >> { %v1305_v53 = vunpack.c.l.b16 %v868_v41  ;;  %v865_v39 = vpack.c.bf16 %v810_v34, %v810_v34 }
 0x1fc   : >> { %v855_v28 = vpack.c.bf16 %v785_v26, %v785_v26 }
 0x1fd   : >> { %v1302_v45 = vunpack.c.l.b16 %v865_v39 }
 0x1fe   : >> { %v819_v27 = vpop.f32.mrf.mxu2  ;;  %v1292_v52 = vunpack.c.l.b16 %v855_v28 }
 0x1ff   : >> { %v820_v49 = vadd.f32 %v1962_v38, %v819_v27  ;;  %v859_v27 = vpack.c.bf16 %v795_v50, %v795_v50 }
 0x200   : >> { %v1023_v31 = vpop.f32.mrf.mxu3 }
 0x201   : >> { %v2496_v32 = vsel %vm2456_vm2, -3.4028235e+38, %v1023_v31  ;;  %v869_v58 = vpack.c.bf16 %v820_v49, %v820_v49  ;;  %v1313_v31 = vpack.c.b16 %v1304_v59, %v1303_v43  ;;  %v1296_v43 = vunpack.c.l.b16 %v859_v27 }
 0x202   : >> { %1079 = vmax.xlane.f32.xlu0 %v2496_v32  ;;  %v1297_v59 = vunpack.c.l.b16 %v860_v47 }
 0x203   : >> { %v1306_v36 = vunpack.c.l.b16 %v869_v58 }
 0x205   : >> { %v1314_v0 = vpack.c.b16 %v1306_v36, %v1305_v53  ;;  %v1311_v53 = vpack.c.b16 %v1300_v23, %v1299_v63  ;;  %v1298_v36 = vunpack.c.l.b16 %v861_v48 }
 0x207   : >> { %1323 = vmatpush.bf16.msrb.mxu0 %v1314_v0  ;;  %1901 = vmatpush.bf16.msra.mxu2 %v1314_v0  ;;  %v1310_v34 = vpack.c.b16 %v1298_v36, %v1297_v59 }
 0x208   : >> { %v1025_v33 = vpop.f32.mrf.mxu3 }
 0x209   : >> { %v2501_v37 = vsel %vm2456_vm2, -3.4028235e+38, %v1025_v33  ;;  %v864_v33 = vpack.c.bf16 %v808_v62, %v808_v62  ;;  %v857_v62 = vpack.c.bf16 %v790_v57, %v790_v57 }
 0x20a   : >> { %1081 = vmax.xlane.f32.xlu1 %v2501_v37 }
 0x20b   : >> { %1324 = vmatpush.bf16.msrb.mxu0 %v1313_v31  ;;  %1902 = vmatpush.bf16.msra.mxu2 %v1313_v31  ;;  %v1301_v25 = vunpack.c.l.b16 %v864_v33  ;;  %v1294_v46 = vunpack.c.l.b16 %v857_v62 }
 0x20d   : >> { %v1312_v49 = vpack.c.b16 %v1302_v45, %v1301_v25  ;;  %v1308_v51 = vpack.c.b16 %v1294_v46, %v1293_v61 }
 0x20f   : >> { %1325 = vmatpush.bf16.msrb.mxu0 %v1312_v49  ;;  %1903 = vmatpush.bf16.msra.mxu2 %v1312_v49 }
 0x210   : >> { %v1028_v42 = vpop.f32.mrf.mxu3 }
 0x211   : >> { %v2511_v44 = vsel %vm2456_vm2, -3.4028235e+38, %v1028_v42  ;;  %v793_v42 = vadd.f32 %v1962_v38, %v2450_v54  ;;  %v783_v54 = vadd.f32 %v1962_v38, %v2438_v40 }
 0x212   : >> { %1083 = vmax.xlane.f32.xlu1 %v2511_v44 }
 0x213   : >> { %v858_v41 = vpack.c.bf16 %v793_v42, %v793_v42  ;;  %1326 = vmatpush.bf16.msrb.mxu0 %v1311_v53  ;;  %1904 = vmatpush.bf16.msra.mxu2 %v1311_v53  ;;  %v854_v0 = vpack.c.bf16 %v783_v54, %v783_v54 }
 0x215   : >> { %v1295_v58 = vunpack.c.l.b16 %v858_v41  ;;  %v1291_v40 = vunpack.c.l.b16 %v854_v0 }
 0x217   : >> { %v1309_v31 = vpack.c.b16 %v1296_v43, %v1295_v58  ;;  %1327 = vmatpush.bf16.msrb.mxu0 %v1310_v34  ;;  %1905 = vmatpush.bf16.msra.mxu2 %v1310_v34  ;;  %v1307_v38 = vpack.c.b16 %v1292_v52, %v1291_v40 }
 0x218   : >> { %v1030_v42 = vpop.f32.mrf.mxu3 }
 0x21b   : >> { %1328 = vmatpush.bf16.msrb.mxu0 %v1309_v31  ;;  %1906 = vmatpush.bf16.msra.mxu2 %v1309_v31 }
 0x21f   : >> { %1329 = vmatpush.bf16.msrb.mxu0 %v1308_v51  ;;  %1907 = vmatpush.bf16.msra.mxu2 %v1308_v51 }
 0x220   : >> { %v1033_v23 = vpop.f32.mrf.mxu3 }
 0x223   : >> { %1330 = vmatpush.bf16.msrb.mxu0 %v1307_v38  ;;  %1908 = vmatpush.bf16.msra.mxu2 %v1307_v38 }
 0x245   : >> { %v1068_v35 = vpop.xlane.xlu0 %1067 }
 0x246   : >> { %v1099_v33 = vsub.f32 %v2464_v55, %v1068_v35  ;;  %v2532_v55 = vsel %vm2456_vm2, -3.4028235e+38, %v1030_v42 }
 0x248   : >> { %v1115_v39 = vmul.f32 1.442695, %v1099_v33 }
 0x24a   : >> { %1963 = vpow2.f32 %v1115_v39 }
 0x24d   : >> { %v1070_v50 = vpop.xlane.xlu0 %1069 }
 0x24e   : >> { %v1100_v56 = vsub.f32 %v2471_v19, %v1070_v50  ;;  %v1035_v19 = vpop.f32.mrf.mxu3 }
 0x250   : >> { %v2524_v29 = vpop.eup %1963  ;;  %v1117_v63 = vmul.f32 1.442695, %v1100_v56 }
 0x251   : >> { %1147 = vadd.xlane.f32.xlu2 %v2524_v29 }
 0x252   : >> { %1965 = vpow2.f32 %v1117_v63 }
 0x255   : >> { %v1072_v25 = vpop.xlane.xlu1 %1071 }
 0x256   : >> { %v1101_v45 = vsub.f32 %v2476_v20, %v1072_v25  ;;  %v2541_v20 = vsel %vm2456_vm2, -3.4028235e+38, %v1033_v23  ;;  %v1038_v22 = vpop.f32.mrf.mxu3 }
 0x258   : >> { %v2528_v41 = vpop.eup %1965  ;;  %v1119_v27 = vmul.f32 1.442695, %v1101_v45 }
 0x259   : >> { %1149 = vadd.xlane.f32.xlu0 %v2528_v41  ;;  %1085 = vmax.xlane.f32.xlu2 %v2532_v55 }
 0x25a   : >> { %1967 = vpow2.f32 %v1119_v27 }
 0x25d   : >> { %v1074_v47 = vpop.xlane.xlu1 %1073 }
 0x25e   : >> { %v1102_v48 = vsub.f32 %v2481_v21, %v1074_v47  ;;  %v2550_v21 = vsel %vm2456_vm2, -3.4028235e+38, %v1035_v19  ;;  %v1040_v28 = vpop.f32.mrf.mxu3 }
 0x260   : >> { %v2537_v49 = vpop.eup %1967  ;;  %v1121_v53 = vmul.f32 1.442695, %v1102_v48 }
 0x261   : >> { %1151 = vadd.xlane.f32.xlu0 %v2537_v49  ;;  %1087 = vmax.xlane.f32.xlu2 %v2541_v20 }
 0x262   : >> { %1969 = vpow2.f32 %v1121_v53 }
 0x265   : >> { %v1076_v54 = vpop.xlane.xlu2 %1075 }
 0x266   : >> { %v1103_v26 = vsub.f32 %v2486_v24, %v1076_v54  ;;  %v2559_v24 = vsel %vm2456_vm2, -3.4028235e+38, %v1038_v22  ;;  %v1043_v40 = vpop.f32.mrf.mxu3 }
 0x268   : >> { %v2546_v57 = vpop.eup %1969  ;;  %v1123_v58 = vmul.f32 1.442695, %v1103_v26 }
 0x269   : >> { %1153 = vadd.xlane.f32.xlu1 %v2546_v57  ;;  %1089 = vmax.xlane.f32.xlu0 %v2550_v21 }
 0x26a   : >> { %1971 = vpow2.f32 %v1123_v58 }
 0x26d   : >> { %v1078_v43 = vpop.xlane.xlu2 %1077 }
 0x26e   : >> { %v1104_v59 = vsub.f32 %v2491_v30, %v1078_v43  ;;  %v2568_v30 = vsel %vm2456_vm2, -3.4028235e+38, %v1040_v28  ;;  %v1045_v38 = vpop.f32.mrf.mxu3 }
 0x270   : >> { %v2555_v36 = vpop.eup %1971  ;;  %v1125_v0 = vmul.f32 1.442695, %v1104_v59 }
 0x271   : >> { %1155 = vadd.xlane.f32.xlu1 %v2555_v36  ;;  %1091 = vmax.xlane.f32.xlu0 %v2559_v24 }
 0x272   : >> { %1973 = vpow2.f32 %v1125_v0 }
 0x275   : >> { %v1080_v18 = vpop.xlane.xlu0 %1079 }
 0x276   : >> { %v1105_v62 = vsub.f32 %v2496_v32, %v1080_v18  ;;  %v2577_v32 = vsel %vm2456_vm2, -3.4028235e+38, %v1043_v40 }
 0x278   : >> { %v2564_v34 = vpop.eup %1973  ;;  %v1127_v31 = vmul.f32 1.442695, %v1105_v62 }
 0x279   : >> { %1157 = vadd.xlane.f32.xlu2 %v2564_v34  ;;  %1093 = vmax.xlane.f32.xlu1 %v2568_v30 }
 0x27a   : >> { %1975 = vpow2.f32 %v1127_v31 }
 0x27d   : >> { %v1082_v52 = vpop.xlane.xlu1 %1081 }
 0x27e   : >> { %v1106_v61 = vsub.f32 %v2501_v37, %v1082_v52  ;;  %v2586_v37 = vsel %vm2456_vm2, -3.4028235e+38, %v1045_v38 }
 0x280   : >> { %v2573_v46 = vpop.eup %1975  ;;  %v1129_v51 = vmul.f32 1.442695, %v1106_v61 }
 0x281   : >> { %1159 = vadd.xlane.f32.xlu2 %v2573_v46  ;;  %1095 = vmax.xlane.f32.xlu1 %v2577_v32 }
 0x282   : >> { %1977 = vpow2.f32 %v1129_v51 }
 0x285   : >> { %v1084_v35 = vpop.xlane.xlu1 %1083 }
 0x286   : >> { %v1107_v33 = vsub.f32 %v2511_v44, %v1084_v35 }
 0x288   : >> { %v2582_v39 = vpop.eup %1977  ;;  %v1131_v42 = vmul.f32 1.442695, %v1107_v33 }
 0x289   : >> { %1161 = vadd.xlane.f32.xlu0 %v2582_v39  ;;  %1097 = vmax.xlane.f32.xlu2 %v2586_v37 }
 0x28a   : >> { %1979 = vpow2.f32 %v1131_v42 }
 0x290   : >> { %v2590_v50 = vpop.eup %1979 }
 0x291   : >> { %1163 = vadd.xlane.f32.xlu0 %v2590_v50 }
 0x2c4   : >> { %v1148_v56 = vpop.xlane.xlu2 %1147 }
 0x2c5   : >> { %1981 = vrcp.f32 %v1148_v56 }
 0x2cb   : >> { %v1982_v23 = vpop.eup %1981 }
 0x2cc   : >> { %v1150_v63 = vpop.xlane.xlu0 %1149  ;;  %v1086_v44 = vpop.xlane.xlu2 %1085  ;;  %v1195_v45 = vmul.f32 %v1982_v23, %v2524_v29 }
 0x2cd   : >> { %1983 = vrcp.f32 %v1150_v63  ;;  %v1108_v25 = vsub.f32 %v2532_v55, %v1086_v44 }
 0x2ce   : >> { %v1211_v53 = vpack.c.bf16 %v1195_v45, %v1195_v45 }
 0x2cf   : >> { %v1133_v60 = vmul.f32 1.442695, %v1108_v25 }
 0x2d0   : >> { %v1243_v55 = vunpack.c.l.b16 %v1211_v53 }
 0x2d1   : >> { %1985 = vpow2.f32 %v1133_v60 }
 0x2d3   : >> { %v1984_v27 = vpop.eup %1983 }
 0x2d4   : >> { %v1152_v19 = vpop.xlane.xlu0 %1151  ;;  %v1088_v47 = vpop.xlane.xlu2 %1087  ;;  %v1196_v48 = vmul.f32 %v1984_v27, %v2528_v41 }
 0x2d5   : >> { %v1109_v54 = vsub.f32 %v2541_v20, %v1088_v47  ;;  %1987 = vrcp.f32 %v1152_v19 }
 0x2d6   : >> { %v1212_v26 = vpack.c.bf16 %v1196_v48, %v1196_v48 }
 0x2d7   : >> { %v2597_v22 = vpop.eup %1985  ;;  %v1135_v58 = vmul.f32 1.442695, %v1109_v54 }
 0x2d8   : >> { %1165 = vadd.xlane.f32.xlu1 %v2597_v22  ;;  %v1244_v43 = vunpack.c.l.b16 %v1212_v26 }
 0x2d9   : >> { %1989 = vpow2.f32 %v1135_v58 }
 0x2da   : >> { %v1259_v29 = vpack.c.b16 %v1244_v43, %v1243_v55 }
 0x2db   : >> { %v1988_v28 = vpop.eup %1987 }
 0x2dc   : >> { %1331 = vmatmul.bf16.vlgmr.msrb.gmra.mxu0 %v1259_v29  ;;  %v1154_v59 = vpop.xlane.xlu1 %1153  ;;  %v1090_v0 = vpop.xlane.xlu0 %1089  ;;  %v1197_v62 = vmul.f32 %v1988_v28, %v2537_v49 }
 0x2dd   : >> { %1991 = vrcp.f32 %v1154_v59  ;;  %v1110_v41 = vsub.f32 %v2550_v21, %v1090_v0 }
 0x2de   : >> { %v1213_v51 = vpack.c.bf16 %v1197_v62, %v1197_v62 }
 0x2df   : >> { %v2601_v18 = vpop.eup %1989  ;;  %v1137_v20 = vmul.f32 1.442695, %v1110_v41 }
 0x2e0   : >> { %1167 = vadd.xlane.f32.xlu2 %v2601_v18  ;;  %v1245_v42 = vunpack.c.l.b16 %v1213_v51  ;;  %v1882_v51 = vld [vmem:[%s1398_s20] sm:$0xff] }
 0x2e1   : >> { %1993 = vpow2.f32 %v1137_v20 }
 0x2e3   : >> { %v1992_v31 = vpop.eup %1991 }
 0x2e4   : >> { %v1156_v40 = vpop.xlane.xlu1 %1155  ;;  %v1092_v52 = vpop.xlane.xlu0 %1091  ;;  %v1198_v61 = vmul.f32 %v1992_v31, %v2546_v57 }
 0x2e5   : >> { %v1111_v38 = vsub.f32 %v2559_v24, %v1092_v52  ;;  %1995 = vrcp.f32 %v1156_v40 }
 0x2e6   : >> { %v1214_v35 = vpack.c.bf16 %v1198_v61, %v1198_v61 }
 0x2e7   : >> { %v2607_v33 = vpop.eup %1993  ;;  %v1139_v21 = vmul.f32 1.442695, %v1111_v38 }
 0x2e8   : >> { %1169 = vadd.xlane.f32.xlu0 %v2607_v33  ;;  %v1246_v56 = vunpack.c.l.b16 %v1214_v35 }
 0x2e9   : >> { %1997 = vpow2.f32 %v1139_v21 }
 0x2ea   : >> { %v1260_v49 = vpack.c.b16 %v1246_v56, %v1245_v42 }
 0x2eb   : >> { %v1996_v23 = vpop.eup %1995 }
 0x2ec   : >> { %1336 = vmatmul.bf16.gmra.mxu0 %v1260_v49  ;;  %v1158_v63 = vpop.xlane.xlu2 %1157  ;;  %v1094_v44 = vpop.xlane.xlu1 %1093  ;;  %v1199_v60 = vmul.f32 %v1996_v23, %v2555_v36 }
 0x2ed   : >> { %1999 = vrcp.f32 %v1158_v63  ;;  %v1112_v57 = vsub.f32 %v2568_v30, %v1094_v44 }
 0x2ee   : >> { %v1215_v48 = vpack.c.bf16 %v1199_v60, %v1199_v60 }
 0x2ef   : >> { %v2611_v25 = vpop.eup %1997  ;;  %v1141_v24 = vmul.f32 1.442695, %v1112_v57 }
 0x2f0   : >> { %1171 = vadd.xlane.f32.xlu1 %v2611_v25  ;;  %v1247_v58 = vunpack.c.l.b16 %v1215_v48 }
 0x2f1   : >> { %2001 = vpow2.f32 %v1141_v24 }
 0x2f3   : >> { %v2000_v45 = vpop.eup %1999 }
 0x2f4   : >> { %v1160_v27 = vpop.xlane.xlu2 %1159  ;;  %v1096_v19 = vpop.xlane.xlu1 %1095  ;;  %v1200_v47 = vmul.f32 %v2000_v45, %v2564_v34 }
 0x2f5   : >> { %v1113_v53 = vsub.f32 %v2577_v32, %v1096_v19  ;;  %2003 = vrcp.f32 %v1160_v27 }
 0x2f6   : >> { %v1216_v54 = vpack.c.bf16 %v1200_v47, %v1200_v47 }
 0x2f7   : >> { %v2617_v26 = vpop.eup %2001  ;;  %v1143_v30 = vmul.f32 1.442695, %v1113_v53 }
 0x2f8   : >> { %1173 = vadd.xlane.f32.xlu2 %v2617_v26  ;;  %v1248_v55 = vunpack.c.l.b16 %v1216_v54 }
 0x2f9   : >> { %2005 = vpow2.f32 %v1143_v30 }
 0x2fa   : >> { %v1261_v36 = vpack.c.b16 %v1248_v55, %v1247_v58 }
 0x2fb   : >> { %v2004_v59 = vpop.eup %2003 }
 0x2fc   : >> { %1341 = vmatmul.bf16.gmra.mxu0 %v1261_v36  ;;  %v1162_v43 = vpop.xlane.xlu0 %1161  ;;  %v1098_v29 = vpop.xlane.xlu2 %1097  ;;  %v1201_v28 = vmul.f32 %v2004_v59, %v2573_v46  ;;  %v1883_v46 = vld [vmem:[%s1398_s20 + $0x8] sm:$0xff]  ;;  %s2042_s20 = sshra.s32 (%p409_p11), %s1588_s28, 4  ;;  %s2043_s20 = int_to_ptr.hbm [resolvable:$true] %s2042_s20 }
 0x2fd   : >> { %2007 = vrcp.f32 %v1162_v43  ;;  %v1114_v34 = vsub.f32 %v2586_v37, %v1098_v29  ;;  %1445 = vmatpush.bf16.msrb.mxu1 %v1883_v46  ;;  %s2044_s29 = scalar_lea.hbm (%p409_p11), %s2043_s20, 128  ;;  %p2049_p1 = scmp.lt.s32.totalorder (%p409_p11), %s2043_s20, %s2715_s10 }
 0x2fe   : >> { %v1217_v62 = vpack.c.bf16 %v1201_v28, %v1201_v28  ;;  %p2045_p12 = scmp.ne.s32.totalorder (%p409_p11), %s2043_s20, %s2044_s29  ;;  %p2050_p2 = scmp.lt.s32.totalorder (%p409_p11), %s2048_s26, %s2044_s29 }
 0x2ff   : >> { %v2621_v32 = vpop.eup %2005  ;;  %v1145_v0 = vmul.f32 1.442695, %v1114_v34 }
 0x300   : >> { %1175 = vadd.xlane.f32.xlu0 %v2621_v32  ;;  %v1249_v52 = vunpack.c.l.b16 %v1217_v62  ;;  %p2046_p13 = pnand (%p409_p11), %p2045_p12, %p2197_p5  ;;  %p2051_p3 = por (%p409_p11), %p2050_p2, %p2049_p1 }
 0x301   : >> { %2009 = vpow2.f32 %v1145_v0  ;;  %1446 = vmatpush.bf16.msrb.mxu1 %v1882_v51 }
 0x302   : > { %p2047_p0 = pneg (%p409_p11), %p2046_p13 }
 0x303   : >> { %v2008_v41 = vpop.eup %2007 }
 0x304   : >> { %v1202_v20 = vmul.f32 %v2008_v41, %v2582_v39  ;;  %v1164_v39 = vpop.xlane.xlu0 %1163  ;;  %p2052_p4 = pnand (%p409_p11), %p2051_p3, %p2047_p0 }
 0x305   : >> { %2011 = vrcp.f32 %v1164_v39 }
 0x306   : >> { %v1218_v31 = vpack.c.bf16 %v1202_v20, %v1202_v20 }
 0x307   : >> { %v2626_v40 = vpop.eup %2009 }
 0x308   : >> { %1177 = vadd.xlane.f32.xlu1 %v2626_v40  ;;  %v1250_v37 = vunpack.c.l.b16 %v1218_v31 }
 0x30a   : >> { %v1262_v61 = vpack.c.b16 %v1250_v37, %v1249_v52 }
 0x30b   : >> { %v2012_v35 = vpop.eup %2011 }
 0x30c   : >> { %1346 = vmatmul.bf16.gmra.mxu0 %v1262_v61  ;;  %v1203_v21 = vmul.f32 %v2012_v35, %v2590_v50 }
 0x30e   : >> { %v1219_v63 = vpack.c.bf16 %v1203_v21, %v1203_v21 }
 0x310   : >> { %v1251_v23 = vunpack.c.l.b16 %v1219_v63 }
 0x34b   : >> { %v1166_v38 = vpop.xlane.xlu1 %1165 }
 0x34c   : >> { %2013 = vrcp.f32 %v1166_v38 }
 0x352   : >> { %v2014_v42 = vpop.eup %2013 }
 0x353   : >> { %v1168_v56 = vpop.xlane.xlu2 %1167  ;;  %v1204_v49 = vmul.f32 %v2014_v42, %v2597_v22 }
 0x354   : >> { %2015 = vrcp.f32 %v1168_v56 }
 0x355   : >> { %v1220_v44 = vpack.c.bf16 %v1204_v49, %v1204_v49 }
 0x357   : >> { %v1252_v57 = vunpack.c.l.b16 %v1220_v44 }
 0x359   : >> { %v1332_v24 = vpop.f32.mrf.mxu0  ;;  %v1263_v60 = vpack.c.b16 %v1252_v57, %v1251_v23 }
 0x35a   : >> { %v2016_v27 = vpop.eup %2015 }
 0x35b   : >> { %v1170_v45 = vpop.xlane.xlu0 %1169  ;;  %1351 = vmatmul.bf16.gmra.mxu0 %v1263_v60  ;;  %v1205_v19 = vmul.f32 %v2016_v27, %v2601_v18 }
 0x35c   : >> { %2017 = vrcp.f32 %v1170_v45 }
 0x35d   : >> { %v1221_v22 = vpack.c.bf16 %v1205_v19, %v1205_v19 }
 0x35f   : >> { %v1253_v58 = vunpack.c.l.b16 %v1221_v22 }
 0x361   : >> { %v1334_v47 = vpop.f32.mrf.mxu0 }
 0x362   : >> { %v2018_v48 = vpop.eup %2017  ;;  %v1388_v50 = vpack.c.bf16 %v1334_v47, %v1332_v24 }
 0x363   : >> { %v1172_v53 = vpop.xlane.xlu1 %1171  ;;  %v1206_v54 = vmul.f32 %v2018_v48, %v2607_v33 }
 0x364   : >> { %1832 = vmatmul.msk.bf16.vlgmr.msrb.gmra.mxu1 %vm950_vm1, %v1388_v50  ;;  %2019 = vrcp.f32 %v1172_v53  ;;  %v1374_v53 = vld [vmem:[#allocation2 + $0x58] sm:$0xff] }
 0x365   : >> { %v1222_v30 = vpack.c.bf16 %v1206_v54, %v1206_v54 }
 0x367   : >> { %v1254_v55 = vunpack.c.l.b16 %v1222_v30 }
 0x369   : >> { %v1337_v36 = vpop.f32.mrf.mxu0  ;;  %v1264_v43 = vpack.c.b16 %v1254_v55, %v1253_v58  ;;  %v1375_v55 = vld [vmem:[#allocation2 + $0x18] sm:$0xff] }
 0x36a   : >> { %v2020_v59 = vpop.eup %2019 }
 0x36b   : >> { %1356 = vmatmul.bf16.gmra.mxu0 %v1264_v43  ;;  %v1174_v29 = vpop.xlane.xlu2 %1173  ;;  %v1207_v18 = vmul.f32 %v2020_v59, %v2611_v25  ;;  %v1376_v59 = vld [vmem:[#allocation2 + $0x50] sm:$0xff] }
 0x36c   : >> { %2021 = vrcp.f32 %v1174_v29 }
 0x36d   : >> { %v1223_v20 = vpack.c.bf16 %v1207_v18, %v1207_v18 }
 0x36f   : >> { %v1255_v31 = vunpack.c.l.b16 %v1223_v20 }
 0x371   : >> { %v1339_v34 = vpop.f32.mrf.mxu0 }
 0x372   : >> { %v2022_v0 = vpop.eup %2021  ;;  %v1389_v28 = vpack.c.bf16 %v1339_v34, %v1337_v36 }
 0x373   : >> { %v1176_v41 = vpop.xlane.xlu0 %1175  ;;  %v1208_v33 = vmul.f32 %v2022_v0, %v2617_v26 }
 0x374   : >> { %1833 = vmatmul.msk.bf16.gmra.mxu1 %vm950_vm1, %v1389_v28  ;;  %2023 = vrcp.f32 %v1176_v41  ;;  %v1377_v41 = vld [vmem:[#allocation2 + $0x68] sm:$0xff] }
 0x375   : >> { %v1224_v62 = vpack.c.bf16 %v1208_v33, %v1208_v33 }
 0x377   : >> { %v1256_v52 = vunpack.c.l.b16 %v1224_v62 }
 0x379   : >> { %v1342_v37 = vpop.f32.mrf.mxu0  ;;  %v1265_v61 = vpack.c.b16 %v1256_v52, %v1255_v31  ;;  %v1378_v31 = vld [vmem:[#allocation2 + $0x8] sm:$0xff] }
 0x37a   : >> { %v2024_v51 = vpop.eup %2023 }
 0x37b   : >> { %v1178_v46 = vpop.xlane.xlu1 %1177  ;;  %1361 = vmatmul.bf16.gmra.mxu0 %v1265_v61  ;;  %v1209_v25 = vmul.f32 %v2024_v51, %v2621_v32  ;;  %v1372_v32 = vld [vmem:[#allocation2 + $0x30] sm:$0xff]  ;;  %v1379_v51 = vld [vmem:[#allocation2 + $0x48] sm:$0xff] }
 0x37c   : >> { %2025 = vrcp.f32 %v1178_v46 }
 0x37d   : >> { %v1225_v21 = vpack.c.bf16 %v1209_v25, %v1209_v25 }
 0x37f   : >> { %v1257_v56 = vunpack.c.l.b16 %v1225_v21 }
 0x381   : >> { %v1344_v39 = vpop.f32.mrf.mxu0 }
 0x382   : >> { %v2026_v38 = vpop.eup %2025  ;;  %v1390_v35 = vpack.c.bf16 %v1344_v39, %v1342_v37 }
 0x383   : >> { %v1210_v26 = vmul.f32 %v2026_v38, %v2626_v40  ;;  %v1373_v40 = vld [vmem:[#allocation2] sm:$0xff] }
 0x384   : >> { %1834 = vmatmul.msk.bf16.gmra.mxu1 %vm950_vm1, %v1390_v35  ;;  %v1380_v38 = vld [vmem:[#allocation2 + $0x40] sm:$0xff] }
 0x385   : >> { %v1226_v42 = vpack.c.bf16 %v1210_v26, %v1210_v26  ;;  %v1381_v26 = vld [vmem:[#allocation2 + $0x20] sm:$0xff] }
 0x387   : >> { %v1258_v49 = vunpack.c.l.b16 %v1226_v42 }
 0x389   : >> { %v1347_v63 = vpop.f32.mrf.mxu0  ;;  %v1266_v44 = vpack.c.b16 %v1258_v49, %v1257_v56  ;;  %v1382_v49 = vld [vmem:[#allocation2 + $0x10] sm:$0xff] }
 0x38b   : >> { %1366 = vmatmul.bf16.vlgmr.msra.gmra.mxu2 %v1266_v44 }
 0x391   : >> { %v1349_v23 = vpop.f32.mrf.mxu0 }
 0x392   : >> { %v1391_v57 = vpack.c.bf16 %v1349_v23, %v1347_v63  ;;  %v1383_v23 = vld [vmem:[#allocation2 + $0x38] sm:$0xff] }
 0x394   : >> { %1835 = vmatmul.msk.bf16.gmra.mxu1 %vm950_vm1, %v1391_v57 }
 0x3d8   : >> { %v1352_v24 = vpop.f32.mrf.mxu0 }
 0x3e0   : >> { %v1354_v60 = vpop.f32.mrf.mxu0 }
 0x3e1   : >> { %v1392_v45 = vpack.c.bf16 %v1354_v60, %v1352_v24  ;;  %v1448_v27 = vpop.f32.mrf.mxu1 }
 0x3e2   : >> { %v1488_v19 = vadd.f32 %v1448_v27, %v1372_v32  ;;  %v1384_v32 = vld [vmem:[#allocation2 + $0x60] sm:$0xff]  ;;  %v1385_v27 = vld [vmem:[#allocation2 + $0x70] sm:$0xff] }
 0x3e3   : >> { %1836 = vmatmul.msk.bf16.gmra.mxu1 %vm950_vm1, %v1392_v45 }
 0x3e4   : >> { %1504 = vst [vmem:[#allocation2 + $0x30] sm:$0xff] %v1488_v19 }
 0x3e8   : >> { %v1357_v47 = vpop.f32.mrf.mxu0 }
 0x3e9   : >> { %v1450_v48 = vpop.f32.mrf.mxu1 }
 0x3ea   : >> { %v1489_v50 = vadd.f32 %v1450_v48, %v1373_v40 }
 0x3ec   : >> { %1505 = vst [vmem:[#allocation2] sm:$0xff] %v1489_v50 }
 0x3f0   : >> { %v1359_v54 = vpop.f32.mrf.mxu0 }
 0x3f1   : >> { %v1393_v22 = vpack.c.bf16 %v1359_v54, %v1357_v47  ;;  %v1453_v30 = vpop.f32.mrf.mxu1  ;;  %v1386_v47 = vld [vmem:[#allocation2 + $0x78] sm:$0xff] }
 0x3f2   : >> { %v1490_v58 = vadd.f32 %v1453_v30, %v1374_v53  ;;  %v1387_v53 = vld [vmem:[#allocation2 + $0x28] sm:$0xff]  ;;  %v1520_v30 = vld [vmem:[#allocation2 + $0x30] sm:$0xff] (%p409_p11) }
 0x3f3   : >> { %1837 = vmatmul.msk.bf16.gmra.mxu1 %vm950_vm1, %v1393_v22 }
 0x3f4   : >> { %1506 = vst [vmem:[#allocation2 + $0x58] sm:$0xff] %v1490_v58  ;;  %v2027_v58 = vld [vmem:[%s2714_s9] ss:$0 sm:$0xff] (%p409_p11) }
 0x3f8   : >> { %v1362_v36 = vpop.f32.mrf.mxu0 }
 0x3f9   : >> { %v1455_v43 = vpop.f32.mrf.mxu1 }
 0x3fa   : >> { %v1491_v29 = vadd.f32 %v1455_v43, %v1375_v55  ;;  %v1521_v55 = vld [vmem:[#allocation2] sm:$0xff] (%p409_p11) }
 0x3fc   : >> { %1507 = vst [vmem:[#allocation2 + $0x18] sm:$0xff] %v1491_v29  ;;  %v1540_v29 = vadd.f32 (%p409_p11), %v2027_v58, %v1520_v30 }
 0x3fe   : > { %1556 = vst [vmem:[%s2256_s21] sm:$0xff] (%p409_p11), %v1540_v29 }
 0x400   : >> { %v1364_v18 = vpop.f32.mrf.mxu0 }
 0x401   : >> { %v1394_v34 = vpack.c.bf16 %v1364_v18, %v1362_v36  ;;  %v1458_v0 = vpop.f32.mrf.mxu1  ;;  %v1522_v36 = vld [vmem:[#allocation2 + $0x58] sm:$0xff] (%p409_p11) }
 0x402   : >> { %v1492_v28 = vadd.f32 %v1458_v0, %v1376_v59  ;;  %v1541_v59 = vadd.f32 (%p409_p11), %v2027_v58, %v1521_v55  ;;  %v1542_v18 = vadd.f32 (%p409_p11), %v2027_v58, %v1522_v36 }
 0x403   : >> { %1838 = vmatmul.msk.bf16.gmra.mxu1 %vm950_vm1, %v1394_v34  ;;  %v1523_v43 = vld [vmem:[#allocation2 + $0x18] sm:$0xff] (%p409_p11) }
 0x404   : >> { %1508 = vst [vmem:[#allocation2 + $0x50] sm:$0xff] %v1492_v28  ;;  %v1543_v28 = vadd.f32 (%p409_p11), %v2027_v58, %v1523_v43 }
 0x405   : > { %1557 = vst [vmem:[%s2256_s21 + $0x8] sm:$0xff] (%p409_p11), %v1541_v59 }
 0x406   : > { %1558 = vst [vmem:[%s2256_s21 + $0x10] sm:$0xff] (%p409_p11), %v1542_v18 }
 0x407   : > { %1559 = vst [vmem:[%s2256_s21 + $0x18] sm:$0xff] (%p409_p11), %v1543_v28 }
 0x409   : >> { %v1460_v33 = vpop.f32.mrf.mxu1 }
 0x40a   : >> { %v1493_v20 = vadd.f32 %v1460_v33, %v1377_v41 }
 0x40b   : > { %v1524_v34 = vld [vmem:[#allocation2 + $0x50] sm:$0xff] (%p409_p11) }
 0x40c   : >> { %1509 = vst [vmem:[#allocation2 + $0x68] sm:$0xff] %v1493_v20  ;;  %v1544_v1 = vadd.f32 (%p409_p11), %v2027_v58, %v1524_v34 }
 0x40e   : >> { %v1367_v62 = vpop.f32.mrf.mxu2  ;;  %1560 = vst [vmem:[%s2256_s21 + $0x20] sm:$0xff] (%p409_p11), %v1544_v1 }
 0x411   : >> { %v1463_v52 = vpop.f32.mrf.mxu1 }
 0x412   : >> { %v1494_v37 = vadd.f32 %v1463_v52, %v1378_v31 }
 0x413   : > { %v1525_v0 = vld [vmem:[#allocation2 + $0x68] sm:$0xff] (%p409_p11) }
 0x414   : >> { %1510 = vst [vmem:[#allocation2 + $0x8] sm:$0xff] %v1494_v37  ;;  %v1545_v3 = vadd.f32 (%p409_p11), %v2027_v58, %v1525_v0 }
 0x416   : >> { %v1369_v61 = vpop.f32.mrf.mxu2  ;;  %1561 = vst [vmem:[%s2256_s21 + $0x28] sm:$0xff] (%p409_p11), %v1545_v3 }
 0x417   : >> { %v1395_v46 = vpack.c.bf16 %v1369_v61, %v1367_v62 }
 0x419   : >> { %v1465_v25 = vpop.f32.mrf.mxu1  ;;  %1839 = vmatmul.msk.bf16.gmra.mxu1 %vm950_vm1, %v1395_v46 }
 0x41a   : >> { %v1495_v39 = vadd.f32 %v1465_v25, %v1379_v51 }
 0x41b   : > { %v1526_v41 = vld [vmem:[#allocation2 + $0x8] sm:$0xff] (%p409_p11) }
 0x41c   : >> { %1511 = vst [vmem:[#allocation2 + $0x48] sm:$0xff] %v1495_v39  ;;  %v1546_v5 = vadd.f32 (%p409_p11), %v2027_v58, %v1526_v41 }
 0x41e   : > { %1562 = vst [vmem:[%s2256_s21 + $0x30] sm:$0xff] (%p409_p11), %v1546_v5 }
 0x423   : > { %v1527_v2 = vld [vmem:[#allocation2 + $0x48] sm:$0xff] (%p409_p11) }
 0x424   : > { %v1547_v7 = vadd.f32 (%p409_p11), %v2027_v58, %v1527_v2 }
 0x426   : > { %1563 = vst [vmem:[%s2256_s21 + $0x38] sm:$0xff] (%p409_p11), %v1547_v7 }
 0x460   : >> { %v1468_v35 = vpop.f32.mrf.mxu1 }
 0x461   : >> { %v1496_v21 = vadd.f32 %v1468_v35, %v1380_v38 }
 0x463   : >> { %1512 = vst [vmem:[#allocation2 + $0x40] sm:$0xff] %v1496_v21 }
 0x468   : >> { %v1470_v42 = vpop.f32.mrf.mxu1 }
 0x469   : >> { %v1497_v56 = vadd.f32 %v1470_v42, %v1381_v26 }
 0x46a   : > { %v1528_v4 = vld [vmem:[#allocation2 + $0x40] sm:$0xff] (%p409_p11) }
 0x46b   : >> { %1513 = vst [vmem:[#allocation2 + $0x20] sm:$0xff] %v1497_v56  ;;  %v1548_v9 = vadd.f32 (%p409_p11), %v2027_v58, %v1528_v4 }
 0x46d   : > { %1564 = vst [vmem:[%s2256_s21 + $0x40] sm:$0xff] (%p409_p11), %v1548_v9 }
 0x470   : >> { %v1473_v63 = vpop.f32.mrf.mxu1 }
 0x471   : >> { %v1498_v44 = vadd.f32 %v1473_v63, %v1382_v49 }
 0x472   : > { %v1529_v6 = vld [vmem:[#allocation2 + $0x20] sm:$0xff] (%p409_p11) }
 0x473   : >> { %1514 = vst [vmem:[#allocation2 + $0x10] sm:$0xff] %v1498_v44  ;;  %v1549_v11 = vadd.f32 (%p409_p11), %v2027_v58, %v1529_v6 }
 0x475   : > { %1565 = vst [vmem:[%s2256_s21 + $0x48] sm:$0xff] (%p409_p11), %v1549_v11 }
 0x478   : >> { %v1475_v57 = vpop.f32.mrf.mxu1 }
 0x479   : >> { %v1499_v24 = vadd.f32 %v1475_v57, %v1383_v23 }
 0x47a   : > { %v1530_v8 = vld [vmem:[#allocation2 + $0x10] sm:$0xff] (%p409_p11) }
 0x47b   : >> { %1515 = vst [vmem:[#allocation2 + $0x38] sm:$0xff] %v1499_v24  ;;  %v1550_v13 = vadd.f32 (%p409_p11), %v2027_v58, %v1530_v8 }
 0x47d   : > { %1566 = vst [vmem:[%s2256_s21 + $0x50] sm:$0xff] (%p409_p11), %v1550_v13 }
 0x480   : >> { %v1478_v60 = vpop.f32.mrf.mxu1 }
 0x481   : >> { %v1500_v45 = vadd.f32 %v1478_v60, %v1384_v32 }
 0x482   : > { %v1531_v10 = vld [vmem:[#allocation2 + $0x38] sm:$0xff] (%p409_p11) }
 0x483   : >> { %1516 = vst [vmem:[#allocation2 + $0x60] sm:$0xff] %v1500_v45  ;;  %v1551_v15 = vadd.f32 (%p409_p11), %v2027_v58, %v1531_v10 }
 0x485   : > { %1567 = vst [vmem:[%s2256_s21 + $0x58] sm:$0xff] (%p409_p11), %v1551_v15 }
 0x488   : >> { %v1480_v19 = vpop.f32.mrf.mxu1 }
 0x489   : >> { %v1501_v40 = vadd.f32 %v1480_v19, %v1385_v27 }
 0x48a   : > { %v1532_v12 = vld [vmem:[#allocation2 + $0x60] sm:$0xff] (%p409_p11) }
 0x48b   : >> { %1517 = vst [vmem:[#allocation2 + $0x70] sm:$0xff] %v1501_v40  ;;  %v1552_v17 = vadd.f32 (%p409_p11), %v2027_v58, %v1532_v12 }
 0x48d   : > { %1568 = vst [vmem:[%s2256_s21 + $0x60] sm:$0xff] (%p409_p11), %v1552_v17 }
 0x492   : > { %v1533_v14 = vld [vmem:[#allocation2 + $0x70] sm:$0xff] (%p409_p11) }
 0x493   : > { %v1553_v20 = vadd.f32 (%p409_p11), %v2027_v58, %v1533_v14 }
 0x495   : > { %1569 = vst [vmem:[%s2256_s21 + $0x68] sm:$0xff] (%p409_p11), %v1553_v20 }
 0x496   : >> { %v1483_v48 = vpop.f32.mrf.mxu1 }
 0x497   : >> { %v1502_v50 = vadd.f32 %v1483_v48, %v1386_v47 }
 0x499   : >> { %1518 = vst [vmem:[#allocation2 + $0x78] sm:$0xff] %v1502_v50 }
 0x49d   : > { %411 = sbr.rel (!%p409_p11) target bundleno = 39 (0x27), region = 112 }
 0x49e   : >> { %v1485_v54 = vpop.f32.mrf.mxu1 }
 0x49f   : >> { %v1503_v22 = vadd.f32 %v1485_v54, %v1387_v53 }
 0x4a0   : > { %v1534_v16 = vld [vmem:[#allocation2 + $0x78] sm:$0xff] (%p409_p11) }
 0x4a1   : >> { %1519 = vst [vmem:[#allocation2 + $0x28] sm:$0xff] %v1503_v22  ;;  %v1554_v62 = vadd.f32 (%p409_p11), %v2027_v58, %v1534_v16 }
 0x4a3   : > { %1570 = vst [vmem:[%s2256_s21 + $0x70] sm:$0xff] %v1554_v62 }
 0x4a8   : > { %v1535_v33 = vld [vmem:[#allocation2 + $0x28] sm:$0xff] }
 0x4a9   : > { %v1555_v31 = vadd.f32 %v2027_v58, %v1535_v33 }
 0x4ab   : > { %1571 = vst [vmem:[%s2256_s21 + $0x78] sm:$0xff] %v1555_v31 }
 0x4ac   : > { %2055 = shalt.err (!%p2052_p4)
}
 0x4ad   : > { %s2102_s25 = smov 128   ;;  %s2103_s21 = smov 8  }
 0x4ae   : > { %1909 = dma.vmem_to_hbm [thread:$0]  (%p2197_p5), %s1586_s17, 2048, %s1588_s28, %s1573_s18, %s2102_s25, %s2102_s25, %s2103_s21  }
 0x4af PF: > { %p1915_p7 = scmp.ge.s32.totalorder %s2094_s16, 2  ;;  %s1602_s11 = sand.u32 1, %s2082_s13  }
 0x4b0   : > { %s1603_s27 = scalar_lea.sflag [#allocation4], %s1602_s11 }
 0x4b1   : > { %p1912_p8 = pnand %p1915_p7, %p2201_p6 }
 0x4b3   : > { %p1913_p9 = pneg %p1912_p8 }
 0x4b5   : > { %2077 = dma.done.wait (%p1913_p9), %s1603_s27, 2048  }
 0x4b6   : > { %2079 = vsyncadd (%p1913_p9), %s1603_s27, 4294965248  ;;  %p20_p10 = scmp.ge.s32.totalorder %s2184_s19, 4   ;;  %s2720_s13 = smov %s2086_s14 }
 0x4b7   : > { %s2721_s14 = smov %s2090_s15  ;;  %s2722_s15 = smov %s2195_s22 }
 0x4b8   : > { %s2723_s16 = smov %s2184_s19  ;;  %22 = sbr.rel (!%p20_p10) target bundleno = 3 (0x3), region = 123 }
 0x4bd   :  { %1609 = vsyncpa [#allocation4], 1 }
 0x4be   :  { %1611 = vsyncpa [#allocation4 + $0x1], 1 }

</bundles_post_ra>
